<compile_context>
chip_gen: v5e
topology: v5e:2x2
jax: 0.10.0
libtpu: 0.0.40
codegen_flags: <defaults>
</compile_context>

<pallas_src>
import jax
import jax.numpy as jnp
from jax.experimental import pallas as pl
from jax.experimental.pallas import tpu as pltpu


def bottleneck_kernel(x_ref, w1_ref, w2_ref, w3_ref, b1_ref, b2_ref, b3_ref,
                      out_ref, h1pad_ref, patch_ref):
    # x_ref    : [1, H, W, Cin]   unpadded input block (one image)
    # out_ref  : [1, H, W, Cout]
    # h1pad_ref: VMEM scratch [H+2, W+2, P]  (zero-padded conv2 input)
    # patch_ref: VMEM scratch [H*W, 9*P]     (im2col patches)
    H, W, Cin = x_ref.shape[1], x_ref.shape[2], x_ref.shape[3]
    P = w1_ref.shape[1]
    Cout = w3_ref.shape[1]

    # Leading-dim-only reshape (minor dim unchanged -> cheap on TPU layouts).
    x = x_ref[0].reshape(H * W, Cin)          # f32; also used as the residual

    # ---- conv1 (1x1, BN scale folded) + bias + relu (interior only) -------
    h1 = jnp.dot(x.astype(jnp.bfloat16), w1_ref[...],
                 preferred_element_type=jnp.float32)
    h1 = jnp.maximum(h1 + b1_ref[...], 0.0)

    # Zero-pad h1 into the VMEM scratch (PyTorch pads conv2's input with
    # zeros).  Re-zeroed every grid step so megacore grid partitioning can
    # never observe a stale ring.
    h1pad_ref[...] = jnp.zeros_like(h1pad_ref)
    h1pad_ref[1:1 + H, 1:1 + W, :] = h1.reshape(H, W, P)

    # ---- conv2 (3x3, stride=1, pad=1) as a single im2col matmul -----------
    # Assemble [H*W, 9P] patches, then one MXU contraction over K = 9P.
    for dy in range(3):
        for dx in range(3):
            k = dy * 3 + dx
            win = h1pad_ref[dy:dy + H, dx:dx + W, :].reshape(H * W, P)
            patch_ref[:, k * P:(k + 1) * P] = win
    h2 = jnp.dot(patch_ref[...].astype(jnp.bfloat16), w2_ref[...],
                 preferred_element_type=jnp.float32)
    h2 = jnp.maximum(h2 + b2_ref[...], 0.0)                 # bn2 bias + relu

    # ---- conv3 (1x1, BN folded) + identity residual + relu ----------------
    h3 = jnp.dot(h2.astype(jnp.bfloat16), w3_ref[...],
                 preferred_element_type=jnp.float32)
    out = jnp.maximum(h3 + b3_ref[...] + x, 0.0)
    out_ref[0] = out.reshape(H, W, Cout)


@jax.jit
def bottleneck_forward(x, w1, w2, w3, b1, b2, b3):
    # x: [N, H, W, Cin] float32 (NHWC).  Requires Cin == 4 * planes
    # (stride=1 / downsample=None identity-residual path).
    N, H, W, Cin = x.shape
    P = w1.shape[1]
    Cout = w3.shape[1]
    assert Cin == Cout, "identity residual requires inplanes == 4*planes"

    full = lambda a: pl.BlockSpec(a.shape, lambda n: (0,) * a.ndim)
    grid_spec = pltpu.PrefetchScalarGridSpec(
        num_scalar_prefetch=0,
        grid=(N,),
        in_specs=[
            pl.BlockSpec((1, H, W, Cin), lambda n: (n, 0, 0, 0)),
            full(w1), full(w2), full(w3),
            full(b1), full(b2), full(b3),
        ],
        out_specs=pl.BlockSpec((1, H, W, Cout), lambda n: (n, 0, 0, 0)),
        scratch_shapes=[
            pltpu.VMEM((H + 2, W + 2, P), jnp.float32),   # padded conv2 input
            pltpu.VMEM((H * W, 9 * P), jnp.float32),      # im2col patches
        ],
    )
    return pl.pallas_call(
        bottleneck_kernel,
        out_shape=jax.ShapeDtypeStruct((N, H, W, Cout), jnp.float32),
        grid_spec=grid_spec,
        compiler_params=pltpu.CompilerParams(
            dimension_semantics=("parallel",)),
    )(x, w1, w2, w3, b1, b2, b3)


def make_raw_params(key, inplanes, planes):
    """Raw conv weights; inference-mode BN folded to per-channel (scale, bias)."""
    ks = jax.random.split(key, 12)
    P, Cout = planes, planes * 4
    eps = 1e-5

    w1 = jax.random.normal(ks[0], (inplanes, P), jnp.float32) * 0.1
    w2 = jax.random.normal(ks[1], (9, P, P), jnp.float32) * 0.1   # [tap,cin,cout]
    w3 = jax.random.normal(ks[2], (P, Cout), jnp.float32) * 0.1

    def bn_fold(kg, kb, km, kv, c):
        gamma = jax.random.uniform(kg, (c,), jnp.float32, 0.5, 1.5)
        beta = jax.random.normal(kb, (c,), jnp.float32) * 0.1
        rmean = jax.random.normal(km, (c,), jnp.float32) * 0.1
        rvar = jax.random.uniform(kv, (c,), jnp.float32, 0.5, 1.5)
        scale = gamma / jnp.sqrt(rvar + eps)
        bias = beta - rmean * scale
        return scale.reshape(1, c), bias.reshape(1, c)

    s1, b1 = bn_fold(ks[3], ks[4], ks[5], ks[6], P)
    s2, b2 = bn_fold(ks[7], ks[8], ks[9], ks[10], P)
    s3, b3 = bn_fold(ks[11], ks[3], ks[7], ks[0], Cout)  # deterministic reuse
    return w1, w2, w3, s1, b1, s2, b2, s3, b3


def prepare_kernel_params(w1, w2, w3, s1, b1, s2, b2, s3, b3):
    """Fold BN scales into conv weights (output-channel axis); cast to bf16."""
    P = w1.shape[1]
    w1f = (w1 * s1).astype(jnp.bfloat16)                            # [Cin, P]
    w2f = (w2 * s2.reshape(1, 1, P)).reshape(9 * P, P).astype(jnp.bfloat16)
    w3f = (w3 * s3).astype(jnp.bfloat16)                            # [P, Cout]
    return w1f, w2f, w3f, b1, b2, b3


def reference_forward(x, w1, w2, w3, s1, b1, s2, b2, s3, b3):
    """Pure-JAX f32 reference (XLA convs) for a correctness check."""
    P = w1.shape[1]
    h = jnp.einsum('nhwc,cd->nhwd', x, w1) * s1 + b1
    h = jax.nn.relu(h)
    w2_hwio = w2.reshape(3, 3, P, P)
    h = jax.lax.conv_general_dilated(
        h, w2_hwio, window_strides=(1, 1), padding='SAME',
        dimension_numbers=('NHWC', 'HWIO', 'NHWC'))
    h = jax.nn.relu(h * s2 + b2)
    h = jnp.einsum('nhwc,cd->nhwd', h, w3) * s3 + b3
    return jax.nn.relu(h + x)


if __name__ == "__main__":
    key = jax.random.PRNGKey(0)
    kx, kp = jax.random.split(key)

    # Bottleneck(inplanes=16, planes=4, stride=1, downsample=None)
    N, H, W = 2, 16, 16
    planes = 4
    inplanes = planes * 4  # identity residual path

    x = jax.random.normal(kx, (N, H, W, inplanes), jnp.float32)
    raw = make_raw_params(kp, inplanes, planes)
    kparams = prepare_kernel_params(*raw)

    out = bottleneck_forward(x, *kparams)
    out = jax.block_until_ready(out)

    ref = reference_forward(x, *raw)
    assert out.shape == ref.shape == (N, H, W, inplanes)
    max_err = float(jnp.max(jnp.abs(out - ref)))
    # bf16 matmul operands (f32 accumulation) vs. the f32 reference.
    assert jnp.allclose(out, ref, rtol=3e-2, atol=3e-2), max_err

    print("KERNEL_OK")
</pallas_src>

<mosaic_0001>
module attributes {stable_mosaic.version = 11 : i64} {
  func.func @bottleneck_kernel(%arg0: i32, %arg1: memref<1x16x16x16xf32, #tpu.memory_space<vmem>>, %arg2: memref<16x4xbf16, #tpu.memory_space<vmem>>, %arg3: memref<36x4xbf16, #tpu.memory_space<vmem>>, %arg4: memref<4x16xbf16, #tpu.memory_space<vmem>>, %arg5: memref<1x4xf32, #tpu.memory_space<vmem>>, %arg6: memref<1x4xf32, #tpu.memory_space<vmem>>, %arg7: memref<1x16xf32, #tpu.memory_space<vmem>>, %arg8: memref<1x16x16x16xf32, #tpu.memory_space<vmem>>, %arg9: memref<18x18x4xf32, #tpu.memory_space<vmem>>, %arg10: memref<256x36xf32, #tpu.memory_space<vmem>>) attributes {dimension_semantics = [#tpu.dimension_semantics<parallel>], iteration_bounds = array<i64: 2>, scalar_prefetch = 0 : i64, scratch_operands = 2 : i64, tpu.core_type = #tpu.core_type<tc>, window_params = [{transform_indices = @transform_0, window_bounds = array<i64: 1, 16, 16, 16>}, {pipeline_mode = #tpu.pipeline_mode<synchronous>, transform_indices = @transform_1, window_bounds = array<i64: 16, 4>}, {pipeline_mode = #tpu.pipeline_mode<synchronous>, transform_indices = @transform_2, window_bounds = array<i64: 36, 4>}, {pipeline_mode = #tpu.pipeline_mode<synchronous>, transform_indices = @transform_3, window_bounds = array<i64: 4, 16>}, {pipeline_mode = #tpu.pipeline_mode<synchronous>, transform_indices = @transform_4, window_bounds = array<i64: 1, 4>}, {pipeline_mode = #tpu.pipeline_mode<synchronous>, transform_indices = @transform_5, window_bounds = array<i64: 1, 4>}, {pipeline_mode = #tpu.pipeline_mode<synchronous>, transform_indices = @transform_6, window_bounds = array<i64: 1, 16>}, {transform_indices = @transform_7, window_bounds = array<i64: 1, 16, 16, 16>}]} {
    %c0 = arith.constant 0 : index
    %c0_0 = arith.constant 0 : index
    %c0_1 = arith.constant 0 : index
    %c0_2 = arith.constant 0 : index
    %0 = vector.load %arg1[%c0, %c0_0, %c0_1, %c0_2] : memref<1x16x16x16xf32, #tpu.memory_space<vmem>>, vector<1x16x16x16xf32>
    %1 = vector.shape_cast %0 : vector<1x16x16x16xf32> to vector<16x16x16xf32>
    %2 = vector.shape_cast %1 : vector<16x16x16xf32> to vector<256x16xf32>
    %3 = arith.truncf %2 : vector<256x16xf32> to vector<256x16xbf16>
    %c0_3 = arith.constant 0 : index
    %c0_4 = arith.constant 0 : index
    %4 = vector.load %arg2[%c0_3, %c0_4] : memref<16x4xbf16, #tpu.memory_space<vmem>>, vector<16x4xbf16>
    %cst = arith.constant dense<0.000000e+00> : vector<256x4xf32>
    %5 = tpu.matmul %3, %4, %cst {dimension_numbers = #tpu.dot_dimension_numbers<[1], [0], [0], [1], [0, 0, 1, 1], [], []>} : vector<256x16xbf16>, vector<16x4xbf16>, vector<256x4xf32> -> vector<256x4xf32>
    %c0_5 = arith.constant 0 : index
    %c0_6 = arith.constant 0 : index
    %6 = vector.load %arg5[%c0_5, %c0_6] : memref<1x4xf32, #tpu.memory_space<vmem>>, vector<1x4xf32>
    %7 = vector.broadcast %6 : vector<1x4xf32> to vector<256x4xf32>
    %8 = arith.addf %5, %7 : vector<256x4xf32>
    %cst_7 = arith.constant 0.000000e+00 : f32
    %9 = vector.broadcast %cst_7 : f32 to vector<256x4xf32>
    %10 = arith.maximumf %8, %9 : vector<256x4xf32>
    %cst_8 = arith.constant 0.000000e+00 : f32
    %11 = vector.broadcast %cst_8 : f32 to vector<18x18x4xf32>
    %c0_9 = arith.constant 0 : index
    %c0_10 = arith.constant 0 : index
    %c0_11 = arith.constant 0 : index
    %12 = vector.load %arg9[%c0_9, %c0_10, %c0_11] : memref<18x18x4xf32, #tpu.memory_space<vmem>>, vector<18x18x4xf32>
    tpu.vector_store %arg9[%c0_9, %c0_10, %c0_11], %11 {strides = array<i32>} : memref<18x18x4xf32, #tpu.memory_space<vmem>>, vector<18x18x4xf32>,
    %13 = vector.shape_cast %10 : vector<256x4xf32> to vector<16x16x4xf32>
    %c1 = arith.constant 1 : index
    %c1_12 = arith.constant 1 : index
    %c0_13 = arith.constant 0 : index
    %14 = vector.load %arg9[%c1, %c1_12, %c0_13] : memref<18x18x4xf32, #tpu.memory_space<vmem>>, vector<16x16x4xf32>
    tpu.vector_store %arg9[%c1, %c1_12, %c0_13], %13 {strides = array<i32>} : memref<18x18x4xf32, #tpu.memory_space<vmem>>, vector<16x16x4xf32>,
    %c0_14 = arith.constant 0 : index
    %c0_15 = arith.constant 0 : index
    %c0_16 = arith.constant 0 : index
    %15 = vector.load %arg9[%c0_14, %c0_15, %c0_16] : memref<18x18x4xf32, #tpu.memory_space<vmem>>, vector<16x16x4xf32>
    %16 = vector.shape_cast %15 : vector<16x16x4xf32> to vector<256x4xf32>
    %c0_17 = arith.constant 0 : index
    %c0_18 = arith.constant 0 : index
    %17 = vector.load %arg10[%c0_17, %c0_18] : memref<256x36xf32, #tpu.memory_space<vmem>>, vector<256x4xf32>
    tpu.vector_store %arg10[%c0_17, %c0_18], %16 {strides = array<i32>} : memref<256x36xf32, #tpu.memory_space<vmem>>, vector<256x4xf32>,
    %c0_19 = arith.constant 0 : index
    %c1_20 = arith.constant 1 : index
    %c0_21 = arith.constant 0 : index
    %18 = vector.load %arg9[%c0_19, %c1_20, %c0_21] : memref<18x18x4xf32, #tpu.memory_space<vmem>>, vector<16x16x4xf32>
    %19 = vector.shape_cast %18 : vector<16x16x4xf32> to vector<256x4xf32>
    %c0_22 = arith.constant 0 : index
    %c4 = arith.constant 4 : index
    %20 = vector.load %arg10[%c0_22, %c4] : memref<256x36xf32, #tpu.memory_space<vmem>>, vector<256x4xf32>
    tpu.vector_store %arg10[%c0_22, %c4], %19 {strides = array<i32>} : memref<256x36xf32, #tpu.memory_space<vmem>>, vector<256x4xf32>,
    %c0_23 = arith.constant 0 : index
    %c2 = arith.constant 2 : index
    %c0_24 = arith.constant 0 : index
    %21 = vector.load %arg9[%c0_23, %c2, %c0_24] : memref<18x18x4xf32, #tpu.memory_space<vmem>>, vector<16x16x4xf32>
    %22 = vector.shape_cast %21 : vector<16x16x4xf32> to vector<256x4xf32>
    %c0_25 = arith.constant 0 : index
    %c8 = arith.constant 8 : index
    %23 = vector.load %arg10[%c0_25, %c8] : memref<256x36xf32, #tpu.memory_space<vmem>>, vector<256x4xf32>
    tpu.vector_store %arg10[%c0_25, %c8], %22 {strides = array<i32>} : memref<256x36xf32, #tpu.memory_space<vmem>>, vector<256x4xf32>,
    %c1_26 = arith.constant 1 : index
    %c0_27 = arith.constant 0 : index
    %c0_28 = arith.constant 0 : index
    %24 = vector.load %arg9[%c1_26, %c0_27, %c0_28] : memref<18x18x4xf32, #tpu.memory_space<vmem>>, vector<16x16x4xf32>
    %25 = vector.shape_cast %24 : vector<16x16x4xf32> to vector<256x4xf32>
    %c0_29 = arith.constant 0 : index
    %c12 = arith.constant 12 : index
    %26 = vector.load %arg10[%c0_29, %c12] : memref<256x36xf32, #tpu.memory_space<vmem>>, vector<256x4xf32>
    tpu.vector_store %arg10[%c0_29, %c12], %25 {strides = array<i32>} : memref<256x36xf32, #tpu.memory_space<vmem>>, vector<256x4xf32>,
    %c1_30 = arith.constant 1 : index
    %c1_31 = arith.constant 1 : index
    %c0_32 = arith.constant 0 : index
    %27 = vector.load %arg9[%c1_30, %c1_31, %c0_32] : memref<18x18x4xf32, #tpu.memory_space<vmem>>, vector<16x16x4xf32>
    %28 = vector.shape_cast %27 : vector<16x16x4xf32> to vector<256x4xf32>
    %c0_33 = arith.constant 0 : index
    %c16 = arith.constant 16 : index
    %29 = vector.load %arg10[%c0_33, %c16] : memref<256x36xf32, #tpu.memory_space<vmem>>, vector<256x4xf32>
    tpu.vector_store %arg10[%c0_33, %c16], %28 {strides = array<i32>} : memref<256x36xf32, #tpu.memory_space<vmem>>, vector<256x4xf32>,
    %c1_34 = arith.constant 1 : index
    %c2_35 = arith.constant 2 : index
    %c0_36 = arith.constant 0 : index
    %30 = vector.load %arg9[%c1_34, %c2_35, %c0_36] : memref<18x18x4xf32, #tpu.memory_space<vmem>>, vector<16x16x4xf32>
    %31 = vector.shape_cast %30 : vector<16x16x4xf32> to vector<256x4xf32>
    %c0_37 = arith.constant 0 : index
    %c20 = arith.constant 20 : index
    %32 = vector.load %arg10[%c0_37, %c20] : memref<256x36xf32, #tpu.memory_space<vmem>>, vector<256x4xf32>
    tpu.vector_store %arg10[%c0_37, %c20], %31 {strides = array<i32>} : memref<256x36xf32, #tpu.memory_space<vmem>>, vector<256x4xf32>,
    %c2_38 = arith.constant 2 : index
    %c0_39 = arith.constant 0 : index
    %c0_40 = arith.constant 0 : index
    %33 = vector.load %arg9[%c2_38, %c0_39, %c0_40] : memref<18x18x4xf32, #tpu.memory_space<vmem>>, vector<16x16x4xf32>
    %34 = vector.shape_cast %33 : vector<16x16x4xf32> to vector<256x4xf32>
    %c0_41 = arith.constant 0 : index
    %c24 = arith.constant 24 : index
    %35 = vector.load %arg10[%c0_41, %c24] : memref<256x36xf32, #tpu.memory_space<vmem>>, vector<256x4xf32>
    tpu.vector_store %arg10[%c0_41, %c24], %34 {strides = array<i32>} : memref<256x36xf32, #tpu.memory_space<vmem>>, vector<256x4xf32>,
    %c2_42 = arith.constant 2 : index
    %c1_43 = arith.constant 1 : index
    %c0_44 = arith.constant 0 : index
    %36 = vector.load %arg9[%c2_42, %c1_43, %c0_44] : memref<18x18x4xf32, #tpu.memory_space<vmem>>, vector<16x16x4xf32>
    %37 = vector.shape_cast %36 : vector<16x16x4xf32> to vector<256x4xf32>
    %c0_45 = arith.constant 0 : index
    %c28 = arith.constant 28 : index
    %38 = vector.load %arg10[%c0_45, %c28] : memref<256x36xf32, #tpu.memory_space<vmem>>, vector<256x4xf32>
    tpu.vector_store %arg10[%c0_45, %c28], %37 {strides = array<i32>} : memref<256x36xf32, #tpu.memory_space<vmem>>, vector<256x4xf32>,
    %c2_46 = arith.constant 2 : index
    %c2_47 = arith.constant 2 : index
    %c0_48 = arith.constant 0 : index
    %39 = vector.load %arg9[%c2_46, %c2_47, %c0_48] : memref<18x18x4xf32, #tpu.memory_space<vmem>>, vector<16x16x4xf32>
    %40 = vector.shape_cast %39 : vector<16x16x4xf32> to vector<256x4xf32>
    %c0_49 = arith.constant 0 : index
    %c32 = arith.constant 32 : index
    %41 = vector.load %arg10[%c0_49, %c32] : memref<256x36xf32, #tpu.memory_space<vmem>>, vector<256x4xf32>
    tpu.vector_store %arg10[%c0_49, %c32], %40 {strides = array<i32>} : memref<256x36xf32, #tpu.memory_space<vmem>>, vector<256x4xf32>,
    %c0_50 = arith.constant 0 : index
    %c0_51 = arith.constant 0 : index
    %42 = vector.load %arg10[%c0_50, %c0_51] : memref<256x36xf32, #tpu.memory_space<vmem>>, vector<256x36xf32>
    %43 = arith.truncf %42 : vector<256x36xf32> to vector<256x36xbf16>
    %c0_52 = arith.constant 0 : index
    %c0_53 = arith.constant 0 : index
    %44 = vector.load %arg3[%c0_52, %c0_53] : memref<36x4xbf16, #tpu.memory_space<vmem>>, vector<36x4xbf16>
    %cst_54 = arith.constant dense<0.000000e+00> : vector<256x4xf32>
    %45 = tpu.matmul %43, %44, %cst_54 {dimension_numbers = #tpu.dot_dimension_numbers<[1], [0], [0], [1], [0, 0, 1, 1], [], []>} : vector<256x36xbf16>, vector<36x4xbf16>, vector<256x4xf32> -> vector<256x4xf32>
    %c0_55 = arith.constant 0 : index
    %c0_56 = arith.constant 0 : index
    %46 = vector.load %arg6[%c0_55, %c0_56] : memref<1x4xf32, #tpu.memory_space<vmem>>, vector<1x4xf32>
    %47 = vector.broadcast %46 : vector<1x4xf32> to vector<256x4xf32>
    %48 = arith.addf %45, %47 : vector<256x4xf32>
    %cst_57 = arith.constant 0.000000e+00 : f32
    %49 = vector.broadcast %cst_57 : f32 to vector<256x4xf32>
    %50 = arith.maximumf %48, %49 : vector<256x4xf32>
    %51 = arith.truncf %50 : vector<256x4xf32> to vector<256x4xbf16>
    %c0_58 = arith.constant 0 : index
    %c0_59 = arith.constant 0 : index
    %52 = vector.load %arg4[%c0_58, %c0_59] : memref<4x16xbf16, #tpu.memory_space<vmem>>, vector<4x16xbf16>
    %cst_60 = arith.constant dense<0.000000e+00> : vector<256x16xf32>
    %53 = tpu.matmul %51, %52, %cst_60 {dimension_numbers = #tpu.dot_dimension_numbers<[1], [0], [0], [1], [0, 0, 1, 1], [], []>} : vector<256x4xbf16>, vector<4x16xbf16>, vector<256x16xf32> -> vector<256x16xf32>
    %c0_61 = arith.constant 0 : index
    %c0_62 = arith.constant 0 : index
    %54 = vector.load %arg7[%c0_61, %c0_62] : memref<1x16xf32, #tpu.memory_space<vmem>>, vector<1x16xf32>
    %55 = vector.broadcast %54 : vector<1x16xf32> to vector<256x16xf32>
    %56 = arith.addf %53, %55 : vector<256x16xf32>
    %57 = arith.addf %56, %2 : vector<256x16xf32>
    %cst_63 = arith.constant 0.000000e+00 : f32
    %58 = vector.broadcast %cst_63 : f32 to vector<256x16xf32>
    %59 = arith.maximumf %57, %58 : vector<256x16xf32>
    %60 = vector.shape_cast %59 : vector<256x16xf32> to vector<16x16x16xf32>
    %c0_64 = arith.constant 0 : index
    %c0_65 = arith.constant 0 : index
    %c0_66 = arith.constant 0 : index
    %c0_67 = arith.constant 0 : index
    %61 = vector.load %arg8[%c0_64, %c0_65, %c0_66, %c0_67] : memref<1x16x16x16xf32, #tpu.memory_space<vmem>>, vector<1x16x16x16xf32>
    %62 = vector.shape_cast %61 : vector<1x16x16x16xf32> to vector<16x16x16xf32>
    %63 = vector.shape_cast %60 : vector<16x16x16xf32> to vector<1x16x16x16xf32>
    tpu.vector_store %arg8[%c0_64, %c0_65, %c0_66, %c0_67], %63 {strides = array<i32>} : memref<1x16x16x16xf32, #tpu.memory_space<vmem>>, vector<1x16x16x16xf32>,
    return
  }
  func.func @transform_0(%arg0: i32) -> (i32, i32, i32, i32) {
    %c0_i32 = arith.constant 0 : i32
    %c0_i32_0 = arith.constant 0 : i32
    %c0_i32_1 = arith.constant 0 : i32
    %c0_i32_2 = arith.constant 0 : i32
    return %arg0, %c0_i32, %c0_i32_0, %c0_i32_1 : i32, i32, i32, i32
  }
  func.func @transform_1(%arg0: i32) -> (i32, i32) {
    %c0_i32 = arith.constant 0 : i32
    %c0_i32_0 = arith.constant 0 : i32
    %c0_i32_1 = arith.constant 0 : i32
    return %c0_i32, %c0_i32_0 : i32, i32
  }
  func.func @transform_2(%arg0: i32) -> (i32, i32) {
    %c0_i32 = arith.constant 0 : i32
    %c0_i32_0 = arith.constant 0 : i32
    %c0_i32_1 = arith.constant 0 : i32
    return %c0_i32, %c0_i32_0 : i32, i32
  }
  func.func @transform_3(%arg0: i32) -> (i32, i32) {
    %c0_i32 = arith.constant 0 : i32
    %c0_i32_0 = arith.constant 0 : i32
    %c0_i32_1 = arith.constant 0 : i32
    return %c0_i32, %c0_i32_0 : i32, i32
  }
  func.func @transform_4(%arg0: i32) -> (i32, i32) {
    %c0_i32 = arith.constant 0 : i32
    %c0_i32_0 = arith.constant 0 : i32
    %c0_i32_1 = arith.constant 0 : i32
    return %c0_i32, %c0_i32_0 : i32, i32
  }
  func.func @transform_5(%arg0: i32) -> (i32, i32) {
    %c0_i32 = arith.constant 0 : i32
    %c0_i32_0 = arith.constant 0 : i32
    %c0_i32_1 = arith.constant 0 : i32
    return %c0_i32, %c0_i32_0 : i32, i32
  }
  func.func @transform_6(%arg0: i32) -> (i32, i32) {
    %c0_i32 = arith.constant 0 : i32
    %c0_i32_0 = arith.constant 0 : i32
    %c0_i32_1 = arith.constant 0 : i32
    return %c0_i32, %c0_i32_0 : i32, i32
  }
  func.func @transform_7(%arg0: i32) -> (i32, i32, i32, i32) {
    %c0_i32 = arith.constant 0 : i32
    %c0_i32_0 = arith.constant 0 : i32
    %c0_i32_1 = arith.constant 0 : i32
    %c0_i32_2 = arith.constant 0 : i32
    return %arg0, %c0_i32, %c0_i32_0, %c0_i32_1 : i32, i32, i32, i32
  }
}

</mosaic_0001>

<bundles_post_ra>
// kernel: bottleneck_forward.1
= control target key start
LH: loop header
LB: loop body
LE: loop exit
PB: predicated region body
PF: predicated region fallthrough
CT: control target
= control target key end

     0   :  { %12 = vsyncpa [#allocation5], 0  ;;  %s4666_s0 = inlined_call_operand.hbm [shape: f32[2,16,16,16], index: 0, kind: input, shape index: {}]   ;;  %s4667_s1 = inlined_call_operand.vmem [shape: bf16[16,4], index: 1, kind: input, shape index: {}]   ;;  %s4668_s2 = inlined_call_operand.vmem [shape: bf16[36,4], index: 2, kind: input, shape index: {}]   ;;  %s4669_s3 = inlined_call_operand.vmem [shape: bf16[4,16], index: 3, kind: input, shape index: {}]   ;;  %s4670_s4 = inlined_call_operand.vmem [shape: f32[1,4], index: 4, kind: input, shape index: {}]   ;;  %s4671_s5 = inlined_call_operand.vmem [shape: f32[1,4], index: 5, kind: input, shape index: {}]   ;;  %s4672_s6 = inlined_call_operand.vmem [shape: f32[1,16], index: 6, kind: input, shape index: {}]   ;;  %s4673_s7 = inlined_call_operand.hbm [shape: f32[2,16,16,16], index: 7, kind: output, shape index: {}]  }
   0x1   :  { %14 = vsyncpa [#allocation5 + $0x1], 0 }
   0x2   :  { %15 = vsyncpa [#allocation6], 0 }
   0x3   :  { %17 = vsyncpa [#allocation6 + $0x1], 0  ;;  %s3150_s24 = smov 0   ;;  %s3152_s25 = smov 0  }
   0x4   :  { %s3154_s26 = smov 0   ;;  %s3156_s27 = smov 0  }
   0x5 LB: > { %s3171_s28 = sadd.s32 4294967295, %s3096_s27   ;;  %s2820_s29 = sadd.s32 4294967294, %s3096_s27   ;;  %s3096_s27 = sphi %s3156_s27, %s4685_s27   ;;  %s3092_s26 = sphi %s3154_s26, %s4684_s26   ;;  %s3088_s25 = sphi %s3152_s25, %s4683_s25   ;;  %s3084_s24 = sphi %s3150_s24, %s4682_s24  }
   0x6   : > { %s3175_s30 = sadd.s32 1, %s3096_s27   ;;  %s30_s8 = sadd.s32 1, %s3092_s26 }
   0x7   : > { %s27_s9 = ssub.s32 %s3096_s27, %s3175_s30  ;;  %p37_p0 = scmp.ne.s32.totalorder %s3092_s26, %s3088_s25 }
   0x8   : > { %p28_p1 = scmp.eq.s32.totalorder %s27_s9, 0  ;;  %p38_p2 = scmp.eq.s32.totalorder %s3096_s27, 0 }
   0x9   : > { %p43_p3 = scmp.ne.s32.totalorder %s3088_s25, %s3084_s24  ;;  %p44_p4 = scmp.eq.s32.totalorder %s3171_s28, 0 }
   0xa   : > { %s3187_s10 = scalar_select %p28_p1, %s3092_s26, %s30_s8  }
   0xb   : > { %p3189_p5 = por %p38_p2, %p37_p0  ;;  %p3193_p6 = por %p44_p4, %p43_p3 }
   0xc   : > { %4674 = sst [smem:[#allocation10_spill]] %s3187_s10  ;;  %p193_p7 = scmp.eq.s32.totalorder %s3171_s28, 1 }
   0xd   : > { %p199_p8 = scmp.eq.s32.totalorder %s2820_s29, 1  ;;  %p2916_p10 = scmp.lt.s32.totalorder %s3096_s27, 2 }
   0xe   : > { %p3200_p11 = por %p193_p7, %p37_p0  ;;  %s237_s15 = sand.u32 1, %s3092_s26  }
   0xf   : > { %p3204_p12 = por %p199_p8, %p43_p3  ;;  %s2894_s16 = sshll.u32 %s3096_s27, 8 }
  0x10   : > { %s2823_s17 = sshll.u32 %s237_s15, 8  ;;  %s246_s20 = scalar_lea.hbm %s4666_s0, %s2894_s16 }
  0x11   : > { %s247_s21 = sshll.u32 %s246_s20, 4  ;;  %s241_s22 = scalar_lea.vmem [#allocation4], %s2823_s17  ;;  %s248_s21 = int_to_ptr.hbm [resolvable:$true] %s247_s21 }
  0x12   : > { %s249_s23 = sshll.u32 %s241_s22, 4  ;;  %p3215_p13 = pnand %p2916_p10, %p3189_p5  ;;  %s250_s23 = int_to_ptr.vmem [resolvable:$true] %s249_s23 }
  0x13   : > { %p2826_p0 = scmp.ge.s32.totalorder %s3096_s27, 1  ;;  %p257_p1 = scmp.lt.s32.totalorder %s3096_s27, 3 }
  0x14   : > { %s238_s8 = scalar_lea.sflag [#allocation5], %s237_s15  ;;  %s3000_s9 = sshra.s32 %s248_s21, 4  ;;  %s3001_s9 = int_to_ptr.hbm [resolvable:$true] %s3000_s9 }
  0x15   : > { %s3002_s10 = scalar_lea.hbm %s3001_s9, 256  ;;  %p3004_p3 = pneg %p3215_p13 }
  0x16   : > { %p3003_p2 = scmp.ne.s32.totalorder %s3001_s9, %s3002_s10  ;;  %s3007_s11 = scalar_lea.hbm %s4666_s0, 512 }
  0x17   : > { %p3008_p5 = scmp.lt.s32.totalorder %s3001_s9, %s4666_s0  ;;  %p3009_p8 = scmp.lt.s32.totalorder %s3007_s11, %s3002_s10 }
  0x18   : > { %p3005_p4 = pnand %p3004_p3, %p3003_p2 }
  0x19   : > { %p3010_p10 = por %p3009_p8, %p3008_p5 }
  0x1a   : > { %p3006_p7 = pneg %p3005_p4 }
  0x1c   : > { %p3011_p9 = pnand %p3010_p10, %p3006_p7 }
  0x1e   : > { %3014 = shalt.err (!%p3011_p9)
}
  0x1f   : > { %s3098_s15 = smov 128   ;;  %s3099_s20 = smov 8  }
  0x20   : > { %2911 = dma.hbm_to_vmem [thread:$0]  (!%p3215_p13), %s248_s21, 4096, %s250_s23, %s238_s8, %s3098_s15, %s3098_s15, %s3099_s20  }
  0x21   : > { %p258_p2 = pnand %p2826_p0, %p257_p1 }
  0x22   : > { %s3236_s22 = sand.u32 (!%p258_p2), 1, %s3088_s25  }
  0x23   : > { %261 = sbr.rel (%p258_p2) target bundleno = 1278 (0x4fe), region = 48  ;;  %s2827_s10 = sshll.u32 (!%p258_p2), %s3236_s22, 8 }
  0x24   : > { %s264_s9 = scalar_lea.sflag (!%p258_p2), [#allocation5], %s3236_s22  ;;  %s3242_s16 = scalar_lea.vmem (!%p258_p2), [#allocation4], %s2827_s10 }
  0x28   : > { %3075 = dma.done.wait (%p3193_p6), %s264_s9, 4096  }
  0x29   : > { %3077 = vsyncadd (%p3193_p6), %s264_s9, 4294963200  ;;  %v2895_v0 = vld [vmem:[%s4667_s1] sm:$0xff]  ;;  %v300_v1 = vld [vmem:[%s3242_s16] sm:$0xff]  ;;  %vm360_vm0 = vcmask 130048   ;;  %vm530_vm1 = vcmask 31744   ;;  %v3100_v7 = vmov 0.0  }
  0x2a   : > { %v301_v2 = vld [vmem:[%s3242_s16 + $0x8] sm:$0xff]  ;;  %v326_v4 = vld [vmem:[%s3242_s16 + $0xd0] sm:$0xff]  ;;  %v327_v5 = vld [vmem:[%s3242_s16 + $0xd8] sm:$0xff]  ;;  %416 = vmatpush.bf16.msra.mxu0 %v2895_v0  ;;  %2899 = vmatpush.bf16.msra.mxu3 %v2895_v0  ;;  %531 = vst.msk [vmem:[#allocation2] sm:$0xff] %vm530_vm1, %v3100_v7  ;;  %s3101_s12 = smov 4   ;;  %vm533_vm2 = vcmask 25600  }
  0x2b   : > { %v332_v3 = vpack.c.bf16 %v301_v2, %v300_v1  ;;  %v345_v6 = vpack.c.bf16 %v327_v5, %v326_v4  ;;  %532 = vst.msk [vmem:[#allocation2 + $0x8] sm:$0xff] %vm530_vm1, %v3100_v7  ;;  %v302_v8 = vld [vmem:[%s3242_s16 + $0x10] sm:$0xff]  ;;  %v303_v9 = vld [vmem:[%s3242_s16 + $0x18] sm:$0xff]  ;;  %v328_v10 = vld [vmem:[%s3242_s16 + $0xe0] sm:$0xff]  ;;  %s3102_s29 = smov 8   ;;  %s3103_s11 = smov 20  }
  0x2c   : > { %535 = vst.msk [vmem:[#allocation2 + $0x18] sm:$0xff] %vm530_vm1, %v3100_v7  ;;  %v329_v11 = vld [vmem:[%s3242_s16 + $0xe8] sm:$0xff]  ;;  %v333_v13 = vpack.c.bf16 %v303_v9, %v302_v8  ;;  %v304_v15 = vld [vmem:[%s3242_s16 + $0x20] sm:$0xff]  ;;  %v306_v20 = vld [vmem:[%s3242_s16 + $0x30] sm:$0xff]  ;;  %s3104_s18 = smov 12   ;;  %s3105_s19 = smov 16  }
  0x2d   : > { %2833 = vmatmul.msk.bf16.vlgmr.msra.gmra.mxu0 %vm360_vm0, %v332_v3  ;;  %2846 = vmatmul.msk.bf16.vlgmr.msra.gmra.mxu3 %vm360_vm0, %v345_v6  ;;  %536 = vst.msk [vmem:[#allocation2 + $0x20] sm:$0xff] %vm530_vm1, %v3100_v7  ;;  %v346_v14 = vpack.c.bf16 %v329_v11, %v328_v10  ;;  %v305_v16 = vld [vmem:[%s3242_s16 + $0x28] sm:$0xff]  ;;  %v307_v21 = vld [vmem:[%s3242_s16 + $0x38] sm:$0xff]  ;;  %v3384_v24 = vld [vmem:[%s4670_s4] ss:$0 sm:$0xff]  ;;  %s3106_s15 = smov 24  }
  0x2e   : > { %538 = vst.msk [vmem:[#allocation2 + $0x30] sm:$0xff] %vm530_vm1, %v3100_v7  ;;  %v334_v17 = vpack.c.bf16 %v305_v16, %v304_v15  ;;  %v335_v22 = vpack.c.bf16 %v307_v21, %v306_v20  ;;  %v308_v29 = vld [vmem:[%s3242_s16 + $0x40] sm:$0xff]  ;;  %v309_v30 = vld [vmem:[%s3242_s16 + $0x48] sm:$0xff]  ;;  %v310_v1 = vld [vmem:[%s3242_s16 + $0x50] sm:$0xff]  ;;  %s3107_s20 = smov 32   ;;  %vm843_vm3 = vcmask 64544  }
  0x2f   : > { %539 = vst.msk [vmem:[#allocation2 + $0x38] sm:$0xff] %vm530_vm1, %v3100_v7  ;;  %v336_v32 = vpack.c.bf16 %v309_v30, %v308_v29  ;;  %v311_v2 = vld [vmem:[%s3242_s16 + $0x58] sm:$0xff]  ;;  %v312_v15 = vld [vmem:[%s3242_s16 + $0x60] sm:$0xff]  ;;  %v313_v16 = vld [vmem:[%s3242_s16 + $0x68] sm:$0xff]  ;;  %vm1036_vm4 = vcmask 97344   ;;  %s3108_s9 = smov 28  }
  0x30   : > { %541 = vst.msk [vmem:[#allocation2 + $0x48] sm:$0xff] %vm530_vm1, %v3100_v7  ;;  %v337_v3 = vpack.c.bf16 %v311_v2, %v310_v1  ;;  %v315_v29 = vld [vmem:[%s3242_s16 + $0x78] sm:$0xff]  ;;  %vm1229_vm5 = vcmask 130144   ;;  %vm1422_vm6 = vcmask 162944   ;;  %vm1615_vm7 = vcmask 195744   ;;  %s4183_s23 = scalar_lea.vmem [#allocation7], %s2827_s10 }
  0x31   : > { %542 = vst.msk [vmem:[#allocation2 + $0x50] sm:$0xff] %vm530_vm1, %v3100_v7  ;;  %v619_v21 = vld [vmem:[#allocation2] sm:$0xff]  ;;  %vm1809_vm8 = vcmask 228544   ;;  %vm2002_vm9 = vcmask 261344   ;;  %vm2349_vm10 = vcmask 1041408   ;;  %vm2195_vm11 = vcmask 294144  }
  0x32   : > { %v683_v12 = vld [vmem:[#allocation2 + $0x1] sm:$0xff]  ;;  %544 = vst.msk [vmem:[#allocation2 + $0x60] sm:$0xff] %vm530_vm1, %v3100_v7  ;;  %vm2300_vm12 = vcmask 293888   ;;  %s2744_s17 = sshll.u32 %s4183_s23, 4  ;;  %s2745_s17 = int_to_ptr.vmem [resolvable:$true] %s2744_s17 }
  0x33   : > { %747 = vrot.lane.b32.xlu0 %v683_v12, %s3101_s12  ;;  %545 = vst.msk [vmem:[#allocation2 + $0x68] sm:$0xff] %vm530_vm1, %v3100_v7  ;;  %v876_v23 = vld [vmem:[#allocation2 + $0x2] sm:$0xff] }
  0x34   : > { %547 = vst.msk [vmem:[#allocation2 + $0x78] sm:$0xff] %vm530_vm1, %v3100_v7  ;;  %940 = vrot.lane.b32.xlu2 %v876_v23, %s3102_s29 }
  0x35   : > { %548 = vst.msk [vmem:[#allocation2 + $0x80] sm:$0xff] %vm530_vm1, %v3100_v7 }
  0x36   : > { %550 = vst.msk [vmem:[#allocation2 + $0x90] sm:$0xff] %vm530_vm1, %v3100_v7 }
  0x37   : > { %551 = vst.msk [vmem:[#allocation2 + $0x98] sm:$0xff] %vm530_vm1, %v3100_v7 }
  0x38   : > { %553 = vst.msk [vmem:[#allocation2 + $0xa8] sm:$0xff] %vm530_vm1, %v3100_v7 }
  0x39   : > { %554 = vst.msk [vmem:[#allocation2 + $0xb0] sm:$0xff] %vm530_vm1, %v3100_v7 }
  0x3a   : > { %556 = vst.msk [vmem:[#allocation2 + $0xc0] sm:$0xff] %vm530_vm1, %v3100_v7 }
  0x3b   : > { %557 = vst.msk [vmem:[#allocation2 + $0xc8] sm:$0xff] %vm530_vm1, %v3100_v7 }
  0x3c   : > { %559 = vst.msk [vmem:[#allocation2 + $0xd8] sm:$0xff] %vm530_vm1, %v3100_v7 }
  0x3d   : > { %2834 = vmatmul.msk.bf16.gmra.mxu0 %vm360_vm0, %v333_v13  ;;  %2847 = vmatmul.msk.bf16.gmra.mxu3 %vm360_vm0, %v346_v14  ;;  %560 = vst.msk [vmem:[#allocation2 + $0xe0] sm:$0xff] %vm530_vm1, %v3100_v7 }
  0x3e   : > { %562 = vst.msk [vmem:[#allocation2 + $0xf0] sm:$0xff] %vm530_vm1, %v3100_v7 }
  0x3f   : > { %563 = vst.msk [vmem:[#allocation2 + $0xf8] sm:$0xff] %vm530_vm1, %v3100_v7 }
  0x40   : > { %565 = vst.msk [vmem:[#allocation2 + $0x108] sm:$0xff] %vm530_vm1, %v3100_v7 }
  0x41   : > { %566 = vst.msk [vmem:[#allocation2 + $0x110] sm:$0xff] %vm530_vm1, %v3100_v7 }
  0x42   : > { %568 = vst.msk [vmem:[#allocation2 + $0x120] sm:$0xff] %vm530_vm1, %v3100_v7 }
  0x43   : > { %569 = vst.msk [vmem:[#allocation2 + $0x128] sm:$0xff] %vm530_vm1, %v3100_v7 }
  0x44   : > { %571 = vst.msk [vmem:[#allocation2 + $0x138] sm:$0xff] %vm530_vm1, %v3100_v7 }
  0x45   : > { %572 = vst.msk [vmem:[#allocation2 + $0x140] sm:$0xff] %vm530_vm1, %v3100_v7 }
  0x46   : > { %574 = vst.msk [vmem:[#allocation2 + $0x150] sm:$0xff] %vm530_vm1, %v3100_v7 }
  0x47   : > { %575 = vst.msk [vmem:[#allocation2 + $0x158] sm:$0xff] %vm530_vm1, %v3100_v7 }
  0x48   : > { %577 = vst.msk [vmem:[#allocation2 + $0x168] sm:$0xff] %vm530_vm1, %v3100_v7 }
  0x49   : > { %578 = vst.msk [vmem:[#allocation2 + $0x170] sm:$0xff] %vm530_vm1, %v3100_v7 }
  0x4a   : > { %580 = vst.msk [vmem:[#allocation2 + $0x180] sm:$0xff] %vm530_vm1, %v3100_v7 }
  0x4b   : > { %581 = vst.msk [vmem:[#allocation2 + $0x188] sm:$0xff] %vm530_vm1, %v3100_v7 }
  0x4c   : > { %583 = vst.msk [vmem:[#allocation2 + $0x198] sm:$0xff] %vm530_vm1, %v3100_v7 }
  0x4d   : > { %2835 = vmatmul.msk.bf16.gmra.mxu0 %vm360_vm0, %v334_v17  ;;  %584 = vst.msk [vmem:[#allocation2 + $0x1a0] sm:$0xff] %vm530_vm1, %v3100_v7 }
  0x4e   : > { %534 = vst.msk [vmem:[#allocation2 + $0x10] sm:$0x3] %vm533_vm2, %v3100_v7 }
  0x4f   : > { %537 = vst.msk [vmem:[#allocation2 + $0x28] sm:$0x3] %vm533_vm2, %v3100_v7 }
  0x50   : > { %540 = vst.msk [vmem:[#allocation2 + $0x40] sm:$0x3] %vm533_vm2, %v3100_v7 }
  0x51   : > { %543 = vst.msk [vmem:[#allocation2 + $0x58] sm:$0x3] %vm533_vm2, %v3100_v7 }
  0x52   : > { %546 = vst.msk [vmem:[#allocation2 + $0x70] sm:$0x3] %vm533_vm2, %v3100_v7 }
  0x53   : > { %549 = vst.msk [vmem:[#allocation2 + $0x88] sm:$0x3] %vm533_vm2, %v3100_v7 }
  0x54   : > { %552 = vst.msk [vmem:[#allocation2 + $0xa0] sm:$0x3] %vm533_vm2, %v3100_v7 }
  0x55   : > { %v684_v18 = vld [vmem:[#allocation2 + $0x9] sm:$0xff]  ;;  %555 = vst.msk [vmem:[#allocation2 + $0xb8] sm:$0x3] %vm533_vm2, %v3100_v7 }
  0x56   : > { %749 = vrot.lane.b32.xlu0 %v684_v18, %s3101_s12  ;;  %558 = vst.msk [vmem:[#allocation2 + $0xd0] sm:$0x3] %vm533_vm2, %v3100_v7  ;;  %v877_v19 = vld [vmem:[#allocation2 + $0xa] sm:$0xff]  ;;  %v338_v18 = vpack.c.bf16 %v313_v16, %v312_v15 }
  0x57   : > { %561 = vst.msk [vmem:[#allocation2 + $0xe8] sm:$0x3] %vm533_vm2, %v3100_v7 }
  0x58   : > { %564 = vst.msk [vmem:[#allocation2 + $0x100] sm:$0x3] %vm533_vm2, %v3100_v7 }
  0x59   : > { %567 = vst.msk [vmem:[#allocation2 + $0x118] sm:$0x3] %vm533_vm2, %v3100_v7 }
  0x5a   : > { %570 = vst.msk [vmem:[#allocation2 + $0x130] sm:$0x3] %vm533_vm2, %v3100_v7 }
  0x5b   : > { %573 = vst.msk [vmem:[#allocation2 + $0x148] sm:$0x3] %vm533_vm2, %v3100_v7 }
  0x5c   : > { %576 = vst.msk [vmem:[#allocation2 + $0x160] sm:$0x3] %vm533_vm2, %v3100_v7 }
  0x5d   : > { %579 = vst.msk [vmem:[#allocation2 + $0x178] sm:$0x3] %vm533_vm2, %v3100_v7  ;;  %2836 = vmatmul.msk.bf16.gmra.mxu0 %vm360_vm0, %v335_v22 }
  0x5e   : > { %582 = vst.msk [vmem:[#allocation2 + $0x190] sm:$0x3] %vm533_vm2, %v3100_v7  ;;  %942 = vrot.lane.b32.xlu0 %v877_v19, %s3102_s29 }
  0x5f   : > { %585 = vst.msk [vmem:[#allocation2 + $0x1a8] sm:$0x3] %vm533_vm2, %v3100_v7 }
  0x60   : > { %651 = vst.msk [vmem:[#allocation3] sm:$0xff] %vm530_vm1, %v619_v21 }
  0x6d   : > { %2837 = vmatmul.msk.bf16.gmra.mxu0 %vm360_vm0, %v336_v32 }
  0x7d   : > { %2838 = vmatmul.msk.bf16.gmra.mxu0 %vm360_vm0, %v337_v3 }
  0x8d   : > { %2839 = vmatmul.msk.bf16.gmra.mxu0 %vm360_vm0, %v338_v18 }
  0x8e   : > { %v941_v23 = vpop.permute.xlu2 %940 }
  0xa5   : > { %v748_v20 = vpop.permute.xlu0 %747 }
  0xa6   : > { %844 = vst.msk [vmem:[#allocation3] sm:$0xff] %vm843_vm3, %v748_v20 }
  0xa7   : > { %1037 = vst.msk [vmem:[#allocation3] sm:$0xff] %vm1036_vm4, %v941_v23  ;;  %v324_v23 = vld [vmem:[%s3242_s16 + $0xc0] sm:$0xff] }
  0xaa   : > { %v418_v25 = vpop.f32.mrf.mxu0 }
  0xab   : > { %v419_v26 = vadd.f32 %v3384_v24, %v418_v25 }
  0xad   : > { %v498_v27 = vmax.f32 %v419_v26, 0.0  ;;  %v620_v26 = vld [vmem:[#allocation2 + $0x8] sm:$0xff] }
  0xae   : > { %652 = vst.msk [vmem:[#allocation3 + $0x8] sm:$0xff] %vm530_vm1, %v620_v26 }
  0xaf   : > { %587 = vst.msk [vmem:[#allocation2 + $0x19] sm:$0xff] %vm530_vm1, %v498_v27 }
  0xb0   : > { %v483_v28 = vpop.f32.mrf.mxu3 }
  0xb1   : > { %v484_v31 = vadd.f32 %v3384_v24, %v483_v28  ;;  %v314_v28 = vld [vmem:[%s3242_s16 + $0x70] sm:$0xff] }
  0xb2   : > { %v420_v33 = vpop.f32.mrf.mxu0  ;;  %v339_v30 = vpack.c.bf16 %v315_v29, %v314_v28 }
  0xb3   : > { %v421_v34 = vadd.f32 %v3384_v24, %v420_v33  ;;  %v524_v35 = vmax.f32 %v484_v31, 0.0 }
  0xb4   : > { %2840 = vmatmul.msk.bf16.gmra.mxu0 %vm360_vm0, %v339_v30 }
  0xb5   : > { %v499_v36 = vmax.f32 %v421_v34, 0.0  ;;  %613 = vst.msk [vmem:[#allocation2 + $0x151] sm:$0xff] %vm530_vm1, %v524_v35  ;;  %v316_v35 = vld [vmem:[%s3242_s16 + $0x80] sm:$0xff] }
  0xb6   : > { %v685_v37 = vld [vmem:[#allocation2 + $0x19] sm:$0xff] }
  0xb7   : > { %v1069_v38 = vld [vmem:[#allocation2 + $0x18] sm:$0xff]  ;;  %588 = vst.msk [vmem:[#allocation2 + $0x21] sm:$0xff] %vm530_vm1, %v499_v36  ;;  %751 = vrot.lane.b32.xlu1 %v685_v37, %s3101_s12 }
  0xb8   : > { %v485_v39 = vpop.f32.mrf.mxu3  ;;  %653 = vst.msk [vmem:[#allocation3 + $0x10] sm:$0xff] %vm530_vm1, %v1069_v38  ;;  %v317_v36 = vld [vmem:[%s3242_s16 + $0x88] sm:$0xff] }
  0xb9   : > { %v486_v40 = vadd.f32 %v3384_v24, %v485_v39 }
  0xba   : > { %v423_v41 = vpop.f32.mrf.mxu0 }
  0xbb   : > { %v525_v42 = vmax.f32 %v486_v40, 0.0  ;;  %v424_v43 = vadd.f32 %v3384_v24, %v423_v41 }
  0xbc   : > { %v647_v44 = vld [vmem:[#allocation2 + $0x150] sm:$0xff] }
  0xbd   : > { %614 = vst.msk [vmem:[#allocation2 + $0x159] sm:$0xff] %vm530_vm1, %v525_v42  ;;  %v500_v45 = vmax.f32 %v424_v43, 0.0  ;;  %v711_v0 = vld [vmem:[#allocation2 + $0x151] sm:$0xff] }
  0xbe   : > { %v3400_v46 = vld [vmem:[#allocation2 + $0x22] sm:$0xff]  ;;  %v1455_v47 = vld [vmem:[#allocation2 + $0x1a] sm:$0xff]  ;;  %679 = vst.msk [vmem:[#allocation3 + $0xe0] sm:$0xff] %vm530_vm1, %v647_v44 }
  0xbf   : > { %v1070_v48 = vld [vmem:[#allocation2 + $0x20] sm:$0xff]  ;;  %946 = vrot.lane.b32.xlu2 %v3400_v46, %s3102_s29  ;;  %1519 = vrot.lane.b32.xlu0 %v1455_v47, %s3103_s11  ;;  %589 = vst.msk [vmem:[#allocation2 + $0x31] sm:$0xff] %vm530_vm1, %v500_v45  ;;  %v319_v45 = vld [vmem:[%s3242_s16 + $0x98] sm:$0xff] }
  0xc0   : > { %1133 = vrot.lane.b32.xlu1 %v1069_v38, %s3104_s18  ;;  %v488_v49 = vpop.f32.mrf.mxu3  ;;  %654 = vst.msk [vmem:[#allocation3 + $0x18] sm:$0xff] %vm530_vm1, %v1070_v48  ;;  %v1263_v62 = vld [vmem:[#allocation2 + $0x21] sm:$0xff] }
  0xc1   : > { %v489_v50 = vadd.f32 %v3384_v24, %v488_v49  ;;  %v318_v44 = vld [vmem:[%s3242_s16 + $0x90] sm:$0xff] }
  0xc2   : > { %v425_v51 = vpop.f32.mrf.mxu0 }
  0xc3   : > { %v526_v52 = vmax.f32 %v489_v50, 0.0  ;;  %v426_v53 = vadd.f32 %v3384_v24, %v425_v51 }
  0xc4   : > { %v904_v54 = vld [vmem:[#allocation2 + $0x152] sm:$0xff]  ;;  %v905_v19 = vld [vmem:[#allocation2 + $0x15a] sm:$0xff] }
  0xc5   : > { %615 = vst.msk [vmem:[#allocation2 + $0x169] sm:$0xff] %vm530_vm1, %v526_v52  ;;  %v501_v55 = vmax.f32 %v426_v53, 0.0  ;;  %v648_v56 = vld [vmem:[#allocation2 + $0x158] sm:$0xff] }
  0xc6   : > { %680 = vst.msk [vmem:[#allocation3 + $0xe8] sm:$0xff] %vm530_vm1, %v648_v56  ;;  %v1071_v57 = vld [vmem:[#allocation2 + $0x30] sm:$0xff]  ;;  %v712_v6 = vld [vmem:[#allocation2 + $0x159] sm:$0xff] }
  0xc7   : > { %996 = vrot.lane.b32.xlu0 %v904_v54, %s3102_s29  ;;  %1135 = vrot.lane.b32.xlu2 %v1070_v48, %s3104_s18  ;;  %590 = vst.msk [vmem:[#allocation2 + $0x39] sm:$0xff] %vm530_vm1, %v501_v55  ;;  %v687_v11 = vld [vmem:[#allocation2 + $0x31] sm:$0xff] }
  0xc8   : > { %1326 = vrot.lane.b32.xlu1 %v685_v37, %s3105_s19  ;;  %v490_v58 = vpop.f32.mrf.mxu3  ;;  %655 = vst.msk [vmem:[#allocation3 + $0x20] sm:$0xff] %vm530_vm1, %v1071_v57  ;;  %v750_v27 = vpop.permute.xlu0 %749  ;;  %v340_v37 = vpack.c.bf16 %v317_v36, %v316_v35 }
  0xc9   : > { %v491_v59 = vadd.f32 %v3384_v24, %v490_v58  ;;  %845 = vst.msk [vmem:[#allocation3 + $0x8] sm:$0xff] %vm843_vm3, %v750_v27  ;;  %v320_v58 = vld [vmem:[%s3242_s16 + $0xa0] sm:$0xff] }
  0xca   : > { %v428_v7 = vpop.f32.mrf.mxu0  ;;  %2841 = vmatmul.msk.bf16.gmra.mxu0 %vm360_vm0, %v340_v37 }
  0xcb   : > { %v527_v60 = vmax.f32 %v491_v59, 0.0  ;;  %v429_v8 = vadd.f32 %v3384_v24, %v428_v7  ;;  %v321_v59 = vld [vmem:[%s3242_s16 + $0xa8] sm:$0xff] }
  0xcc   : > { %v649_v61 = vld [vmem:[#allocation2 + $0x168] sm:$0xff] }
  0xcd   : > { %616 = vst.msk [vmem:[#allocation2 + $0x171] sm:$0xff] %vm530_vm1, %v527_v60  ;;  %v713_v4 = vld [vmem:[#allocation2 + $0x169] sm:$0xff]  ;;  %v502_v9 = vmax.f32 %v429_v8, 0.0  ;;  %v342_v60 = vpack.c.bf16 %v321_v59, %v320_v58  ;;  %v322_v8 = vld [vmem:[%s3242_s16 + $0xb0] sm:$0xff] }
  0xce   : > { %v3420_v63 = vld [vmem:[#allocation2 + $0x38] sm:$0xff]  ;;  %681 = vst.msk [vmem:[#allocation3 + $0xf0] sm:$0xff] %vm530_vm1, %v649_v61 }
  0xcf   : > { %1137 = vrot.lane.b32.xlu0 %v1071_v57, %s3104_s18  ;;  %1328 = vrot.lane.b32.xlu2 %v1263_v62, %s3105_s19  ;;  %656 = vst.msk [vmem:[#allocation3 + $0x28] sm:$0xff] %vm530_vm1, %v3420_v63  ;;  %v3437_v10 = vld [vmem:[#allocation2 + $0x32] sm:$0xff]  ;;  %v881_v32 = vld [vmem:[#allocation2 + $0x3a] sm:$0xff] }
  0xd0   : > { %803 = vrot.lane.b32.xlu1 %v711_v0, %s3101_s12  ;;  %591 = vst.msk [vmem:[#allocation2 + $0x49] sm:$0xff] %vm530_vm1, %v502_v9  ;;  %v1265_v25 = vld [vmem:[#allocation2 + $0x39] sm:$0xff]  ;;  %v943_v33 = vpop.permute.xlu0 %942  ;;  %v323_v9 = vld [vmem:[%s3242_s16 + $0xb8] sm:$0xff] }
  0xd1   : > { %1038 = vst.msk [vmem:[#allocation3 + $0x8] sm:$0xff] %vm1036_vm4, %v943_v33 }
  0xd2   : > { %v430_v12 = vpop.f32.mrf.mxu0 }
  0xd3   : > { %v431_v13 = vadd.f32 %v3384_v24, %v430_v12 }
  0xd4   : > { %v650_v5 = vld [vmem:[#allocation2 + $0x170] sm:$0xff] }
  0xd5   : > { %682 = vst.msk [vmem:[#allocation3 + $0xf8] sm:$0xff] %vm530_vm1, %v650_v5  ;;  %v503_v14 = vmax.f32 %v431_v13, 0.0  ;;  %v907_v31 = vld [vmem:[#allocation2 + $0x172] sm:$0xff]  ;;  %v906_v38 = vld [vmem:[#allocation2 + $0x16a] sm:$0xff] }
  0xd6   : > { %v714_v50 = vld [vmem:[#allocation2 + $0x171] sm:$0xff] }
  0xd7   : > { %807 = vrot.lane.b32.xlu0 %v713_v4, %s3101_s12  ;;  %805 = vrot.lane.b32.xlu2 %v712_v6, %s3101_s12  ;;  %592 = vst.msk [vmem:[#allocation2 + $0x51] sm:$0xff] %vm530_vm1, %v503_v14  ;;  %v1651_v17 = vld [vmem:[#allocation2 + $0x48] sm:$0xff] }
  0xd8   : > { %753 = vrot.lane.b32.xlu1 %v1263_v62, %s3101_s12  ;;  %657 = vst.msk [vmem:[#allocation3 + $0x30] sm:$0xff] %vm530_vm1, %v1651_v17  ;;  %v689_v34 = vld [vmem:[#allocation2 + $0x49] sm:$0xff] }
  0xda   : > { %v433_v39 = vpop.f32.mrf.mxu0 }
  0xdb   : > { %v434_v40 = vadd.f32 %v3384_v24, %v433_v39  ;;  %v2280_v39 = vld [vmem:[%s4668_s2 + $0x10] sm:$0x3] }
  0xdd   : > { %v504_v41 = vmax.f32 %v434_v40, 0.0  ;;  %v2294_v40 = vunpack.c.l.b16 %v2280_v39 }
  0xde   : > { %v3459_v22 = vld [vmem:[#allocation2 + $0x50] sm:$0xff] }
  0xdf   : > { %948 = vrot.lane.b32.xlu0 %v3437_v10, %s3102_s29  ;;  %755 = vrot.lane.b32.xlu2 %v687_v11, %s3101_s12  ;;  %658 = vst.msk [vmem:[#allocation3 + $0x38] sm:$0xff] %vm530_vm1, %v3459_v22  ;;  %v883_v48 = vld [vmem:[#allocation2 + $0x52] sm:$0xff]  ;;  %v882_v52 = vld [vmem:[#allocation2 + $0x4a] sm:$0xff] }
  0xe0   : > { %944 = vrot.lane.b32.xlu1 %v1455_v47, %s3102_s29  ;;  %593 = vst.msk [vmem:[#allocation2 + $0x61] sm:$0xff] %vm530_vm1, %v504_v41  ;;  %v341_v47 = vpack.c.bf16 %v319_v45, %v318_v44  ;;  %v690_v53 = vld [vmem:[#allocation2 + $0x51] sm:$0xff] }
  0xe2   : > { %v435_v43 = vpop.f32.mrf.mxu0  ;;  %2842 = vmatmul.msk.bf16.gmra.mxu0 %vm360_vm0, %v341_v47 }
  0xe7   : > { %1715 = vrot.lane.b32.xlu0 %v3420_v63, %s3106_s15  ;;  %1713 = vrot.lane.b32.xlu2 %v1071_v57, %s3106_s15  ;;  %v3507_v54 = vld [vmem:[#allocation2 + $0x60] sm:$0xff] }
  0xe8   : > { %1521 = vrot.lane.b32.xlu1 %v3400_v46, %s3103_s11  ;;  %v436_v46 = vadd.f32 %v3384_v24, %v435_v43  ;;  %659 = vst.msk [vmem:[#allocation3 + $0x40] sm:$0xff] %vm530_vm1, %v3507_v54  ;;  %v1846_v6 = vld [vmem:[#allocation2 + $0x61] sm:$0xff] }
  0xea   : > { %v505_v49 = vmax.f32 %v436_v46, 0.0  ;;  %v438_v0 = vpop.f32.mrf.mxu0 }
  0xeb   : > { %v439_v1 = vadd.f32 %v3384_v24, %v438_v0 }
  0xec   : > { %594 = vst.msk [vmem:[#allocation2 + $0x69] sm:$0xff] %vm530_vm1, %v505_v49  ;;  %v2896_v49 = vld [vmem:[%s4668_s2] sm:$0xff] }
  0xed   : > { %v506_v2 = vmax.f32 %v439_v1, 0.0 }
  0xef   : > { %2099 = vrot.lane.b32.xlu0 %v3437_v10, %s3107_s20  ;;  %1330 = vrot.lane.b32.xlu2 %v687_v11, %s3105_s19  ;;  %595 = vst.msk [vmem:[#allocation2 + $0x79] sm:$0xff] %vm530_vm1, %v506_v2 }
  0xf0   : > { %998 = vrot.lane.b32.xlu1 %v905_v19, %s3102_s29 }
  0xf2   : > { %2843 = vmatmul.msk.bf16.gmra.mxu0 %vm360_vm0, %v342_v60  ;;  %v440_v7 = vpop.f32.mrf.mxu0 }
  0xf3   : > { %v3510_v55 = vld [vmem:[#allocation2 + $0x68] sm:$0xff] }
  0xf4   : > { %660 = vst.msk [vmem:[#allocation3 + $0x48] sm:$0xff] %vm530_vm1, %v3510_v55  ;;  %v3546_v16 = vld [vmem:[#allocation2 + $0x69] sm:$0xff] }
  0xf6   : > { %v3550_v18 = vld [vmem:[#allocation2 + $0x78] sm:$0xff] }
  0xf7   : > { %1332 = vrot.lane.b32.xlu0 %v1265_v25, %s3105_s19  ;;  %757 = vrot.lane.b32.xlu2 %v1265_v25, %s3101_s12  ;;  %661 = vst.msk [vmem:[#allocation3 + $0x50] sm:$0xff] %vm530_vm1, %v3550_v18  ;;  %v693_v0 = vld [vmem:[#allocation2 + $0x79] sm:$0xff] }
  0xf8   : > { %1906 = vrot.lane.b32.xlu1 %v687_v11, %s3108_s9  ;;  %v343_v11 = vpack.c.bf16 %v323_v9, %v322_v8 }
  0xfa   : > { %v443_v30 = vpop.f32.mrf.mxu0 }
  0xff   : > { %1002 = vrot.lane.b32.xlu0 %v907_v31, %s3102_s29  ;;  %1908 = vrot.lane.b32.xlu2 %v1265_v25, %s3108_s9  ;;  %v325_v25 = vld [vmem:[%s3242_s16 + $0xc8] sm:$0xff]  ;;  %v444_v31 = vadd.f32 %v3384_v24, %v443_v30 }
 0x100   : > { %950 = vrot.lane.b32.xlu1 %v881_v32, %s3102_s29  ;;  %v344_v26 = vpack.c.bf16 %v325_v25, %v324_v23 }
 0x101   : > { %v508_v33 = vmax.f32 %v444_v31, 0.0 }
 0x102   : > { %2844 = vmatmul.msk.bf16.gmra.mxu0 %vm360_vm0, %v343_v11  ;;  %v445_v37 = vpop.f32.mrf.mxu0 }
 0x103   : > { %597 = vst.msk [vmem:[#allocation2 + $0x91] sm:$0xff] %vm530_vm1, %v508_v33 }
 0x107   : > { %759 = vrot.lane.b32.xlu0 %v689_v34, %s3101_s12  ;;  %1525 = vrot.lane.b32.xlu2 %v881_v32, %s3103_s11 }
 0x108   : > { %1139 = vrot.lane.b32.xlu1 %v3420_v63, %s3104_s18 }
 0x10f   : > { %1717 = vrot.lane.b32.xlu0 %v1651_v17, %s3106_s15  ;;  %1000 = vrot.lane.b32.xlu2 %v906_v38, %s3102_s29  ;;  %v446_v38 = vadd.f32 %v3384_v24, %v445_v37 }
 0x110   : > { %2101 = vrot.lane.b32.xlu1 %v881_v32, %s3107_s20  ;;  %v1461_v32 = vld [vmem:[#allocation2 + $0x62] sm:$0xff] }
 0x111   : > { %v509_v41 = vmax.f32 %v446_v38, 0.0 }
 0x112   : > { %2845 = vmatmul.msk.bf16.gmra.mxu0 %vm360_vm0, %v344_v26 }
 0x113   : > { %598 = vst.msk [vmem:[#allocation2 + $0x99] sm:$0xff] %vm530_vm1, %v509_v41 }
 0x117   : > { %1334 = vrot.lane.b32.xlu0 %v689_v34, %s3105_s19  ;;  %1141 = vrot.lane.b32.xlu2 %v1651_v17, %s3104_s18  ;;  %v3548_v17 = vld [vmem:[#allocation2 + $0x6a] sm:$0xff] }
 0x118   : > { %1523 = vrot.lane.b32.xlu1 %v3437_v10, %s3103_s11  ;;  %v441_v10 = vadd.f32 %v3384_v24, %v440_v7 }
 0x119   : > { %v3493_v42 = vpop.permute.xlu2 %946 }
 0x11a   : > { %v507_v12 = vmax.f32 %v441_v10, 0.0 }
 0x11c   : > { %596 = vst.msk [vmem:[#allocation2 + $0x81] sm:$0xff] %vm530_vm1, %v507_v12 }
 0x11f   : > { %954 = vrot.lane.b32.xlu0 %v883_v48, %s3102_s29  ;;  %1910 = vrot.lane.b32.xlu2 %v689_v34, %s3108_s9 }
 0x120   : > { %809 = vrot.lane.b32.xlu1 %v714_v50, %s3101_s12 }
 0x121   : > { %v1136_v51 = vpop.permute.xlu2 %1135 }
 0x122   : > { %1231 = vst.msk [vmem:[#allocation3 + $0x8] sm:$0xff] %vm1229_vm5, %v1136_v51 }
 0x123   : > { %v3602_v47 = vld [vmem:[#allocation2 + $0x7a] sm:$0xff] }
 0x127   : > { %1143 = vrot.lane.b32.xlu0 %v3459_v22, %s3104_s18  ;;  %952 = vrot.lane.b32.xlu2 %v882_v52, %s3102_s29 }
 0x128   : > { %761 = vrot.lane.b32.xlu1 %v690_v53, %s3101_s12 }
 0x129   : > { %v1329_v56 = vpop.permute.xlu2 %1328  ;;  %v752_v57 = vpop.permute.xlu1 %751 }
 0x12a   : > { %1424 = vst.msk [vmem:[#allocation3 + $0x8] sm:$0xff] %vm1422_vm6, %v1329_v56 }
 0x12b   : > { %846 = vst.msk [vmem:[#allocation3 + $0x10] sm:$0xff] %vm843_vm3, %v752_v57 }
 0x12f   : > { %1912 = vrot.lane.b32.xlu0 %v690_v53, %s3108_s9  ;;  %2105 = vrot.lane.b32.xlu2 %v883_v48, %s3107_s20 }
 0x130   : > { %1719 = vrot.lane.b32.xlu1 %v3459_v22, %s3106_s15  ;;  %v3561_v22 = vld [vmem:[#allocation2 + $0x80] sm:$0xff] }
 0x131   : > { %v1520_v61 = vpop.permute.xlu0 %1519  ;;  %v806_v62 = vpop.permute.xlu2 %805  ;;  %662 = vst.msk [vmem:[#allocation3 + $0x58] sm:$0xff] %vm530_vm1, %v3561_v22 }
 0x132   : > { %873 = vst.msk [vmem:[#allocation3 + $0xe8] sm:$0xff] %vm843_vm3, %v806_v62  ;;  %v1134_v63 = vpop.permute.xlu1 %1133 }
 0x133   : > { %1230 = vst.msk [vmem:[#allocation3] sm:$0xff] %vm1229_vm5, %v1134_v63  ;;  %v3640_v63 = vld [vmem:[#allocation2 + $0x81] sm:$0xff] }
 0x137   : > { %1529 = vrot.lane.b32.xlu0 %v883_v48, %s3103_s11  ;;  %1527 = vrot.lane.b32.xlu2 %v882_v52, %s3103_s11  ;;  %v2897_v48 = vld [vmem:[%s4668_s2 + $0x8] sm:$0xff] }
 0x138   : > { %2103 = vrot.lane.b32.xlu1 %v882_v52, %s3107_s20 }
 0x139   : > { %v997_v3 = vpop.permute.xlu0 %996  ;;  %v756_v4 = vpop.permute.xlu2 %755 }
 0x13a   : > { %848 = vst.msk [vmem:[#allocation3 + $0x20] sm:$0xff] %vm843_vm3, %v756_v4  ;;  %v1327_v5 = vpop.permute.xlu1 %1326 }
 0x13b   : > { %1423 = vst.msk [vmem:[#allocation3] sm:$0xff] %vm1422_vm6, %v1327_v5  ;;  %v3651_v5 = vld [vmem:[#allocation2 + $0x91] sm:$0xff] }
 0x13c   : > { %1616 = vst.msk [vmem:[#allocation3] sm:$0xff] %vm1615_vm7, %v1520_v61 }
 0x13f   : > { %1914 = vrot.lane.b32.xlu0 %v1846_v6, %s3108_s9  ;;  %763 = vrot.lane.b32.xlu2 %v1846_v6, %s3101_s12 }
 0x140   : > { %1336 = vrot.lane.b32.xlu1 %v690_v53, %s3105_s19  ;;  %v3617_v53 = vld [vmem:[#allocation2 + $0x90] sm:$0xff] }
 0x141   : > { %v1138_v13 = vpop.permute.xlu0 %1137  ;;  %v1714_v14 = vpop.permute.xlu2 %1713  ;;  %663 = vst.msk [vmem:[#allocation3 + $0x60] sm:$0xff] %vm530_vm1, %v3617_v53 }
 0x142   : > { %1810 = vst.msk [vmem:[#allocation3] sm:$0xff] %vm1809_vm8, %v1714_v14  ;;  %v804_v15 = vpop.permute.xlu1 %803  ;;  %v3667_v14 = vld [vmem:[#allocation2 + $0x9a] sm:$0xff] }
 0x143   : > { %872 = vst.msk [vmem:[#allocation3 + $0xe0] sm:$0xff] %vm843_vm3, %v804_v15 }
 0x144   : > { %1065 = vst.msk [vmem:[#allocation3 + $0xe0] sm:$0xff] %vm1036_vm4, %v997_v3 }
 0x147   : > { %765 = vrot.lane.b32.xlu0 %v3546_v16, %s3101_s12  ;;  %958 = vrot.lane.b32.xlu2 %v3548_v17, %s3102_s29 }
 0x148   : > { %1145 = vrot.lane.b32.xlu1 %v3507_v54, %s3104_s18 }
 0x149   : > { %v808_v19 = vpop.permute.xlu0 %807  ;;  %v1331_v20 = vpop.permute.xlu2 %1330 }
 0x14a   : > { %874 = vst.msk [vmem:[#allocation3 + $0xf0] sm:$0xff] %vm843_vm3, %v808_v19  ;;  %v754_v21 = vpop.permute.xlu1 %753 }
 0x14b   : > { %847 = vst.msk [vmem:[#allocation3 + $0x18] sm:$0xff] %vm843_vm3, %v754_v21 }
 0x14c   : > { %1040 = vst.msk [vmem:[#allocation3 + $0x18] sm:$0xff] %vm1036_vm4, %v3493_v42  ;;  %v2297_v42 = vpack.c.b16 %v2294_v40, %v2294_v40 }
 0x14e   : > { %v2351_v46 = vsel %vm2349_vm10, %v2297_v42, 0 }
 0x14f   : > { %2109 = vrot.lane.b32.xlu0 %v3548_v17, %s3107_s20  ;;  %1147 = vrot.lane.b32.xlu2 %v3510_v55, %s3104_s18 }
 0x150   : > { %1721 = vrot.lane.b32.xlu1 %v3507_v54, %s3106_s15  ;;  %2358 = vmatpush.bf16.msra.mxu1 %v2351_v46  ;;  %v3620_v54 = vld [vmem:[#allocation2 + $0x98] sm:$0xff] }
 0x151   : > { %v949_v27 = vpop.permute.xlu0 %948  ;;  %v758_v28 = vpop.permute.xlu2 %757  ;;  %2900 = vmatpush.bf16.msrb.mxu3 %v2351_v46  ;;  %664 = vst.msk [vmem:[#allocation3 + $0x68] sm:$0xff] %vm530_vm1, %v3620_v54 }
 0x152   : > { %1041 = vst.msk [vmem:[#allocation3 + $0x20] sm:$0xff] %vm1036_vm4, %v949_v27  ;;  %v945_v29 = vpop.permute.xlu1 %944 }
 0x153   : > { %849 = vst.msk [vmem:[#allocation3 + $0x28] sm:$0xff] %vm843_vm3, %v758_v28 }
 0x154   : > { %1039 = vst.msk [vmem:[#allocation3 + $0x10] sm:$0xff] %vm1036_vm4, %v945_v29  ;;  %2359 = vmatpush.bf16.msra.mxu1 %v2897_v48 }
 0x155   : > { %1232 = vst.msk [vmem:[#allocation3 + $0x10] sm:$0xff] %vm1229_vm5, %v1138_v13  ;;  %2901 = vmatpush.bf16.msrb.mxu3 %v2897_v48 }
 0x156   : > { %1425 = vst.msk [vmem:[#allocation3 + $0x10] sm:$0xff] %vm1422_vm6, %v1331_v20 }
 0x157   : > { %1531 = vrot.lane.b32.xlu0 %v1461_v32, %s3103_s11  ;;  %1723 = vrot.lane.b32.xlu2 %v3510_v55, %s3106_s15  ;;  %v448_v55 = vpop.f32.mrf.mxu0 }
 0x158   : > { %1338 = vrot.lane.b32.xlu1 %v1846_v6, %s3105_s19  ;;  %2360 = vmatpush.bf16.msra.mxu1 %v2896_v49  ;;  %v449_v56 = vadd.f32 %v3384_v24, %v448_v55 }
 0x159   : > { %v1716_v34 = vpop.permute.xlu0 %1715  ;;  %v1909_v35 = vpop.permute.xlu2 %1908  ;;  %2902 = vmatpush.bf16.msrb.mxu3 %v2896_v49 }
 0x15a   : > { %v1522_v36 = vpop.permute.xlu1 %1521  ;;  %v510_v57 = vmax.f32 %v449_v56, 0.0 }
 0x15b   : > { %1617 = vst.msk [vmem:[#allocation3 + $0x8] sm:$0xff] %vm1615_vm7, %v1522_v36 }
 0x15c   : > { %1811 = vst.msk [vmem:[#allocation3 + $0x8] sm:$0xff] %vm1809_vm8, %v1716_v34 }
 0x15d   : > { %2004 = vst.msk [vmem:[#allocation3 + $0x8] sm:$0xff] %vm2002_vm9, %v1909_v35 }
 0x15e   : > { %599 = vst.msk [vmem:[#allocation2 + $0xa9] sm:$0xff] %vm530_vm1, %v510_v57 }
 0x15f   : > { %1149 = vrot.lane.b32.xlu0 %v3550_v18, %s3104_s18  ;;  %2107 = vrot.lane.b32.xlu2 %v1461_v32, %s3107_s20  ;;  %v450_v61 = vpop.f32.mrf.mxu0 }
 0x160   : > { %956 = vrot.lane.b32.xlu1 %v1461_v32, %s3102_s29  ;;  %v451_v62 = vadd.f32 %v3384_v24, %v450_v61 }
 0x161   : > { %v2100_v43 = vpop.permute.xlu0 %2099  ;;  %v1526_v44 = vpop.permute.xlu2 %1525 }
 0x162   : > { %v999_v45 = vpop.permute.xlu1 %998  ;;  %v511_v1 = vmax.f32 %v451_v62, 0.0 }
 0x163   : > { %1066 = vst.msk [vmem:[#allocation3 + $0xe8] sm:$0xff] %vm1036_vm4, %v999_v45  ;;  %v3730_v45 = vld [vmem:[#allocation2 + $0x99] sm:$0xff] }
 0x164   : > { %600 = vst.msk [vmem:[#allocation2 + $0xb1] sm:$0xff] %vm530_vm1, %v511_v1 }
 0x165   : > { %v3661_v11 = vld [vmem:[#allocation2 + $0xa8] sm:$0xff] }
 0x166   : > { %665 = vst.msk [vmem:[#allocation3 + $0x70] sm:$0xff] %vm530_vm1, %v3661_v11  ;;  %v3722_v42 = vld [vmem:[#allocation2 + $0xa9] sm:$0xff] }
 0x167   : > { %960 = vrot.lane.b32.xlu0 %v3602_v47, %s3102_s29  ;;  %1340 = vrot.lane.b32.xlu2 %v3546_v16, %s3105_s19  ;;  %v453_v6 = vpop.f32.mrf.mxu0 }
 0x168   : > { %1916 = vrot.lane.b32.xlu1 %v3546_v16, %s3108_s9  ;;  %v454_v7 = vadd.f32 %v3384_v24, %v453_v6 }
 0x169   : > { %v1333_v50 = vpop.permute.xlu0 %1332  ;;  %v1001_v51 = vpop.permute.xlu2 %1000 }
 0x16a   : > { %1067 = vst.msk [vmem:[#allocation3 + $0xf0] sm:$0xff] %vm1036_vm4, %v1001_v51  ;;  %v1907_v52 = vpop.permute.xlu1 %1906  ;;  %v512_v8 = vmax.f32 %v454_v7, 0.0 }
 0x16b   : > { %2003 = vst.msk [vmem:[#allocation3] sm:$0xff] %vm2002_vm9, %v1907_v52  ;;  %v3664_v13 = vld [vmem:[#allocation2 + $0xb0] sm:$0xff] }
 0x16c   : > { %2196 = vst.msk [vmem:[#allocation3] sm:$0xff] %vm2195_vm11, %v2100_v43  ;;  %v3720_v41 = vld [vmem:[#allocation2 + $0xb1] sm:$0xff] }
 0x16d   : > { %601 = vst.msk [vmem:[#allocation2 + $0xc1] sm:$0xff] %vm530_vm1, %v512_v8  ;;  %v3743_v57 = vld [vmem:[#allocation2 + $0xb2] sm:$0xff]  ;;  %v3765_v1 = vld [vmem:[#allocation2 + $0xaa] sm:$0xff] }
 0x16e   : > { %666 = vst.msk [vmem:[#allocation3 + $0x78] sm:$0xff] %vm530_vm1, %v3664_v13 }
 0x16f   : > { %1727 = vrot.lane.b32.xlu0 %v3561_v22, %s3106_s15  ;;  %1725 = vrot.lane.b32.xlu2 %v3550_v18, %s3106_s15  ;;  %v455_v15 = vpop.f32.mrf.mxu0 }
 0x170   : > { %1533 = vrot.lane.b32.xlu1 %v3548_v17, %s3103_s11  ;;  %v456_v16 = vadd.f32 %v3384_v24, %v455_v15  ;;  %v3677_v17 = vld [vmem:[#allocation2 + $0x82] sm:$0xff] }
 0x171   : > { %v3634_v58 = vpop.permute.xlu0 %1002  ;;  %v1142_v59 = vpop.permute.xlu2 %1141 }
 0x172   : > { %1234 = vst.msk [vmem:[#allocation3 + $0x20] sm:$0xff] %vm1229_vm5, %v1142_v59  ;;  %v951_v60 = vpop.permute.xlu1 %950  ;;  %v513_v18 = vmax.f32 %v456_v16, 0.0 }
 0x173   : > { %1042 = vst.msk [vmem:[#allocation3 + $0x28] sm:$0xff] %vm1036_vm4, %v951_v60  ;;  %v2228_v23 = vld [vmem:[#allocation3] sm:$0xff] }
 0x174   : > { %602 = vst.msk [vmem:[#allocation2 + $0xc9] sm:$0xff] %vm530_vm1, %v513_v18  ;;  %v3687_v28 = vld [vmem:[#allocation2 + $0xc0] sm:$0xff] }
 0x175   : > { %667 = vst.msk [vmem:[#allocation3 + $0x80] sm:$0xff] %vm530_vm1, %v3687_v28 }
 0x177   : > { %2111 = vrot.lane.b32.xlu0 %v3602_v47, %s3107_s20  ;;  %769 = vrot.lane.b32.xlu2 %v3640_v63, %s3101_s12  ;;  %v458_v27 = vpop.f32.mrf.mxu0 }
 0x178   : > { %767 = vrot.lane.b32.xlu1 %v693_v0, %s3101_s12  ;;  %v459_v29 = vadd.f32 %v3384_v24, %v458_v27 }
 0x179   : > { %v760_v2 = vpop.permute.xlu0 %759  ;;  %v1911_v3 = vpop.permute.xlu2 %1910 }
 0x17a   : > { %850 = vst.msk [vmem:[#allocation3 + $0x30] sm:$0xff] %vm843_vm3, %v760_v2  ;;  %v1140_v4 = vpop.permute.xlu1 %1139  ;;  %v514_v30 = vmax.f32 %v459_v29, 0.0 }
 0x17b   : > { %1233 = vst.msk [vmem:[#allocation3 + $0x18] sm:$0xff] %vm1229_vm5, %v1140_v4  ;;  %v3700_v34 = vld [vmem:[#allocation2 + $0xc8] sm:$0xff] }
 0x17c   : > { %1426 = vst.msk [vmem:[#allocation3 + $0x18] sm:$0xff] %vm1422_vm6, %v1333_v50  ;;  %v3758_v62 = vld [vmem:[#allocation2 + $0xc2] sm:$0xff] }
 0x17d   : > { %1619 = vst.msk [vmem:[#allocation3 + $0x18] sm:$0xff] %vm1615_vm7, %v1526_v44 }
 0x17e   : > { %603 = vst.msk [vmem:[#allocation2 + $0xd9] sm:$0xff] %vm530_vm1, %v514_v30 }
 0x17f   : > { %771 = vrot.lane.b32.xlu0 %v3651_v5, %s3101_s12  ;;  %1920 = vrot.lane.b32.xlu2 %v3640_v63, %s3108_s9  ;;  %v460_v35 = vpop.f32.mrf.mxu0  ;;  %668 = vst.msk [vmem:[#allocation3 + $0x88] sm:$0xff] %vm530_vm1, %v3700_v34 }
 0x180   : > { %1918 = vrot.lane.b32.xlu1 %v693_v0, %s3108_s9  ;;  %v461_v36 = vadd.f32 %v3384_v24, %v460_v35 }
 0x181   : > { %v1718_v9 = vpop.permute.xlu0 %1717  ;;  %v953_v10 = vpop.permute.xlu2 %952 }
 0x182   : > { %1043 = vst.msk [vmem:[#allocation3 + $0x30] sm:$0xff] %vm1036_vm4, %v953_v10  ;;  %v2102_v12 = vpop.permute.xlu1 %2101  ;;  %v515_v37 = vmax.f32 %v461_v36, 0.0 }
 0x183   : > { %2197 = vst.msk [vmem:[#allocation3 + $0x8] sm:$0xff] %vm2195_vm11, %v2102_v12 }
 0x184   : > { %604 = vst.msk [vmem:[#allocation2 + $0xe1] sm:$0xff] %vm530_vm1, %v515_v37 }
 0x185   : > { %v3736_v51 = vld [vmem:[#allocation2 + $0xd8] sm:$0xff] }
 0x186   : > { %669 = vst.msk [vmem:[#allocation3 + $0x90] sm:$0xff] %vm530_vm1, %v3736_v51  ;;  %v3774_v12 = vld [vmem:[#allocation2 + $0xd9] sm:$0xff] }
 0x187   : > { %966 = vrot.lane.b32.xlu0 %v3667_v14, %s3102_s29  ;;  %1342 = vrot.lane.b32.xlu2 %v693_v0, %s3105_s19  ;;  %v463_v43 = vpop.f32.mrf.mxu0 }
 0x188   : > { %962 = vrot.lane.b32.xlu1 %v3677_v17, %s3102_s29  ;;  %v464_v44 = vadd.f32 %v3384_v24, %v463_v43 }
 0x189   : > { %v1335_v19 = vpop.permute.xlu0 %1334  ;;  %v2106_v20 = vpop.permute.xlu2 %2105 }
 0x18a   : > { %1427 = vst.msk [vmem:[#allocation3 + $0x20] sm:$0xff] %vm1422_vm6, %v1335_v19  ;;  %v1524_v21 = vpop.permute.xlu1 %1523  ;;  %v2229_v25 = vld [vmem:[#allocation3 + $0x8] sm:$0xff]  ;;  %v516_v46 = vmax.f32 %v464_v44, 0.0  ;;  %v3781_v19 = vld [vmem:[#allocation2 + $0xc9] sm:$0xff] }
 0x18b   : > { %1618 = vst.msk [vmem:[#allocation3 + $0x10] sm:$0xff] %vm1615_vm7, %v1524_v21  ;;  %v2260_v26 = vpack.c.bf16 %v2229_v25, %v2228_v23  ;;  %v3739_v55 = vld [vmem:[#allocation2 + $0xe0] sm:$0xff] }
 0x18c   : > { %1812 = vst.msk [vmem:[#allocation3 + $0x10] sm:$0xff] %vm1809_vm8, %v1718_v9  ;;  %v3799_v27 = vld [vmem:[#allocation2 + $0xe2] sm:$0xff] }
 0x18d   : > { %2005 = vst.msk [vmem:[#allocation3 + $0x10] sm:$0xff] %vm2002_vm9, %v1911_v3  ;;  %2857 = vmatmul.msk.bf16.vlgmr.msra.gmra.mxu1 %vm2300_vm12, %v2260_v26 }
 0x18e   : > { %605 = vst.msk [vmem:[#allocation2 + $0xf1] sm:$0xff] %vm530_vm1, %v516_v46 }
 0x18f   : > { %1155 = vrot.lane.b32.xlu0 %v3620_v54, %s3104_s18  ;;  %1153 = vrot.lane.b32.xlu2 %v3617_v53, %s3104_s18  ;;  %v465_v52 = vpop.f32.mrf.mxu0  ;;  %670 = vst.msk [vmem:[#allocation3 + $0x98] sm:$0xff] %vm530_vm1, %v3739_v55 }
 0x190   : > { %1151 = vrot.lane.b32.xlu1 %v3561_v22, %s3104_s18  ;;  %v3708_v22 = vld [vmem:[#allocation2 + $0x92] sm:$0xff]  ;;  %v466_v56 = vadd.f32 %v3384_v24, %v465_v52 }
 0x191   : > { %v955_v31 = vpop.permute.xlu0 %954  ;;  %v1528_v32 = vpop.permute.xlu2 %1527 }
 0x192   : > { %1620 = vst.msk [vmem:[#allocation3 + $0x20] sm:$0xff] %vm1615_vm7, %v1528_v32  ;;  %v810_v33 = vpop.permute.xlu1 %809 }
 0x193   : > { %875 = vst.msk [vmem:[#allocation3 + $0xf8] sm:$0xff] %vm843_vm3, %v810_v33 }
 0x194   : > { %1068 = vst.msk [vmem:[#allocation3 + $0xf8] sm:$0xff] %vm1036_vm4, %v3634_v58  ;;  %v517_v58 = vmax.f32 %v466_v56, 0.0 }
 0x195   : > { %v3771_v10 = vld [vmem:[#allocation2 + $0xf0] sm:$0xff] }
 0x196   : > { %606 = vst.msk [vmem:[#allocation2 + $0xf9] sm:$0xff] %vm530_vm1, %v517_v58 }
 0x197   : > { %1344 = vrot.lane.b32.xlu0 %v3640_v63, %s3105_s19  ;;  %964 = vrot.lane.b32.xlu2 %v3708_v22, %s3102_s29  ;;  %v468_v63 = vpop.f32.mrf.mxu0  ;;  %671 = vst.msk [vmem:[#allocation3 + $0xa0] sm:$0xff] %vm530_vm1, %v3771_v10 }
 0x198   : > { %2113 = vrot.lane.b32.xlu1 %v3677_v17, %s3107_s20  ;;  %v469_v0 = vadd.f32 %v3384_v24, %v468_v63 }
 0x199   : > { %v1144_v38 = vpop.permute.xlu0 %1143  ;;  %v764_v39 = vpop.permute.xlu2 %763 }
 0x19a   : > { %1235 = vst.msk [vmem:[#allocation3 + $0x28] sm:$0xff] %vm1229_vm5, %v1144_v38  ;;  %v762_v40 = vpop.permute.xlu1 %761  ;;  %v518_v2 = vmax.f32 %v469_v0, 0.0  ;;  %v3860_v0 = vld [vmem:[#allocation2 + $0xf1] sm:$0xff] }
 0x19b   : > { %852 = vst.msk [vmem:[#allocation3 + $0x40] sm:$0xff] %vm843_vm3, %v764_v39  ;;  %v3818_v39 = vld [vmem:[#allocation2 + $0xda] sm:$0xff] }
 0x19c   : > { %851 = vst.msk [vmem:[#allocation3 + $0x38] sm:$0xff] %vm843_vm3, %v762_v40 }
 0x19d   : > { %1044 = vst.msk [vmem:[#allocation3 + $0x38] sm:$0xff] %vm1036_vm4, %v955_v31  ;;  %v3776_v16 = vld [vmem:[#allocation2 + $0xf8] sm:$0xff]  ;;  %v3806_v31 = vld [vmem:[#allocation2 + $0xca] sm:$0xff] }
 0x19e   : > { %607 = vst.msk [vmem:[#allocation2 + $0x109] sm:$0xff] %vm530_vm1, %v518_v2 }
 0x19f   : > { %777 = vrot.lane.b32.xlu0 %v3720_v41, %s3101_s12  ;;  %775 = vrot.lane.b32.xlu2 %v3722_v42, %s3101_s12  ;;  %v470_v15 = vpop.f32.mrf.mxu0  ;;  %672 = vst.msk [vmem:[#allocation3 + $0xa8] sm:$0xff] %vm530_vm1, %v3776_v16 }
 0x1a0   : > { %773 = vrot.lane.b32.xlu1 %v3730_v45, %s3101_s12  ;;  %v471_v18 = vadd.f32 %v3384_v24, %v470_v15 }
 0x1a1   : > { %v1913_v48 = vpop.permute.xlu0 %1912  ;;  %v959_v49 = vpop.permute.xlu2 %958 }
 0x1a2   : > { %v1720_v50 = vpop.permute.xlu1 %1719  ;;  %v519_v21 = vmax.f32 %v471_v18, 0.0 }
 0x1a3   : > { %1813 = vst.msk [vmem:[#allocation3 + $0x18] sm:$0xff] %vm1809_vm8, %v1720_v50  ;;  %v3848_v50 = vld [vmem:[#allocation2 + $0xe1] sm:$0xff] }
 0x1a4   : > { %2006 = vst.msk [vmem:[#allocation3 + $0x18] sm:$0xff] %vm2002_vm9, %v1913_v48 }
 0x1a5   : > { %2199 = vst.msk [vmem:[#allocation3 + $0x18] sm:$0xff] %vm2195_vm11, %v2106_v20  ;;  %v3789_v20 = vld [vmem:[#allocation2 + $0xc1] sm:$0xff] }
 0x1a6   : > { %608 = vst.msk [vmem:[#allocation2 + $0x111] sm:$0xff] %vm530_vm1, %v519_v21  ;;  %v3816_v38 = vld [vmem:[#allocation2 + $0x108] sm:$0xff] }
 0x1a7   : > { %1161 = vrot.lane.b32.xlu0 %v3687_v28, %s3104_s18  ;;  %970 = vrot.lane.b32.xlu2 %v3743_v57, %s3102_s29  ;;  %v473_v29 = vpop.f32.mrf.mxu0  ;;  %673 = vst.msk [vmem:[#allocation3 + $0xb0] sm:$0xff] %vm530_vm1, %v3816_v38 }
 0x1a8   : > { %1157 = vrot.lane.b32.xlu1 %v3661_v11, %s3104_s18  ;;  %v474_v30 = vadd.f32 %v3384_v24, %v473_v29 }
 0x1a9   : > { %v1530_v59 = vpop.permute.xlu0 %1529  ;;  %v1148_v60 = vpop.permute.xlu2 %1147 }
 0x1aa   : > { %1237 = vst.msk [vmem:[#allocation3 + $0x38] sm:$0xff] %vm1229_vm5, %v1148_v60  ;;  %v2104_v61 = vpop.permute.xlu1 %2103  ;;  %v520_v36 = vmax.f32 %v474_v30, 0.0 }
 0x1ab   : > { %2198 = vst.msk [vmem:[#allocation3 + $0x10] sm:$0xff] %vm2195_vm11, %v2104_v61 }
 0x1ac   : > { %v2231_v8 = vld [vmem:[#allocation3 + $0x18] sm:$0xff]  ;;  %609 = vst.msk [vmem:[#allocation2 + $0x121] sm:$0xff] %vm530_vm1, %v520_v36 }
 0x1ad   : > { %v3813_v37 = vld [vmem:[#allocation2 + $0x110] sm:$0xff] }
 0x1ae   : > { %674 = vst.msk [vmem:[#allocation3 + $0xb8] sm:$0xff] %vm530_vm1, %v3813_v37 }
 0x1af   : > { %972 = vrot.lane.b32.xlu0 %v3758_v62, %s3102_s29  ;;  %1159 = vrot.lane.b32.xlu2 %v3664_v13, %s3104_s18 }
 0x1b0   : > { %968 = vrot.lane.b32.xlu1 %v3765_v1, %s3102_s29 }
 0x1b1   : > { %v1915_v3 = vpop.permute.xlu0 %1914  ;;  %v1724_v4 = vpop.permute.xlu2 %1723 }
 0x1b2   : > { %v1337_v6 = vpop.permute.xlu1 %1336  ;;  %v2230_v7 = vld [vmem:[#allocation3 + $0x10] sm:$0xff] }
 0x1b3   : > { %1428 = vst.msk [vmem:[#allocation3 + $0x28] sm:$0xff] %vm1422_vm6, %v1337_v6  ;;  %v2261_v9 = vpack.c.bf16 %v2231_v8, %v2230_v7  ;;  %v3854_v60 = vld [vmem:[#allocation2 + $0x120] sm:$0xff]  ;;  %v3876_v8 = vld [vmem:[#allocation2 + $0x10a] sm:$0xff] }
 0x1b4   : > { %1621 = vst.msk [vmem:[#allocation3 + $0x28] sm:$0xff] %vm1615_vm7, %v1530_v59  ;;  %v3893_v30 = vld [vmem:[#allocation2 + $0x121] sm:$0xff] }
 0x1b5   : > { %1815 = vst.msk [vmem:[#allocation3 + $0x28] sm:$0xff] %vm1809_vm8, %v1724_v4  ;;  %2858 = vmatmul.msk.bf16.gmra.mxu1 %vm2300_vm12, %v2261_v9  ;;  %v3878_v9 = vld [vmem:[#allocation2 + $0xfa] sm:$0xff] }
 0x1b6   : > { %675 = vst.msk [vmem:[#allocation3 + $0xc0] sm:$0xff] %vm530_vm1, %v3854_v60 }
 0x1b7   : > { %783 = vrot.lane.b32.xlu0 %v3774_v12, %s3101_s12  ;;  %781 = vrot.lane.b32.xlu2 %v3781_v19, %s3101_s12 }
 0x1b8   : > { %779 = vrot.lane.b32.xlu1 %v3789_v20, %s3101_s12 }
 0x1b9   : > { %v766_v23 = vpop.permute.xlu0 %765  ;;  %v2108_v25 = vpop.permute.xlu2 %2107 }
 0x1ba   : > { %853 = vst.msk [vmem:[#allocation3 + $0x48] sm:$0xff] %vm843_vm3, %v766_v23  ;;  %v1146_v26 = vpop.permute.xlu1 %1145 }
 0x1bb   : > { %1046 = vst.msk [vmem:[#allocation3 + $0x48] sm:$0xff] %vm1036_vm4, %v959_v49 }
 0x1bc   : > { %1236 = vst.msk [vmem:[#allocation3 + $0x30] sm:$0xff] %vm1229_vm5, %v1146_v26 }
 0x1bf   : > { %978 = vrot.lane.b32.xlu0 %v3799_v27, %s3102_s29  ;;  %1537 = vrot.lane.b32.xlu2 %v3677_v17, %s3103_s11  ;;  %v475_v17 = vpop.f32.mrf.mxu0 }
 0x1c0   : > { %974 = vrot.lane.b32.xlu1 %v3806_v31, %s3102_s29  ;;  %v476_v40 = vadd.f32 %v3384_v24, %v475_v17  ;;  %v3835_v24 = vld [vmem:[#allocation2 + $0xf9] sm:$0xff] }
 0x1c1   : > { %v2110_v32 = vpop.permute.xlu0 %2109  ;;  %v1341_v33 = vpop.permute.xlu2 %1340 }
 0x1c2   : > { %1430 = vst.msk [vmem:[#allocation3 + $0x38] sm:$0xff] %vm1422_vm6, %v1341_v33  ;;  %v1722_v35 = vpop.permute.xlu1 %1721  ;;  %v521_v43 = vmax.f32 %v476_v40, 0.0  ;;  %v3899_v33 = vld [vmem:[#allocation2 + $0x111] sm:$0xff] }
 0x1c3   : > { %1814 = vst.msk [vmem:[#allocation3 + $0x20] sm:$0xff] %vm1809_vm8, %v1722_v35  ;;  %v3907_v35 = vld [vmem:[#allocation2 + $0x109] sm:$0xff] }
 0x1c4   : > { %2007 = vst.msk [vmem:[#allocation3 + $0x20] sm:$0xff] %vm2002_vm9, %v1915_v3 }
 0x1c5   : > { %2200 = vst.msk [vmem:[#allocation3 + $0x20] sm:$0xff] %vm2195_vm11, %v2108_v25 }
 0x1c6   : > { %610 = vst.msk [vmem:[#allocation2 + $0x129] sm:$0xff] %vm530_vm1, %v521_v43 }
 0x1c7   : > { %1729 = vrot.lane.b32.xlu0 %v3617_v53, %s3106_s15  ;;  %976 = vrot.lane.b32.xlu2 %v3818_v39, %s3102_s29  ;;  %v478_v53 = vpop.f32.mrf.mxu0 }
 0x1c8   : > { %1535 = vrot.lane.b32.xlu1 %v3602_v47, %s3103_s11  ;;  %v3841_v47 = vld [vmem:[%s4670_s4] ss:$0 sm:$0xff] }
 0x1c9   : > { %v1532_v44 = vpop.permute.xlu0 %1531  ;;  %v1726_v46 = vpop.permute.xlu2 %1725  ;;  %v479_v49 = vadd.f32 %v3841_v47, %v478_v53 }
 0x1ca   : > { %v1339_v48 = vpop.permute.xlu1 %1338 }
 0x1cb   : > { %1429 = vst.msk [vmem:[#allocation3 + $0x30] sm:$0xff] %vm1422_vm6, %v1339_v48  ;;  %v522_v58 = vmax.f32 %v479_v49, 0.0 }
 0x1cc   : > { %1622 = vst.msk [vmem:[#allocation3 + $0x30] sm:$0xff] %vm1615_vm7, %v1532_v44  ;;  %v2232_v23 = vld [vmem:[#allocation3 + $0x20] sm:$0xff] }
 0x1cd   : > { %1816 = vst.msk [vmem:[#allocation3 + $0x30] sm:$0xff] %vm1809_vm8, %v1726_v46  ;;  %v3857_v61 = vld [vmem:[#allocation2 + $0x128] sm:$0xff]  ;;  %v3922_v44 = vld [vmem:[#allocation2 + $0x112] sm:$0xff] }
 0x1ce   : > { %611 = vst.msk [vmem:[#allocation2 + $0x139] sm:$0xff] %vm530_vm1, %v522_v58  ;;  %v3915_v43 = vld [vmem:[#allocation2 + $0x12a] sm:$0xff]  ;;  %v3930_v49 = vld [vmem:[#allocation2 + $0x122] sm:$0xff] }
 0x1cf   : > { %789 = vrot.lane.b32.xlu0 %v3835_v24, %s3101_s12  ;;  %1922 = vrot.lane.b32.xlu2 %v3651_v5, %s3108_s9  ;;  %v480_v63 = vpop.f32.mrf.mxu0  ;;  %676 = vst.msk [vmem:[#allocation3 + $0xc8] sm:$0xff] %vm530_vm1, %v3857_v61 }
 0x1d0   : > { %785 = vrot.lane.b32.xlu1 %v3848_v50, %s3101_s12  ;;  %v481_v2 = vadd.f32 %v3841_v47, %v480_v63 }
 0x1d1   : > { %v1150_v52 = vpop.permute.xlu0 %1149  ;;  %v770_v56 = vpop.permute.xlu2 %769 }
 0x1d2   : > { %855 = vst.msk [vmem:[#allocation3 + $0x58] sm:$0xff] %vm843_vm3, %v770_v56  ;;  %v957_v59 = vpop.permute.xlu1 %956  ;;  %v523_v3 = vmax.f32 %v481_v2, 0.0 }
 0x1d3   : > { %1045 = vst.msk [vmem:[#allocation3 + $0x40] sm:$0xff] %vm1036_vm4, %v957_v59 }
 0x1d4   : > { %1238 = vst.msk [vmem:[#allocation3 + $0x40] sm:$0xff] %vm1229_vm5, %v1150_v52  ;;  %v2490_v52 = vld [vmem:[%s4669_s3] sm:$0x3] }
 0x1d5   : > { %612 = vst.msk [vmem:[#allocation2 + $0x141] sm:$0xff] %vm530_vm1, %v523_v3  ;;  %v3890_v26 = vld [vmem:[#allocation2 + $0x138] sm:$0xff]  ;;  %v2544_v56 = vsel %vm2349_vm10, %v2490_v52, 0 }
 0x1d6   : > { %677 = vst.msk [vmem:[#allocation3 + $0xd0] sm:$0xff] %vm530_vm1, %v3890_v26  ;;  %2553 = vmatpush.bf16.msra.mxu2 %v2544_v56  ;;  %2903 = vmatpush.bf16.msra.mxu3 %v2544_v56 }
 0x1d7   : > { %1924 = vrot.lane.b32.xlu0 %v3730_v45, %s3108_s9  ;;  %787 = vrot.lane.b32.xlu2 %v3860_v0, %s3101_s12 }
 0x1d8   : > { %1731 = vrot.lane.b32.xlu1 %v3620_v54, %s3106_s15  ;;  %v3884_v54 = vld [vmem:[#allocation2 + $0xf2] sm:$0xff] }
 0x1d9   : > { %v961_v4 = vpop.permute.xlu0 %960  ;;  %v1921_v6 = vpop.permute.xlu2 %1920 }
 0x1da   : > { %v1917_v7 = vpop.permute.xlu1 %1916 }
 0x1db   : > { %2008 = vst.msk [vmem:[#allocation3 + $0x28] sm:$0xff] %vm2002_vm9, %v1917_v7  ;;  %v3956_v7 = vld [vmem:[#allocation2 + $0x139] sm:$0xff] }
 0x1dc   : > { %2201 = vst.msk [vmem:[#allocation3 + $0x28] sm:$0xff] %vm2195_vm11, %v2110_v32  ;;  %v3895_v32 = vld [vmem:[#allocation2 + $0x140] sm:$0xff] }
 0x1dd   : > { %678 = vst.msk [vmem:[#allocation3 + $0xd8] sm:$0xff] %vm530_vm1, %v3895_v32  ;;  %v3944_v2 = vld [vmem:[#allocation2 + $0x141] sm:$0xff] }
 0x1df   : > { %984 = vrot.lane.b32.xlu0 %v3876_v8, %s3102_s29  ;;  %982 = vrot.lane.b32.xlu2 %v3878_v9, %s3102_s29 }
 0x1e0   : > { %980 = vrot.lane.b32.xlu1 %v3884_v54, %s3102_s29 }
 0x1e1   : > { %v1728_v15 = vpop.permute.xlu0 %1727  ;;  %v1343_v18 = vpop.permute.xlu2 %1342 }
 0x1e2   : > { %1431 = vst.msk [vmem:[#allocation3 + $0x40] sm:$0xff] %vm1422_vm6, %v1343_v18  ;;  %v1534_v21 = vpop.permute.xlu1 %1533 }
 0x1e3   : > { %1623 = vst.msk [vmem:[#allocation3 + $0x38] sm:$0xff] %vm1615_vm7, %v1534_v21  ;;  %v2233_v25 = vld [vmem:[#allocation3 + $0x28] sm:$0xff] }
 0x1e4   : > { %1817 = vst.msk [vmem:[#allocation3 + $0x38] sm:$0xff] %vm1809_vm8, %v1728_v15  ;;  %v2262_v29 = vpack.c.bf16 %v2233_v25, %v2232_v23  ;;  %v3969_v23 = vld [vmem:[%s4671_s5] ss:$0 sm:$0xff] }
 0x1e5   : > { %2010 = vst.msk [vmem:[#allocation3 + $0x38] sm:$0xff] %vm2002_vm9, %v1921_v6 }
 0x1e6   : > { %2859 = vmatmul.msk.bf16.gmra.mxu1 %vm2300_vm12, %v2262_v29 }
 0x1e7   : > { %795 = vrot.lane.b32.xlu0 %v3893_v30, %s3101_s12  ;;  %793 = vrot.lane.b32.xlu2 %v3899_v33, %s3101_s12 }
 0x1e8   : > { %791 = vrot.lane.b32.xlu1 %v3907_v35, %s3101_s12 }
 0x1e9   : > { %v2112_v36 = vpop.permute.xlu0 %2111  ;;  %v1154_v17 = vpop.permute.xlu2 %1153 }
 0x1ea   : > { %v768_v40 = vpop.permute.xlu1 %767 }
 0x1eb   : > { %854 = vst.msk [vmem:[#allocation3 + $0x50] sm:$0xff] %vm843_vm3, %v768_v40 }
 0x1ec   : > { %1047 = vst.msk [vmem:[#allocation3 + $0x50] sm:$0xff] %vm1036_vm4, %v961_v4 }
 0x1ed   : > { %1240 = vst.msk [vmem:[#allocation3 + $0x50] sm:$0xff] %vm1229_vm5, %v1154_v17 }
 0x1ef   : > { %990 = vrot.lane.b32.xlu0 %v3915_v43, %s3102_s29  ;;  %2117 = vrot.lane.b32.xlu2 %v3667_v14, %s3107_s20 }
 0x1f0   : > { %986 = vrot.lane.b32.xlu1 %v3922_v44, %s3102_s29 }
 0x1f1   : > { %v772_v46 = vpop.permute.xlu0 %771  ;;  %v965_v48 = vpop.permute.xlu2 %964 }
 0x1f2   : > { %856 = vst.msk [vmem:[#allocation3 + $0x60] sm:$0xff] %vm843_vm3, %v772_v46  ;;  %v1919_v53 = vpop.permute.xlu1 %1918 }
 0x1f3   : > { %1049 = vst.msk [vmem:[#allocation3 + $0x60] sm:$0xff] %vm1036_vm4, %v965_v48 }
 0x1f4   : > { %2009 = vst.msk [vmem:[#allocation3 + $0x30] sm:$0xff] %vm2002_vm9, %v1919_v53 }
 0x1f5   : > { %2202 = vst.msk [vmem:[#allocation3 + $0x30] sm:$0xff] %vm2195_vm11, %v2112_v36 }
 0x1f7   : > { %1346 = vrot.lane.b32.xlu0 %v3651_v5, %s3105_s19  ;;  %988 = vrot.lane.b32.xlu2 %v3930_v49, %s3102_s29  ;;  %v3950_v5 = vld [vmem:[#allocation2 + $0x129] sm:$0xff] }
 0x1f8   : > { %2115 = vrot.lane.b32.xlu1 %v3708_v22, %s3107_s20 }
 0x1f9   : > { %v967_v58 = vpop.permute.xlu0 %966  ;;  %v776_v59 = vpop.permute.xlu2 %775 }
 0x1fa   : > { %858 = vst.msk [vmem:[#allocation3 + $0x70] sm:$0xff] %vm843_vm3, %v776_v59  ;;  %v963_v63 = vpop.permute.xlu1 %962 }
 0x1fb   : > { %1048 = vst.msk [vmem:[#allocation3 + $0x58] sm:$0xff] %vm1036_vm4, %v963_v63 }
 0x1fc   : > { %v2234_v46 = vld [vmem:[#allocation3 + $0x30] sm:$0xff] }
 0x1ff   : > { %801 = vrot.lane.b32.xlu0 %v3944_v2, %s3101_s12  ;;  %1539 = vrot.lane.b32.xlu2 %v3708_v22, %s3103_s11 }
 0x200   : > { %797 = vrot.lane.b32.xlu1 %v3950_v5, %s3101_s12 }
 0x201   : > { %v1156_v3 = vpop.permute.xlu0 %1155  ;;  %v971_v4 = vpop.permute.xlu2 %970 }
 0x202   : > { %1241 = vst.msk [vmem:[#allocation3 + $0x58] sm:$0xff] %vm1229_vm5, %v1156_v3  ;;  %v1152_v6 = vpop.permute.xlu1 %1151 }
 0x203   : > { %1239 = vst.msk [vmem:[#allocation3 + $0x48] sm:$0xff] %vm1229_vm5, %v1152_v6 }
 0x207   : > { %1541 = vrot.lane.b32.xlu0 %v3667_v14, %s3103_s11  ;;  %799 = vrot.lane.b32.xlu2 %v3956_v7, %s3101_s12  ;;  %v3971_v14 = vld [vmem:[#allocation2 + $0x142] sm:$0xff] }
 0x208   : > { %1348 = vrot.lane.b32.xlu1 %v3730_v45, %s3105_s19  ;;  %v3977_v45 = vld [vmem:[#allocation2 + $0x13a] sm:$0xff] }
 0x209   : > { %v1345_v22 = vpop.permute.xlu0 %1344  ;;  %v1160_v15 = vpop.permute.xlu2 %1159 }
 0x20a   : > { %1432 = vst.msk [vmem:[#allocation3 + $0x48] sm:$0xff] %vm1422_vm6, %v1345_v22  ;;  %v2362_v18 = vpop.f32.mrf.mxu1  ;;  %v2114_v21 = vpop.permute.xlu1 %2113 }
 0x20b   : > { %2203 = vst.msk [vmem:[#allocation3 + $0x38] sm:$0xff] %vm2195_vm11, %v2114_v21  ;;  %v2363_v25 = vadd.f32 %v3969_v23, %v2362_v18 }
 0x20d   : > { %v2442_v56 = vmax.f32 %v2363_v25, 0.0 }
 0x20f   : > { %1926 = vrot.lane.b32.xlu0 %v3722_v42, %s3108_s9  ;;  %994 = vrot.lane.b32.xlu2 %v3971_v14, %s3102_s29 }
 0x210   : > { %992 = vrot.lane.b32.xlu1 %v3977_v45, %s3102_s29 }
 0x211   : > { %v778_v29 = vpop.permute.xlu0 %777  ;;  %v782_v36 = vpop.permute.xlu2 %781 }
 0x212   : > { %859 = vst.msk [vmem:[#allocation3 + $0x78] sm:$0xff] %vm843_vm3, %v778_v29  ;;  %v2364_v17 = vpop.f32.mrf.mxu1  ;;  %v774_v40 = vpop.permute.xlu1 %773  ;;  %v2235_v48 = vld [vmem:[#allocation3 + $0x38] sm:$0xff] }
 0x213   : > { %1052 = vst.msk [vmem:[#allocation3 + $0x78] sm:$0xff] %vm1036_vm4, %v971_v4  ;;  %v2365_v53 = vadd.f32 %v3969_v23, %v2364_v17  ;;  %v2263_v52 = vpack.c.bf16 %v2235_v48, %v2234_v46 }
 0x214   : > { %861 = vst.msk [vmem:[#allocation3 + $0x88] sm:$0xff] %vm843_vm3, %v782_v36 }
 0x215   : > { %v2443_v59 = vmax.f32 %v2365_v53, 0.0  ;;  %857 = vst.msk [vmem:[#allocation3 + $0x68] sm:$0xff] %vm843_vm3, %v774_v40  ;;  %2860 = vmatmul.msk.bf16.gmra.mxu1 %vm2300_vm12, %v2263_v52 }
 0x216   : > { %1050 = vst.msk [vmem:[#allocation3 + $0x68] sm:$0xff] %vm1036_vm4, %v967_v58 }
 0x217   : > { %v2474_v63 = vpack.c.bf16 %v2443_v59, %v2442_v56  ;;  %1243 = vst.msk [vmem:[#allocation3 + $0x68] sm:$0xff] %vm1229_vm5, %v1160_v15  ;;  %2121 = vrot.lane.b32.xlu0 %v3743_v57, %s3107_s20  ;;  %1735 = vrot.lane.b32.xlu2 %v3664_v13, %s3106_s15 }
 0x218   : > { %1733 = vrot.lane.b32.xlu1 %v3661_v11, %s3106_s15 }
 0x219   : > { %2873 = vmatmul.msk.bf16.vlgmr.msra.gmra.mxu2 %vm530_vm1, %v2474_v63  ;;  %v1162_v3 = vpop.permute.xlu0 %1161  ;;  %v1538_v4 = vpop.permute.xlu2 %1537  ;;  %v330_v63 = vld [vmem:[%s3242_s16 + $0xf0] sm:$0xff] }
 0x21a   : > { %1625 = vst.msk [vmem:[#allocation3 + $0x48] sm:$0xff] %vm1615_vm7, %v1538_v4  ;;  %v1158_v6 = vpop.permute.xlu1 %1157 }
 0x21b   : > { %1242 = vst.msk [vmem:[#allocation3 + $0x60] sm:$0xff] %vm1229_vm5, %v1158_v6 }
 0x21f   : > { %1543 = vrot.lane.b32.xlu0 %v3765_v1, %s3103_s11  ;;  %2119 = vrot.lane.b32.xlu2 %v3765_v1, %s3107_s20 }
 0x220   : > { %1928 = vrot.lane.b32.xlu1 %v3720_v41, %s3108_s9 }
 0x221   : > { %v973_v13 = vpop.permute.xlu0 %972  ;;  %v977_v11 = vpop.permute.xlu2 %976 }
 0x222   : > { %v969_v58 = vpop.permute.xlu1 %968 }
 0x223   : > { %1051 = vst.msk [vmem:[#allocation3 + $0x70] sm:$0xff] %vm1036_vm4, %v969_v58 }
 0x224   : > { %1244 = vst.msk [vmem:[#allocation3 + $0x70] sm:$0xff] %vm1229_vm5, %v1162_v3  ;;  %v331_v3 = vld [vmem:[%s3242_s16 + $0xf8] sm:$0xff] }
 0x225   : > { %v347_v4 = vpack.c.bf16 %v331_v3, %v330_v63  ;;  %v4150_v63 = vld [vmem:[#allocation2 + $0x152] sm:$0xff] }
 0x226   : > { %v4156_v3 = vld [vmem:[#allocation2 + $0x159] sm:$0xff] }
 0x227   : > { %1739 = vrot.lane.b32.xlu0 %v3700_v34, %s3106_s15  ;;  %1352 = vrot.lane.b32.xlu2 %v3720_v41, %s3105_s19 }
 0x228   : > { %1350 = vrot.lane.b32.xlu1 %v3722_v42, %s3105_s19  ;;  %2848 = vmatmul.msk.bf16.gmra.mxu3 %vm360_vm0, %v347_v4 }
 0x229   : > { %v784_v1 = vpop.permute.xlu0 %783  ;;  %v1923_v22 = vpop.permute.xlu2 %1922 }
 0x22a   : > { %862 = vst.msk [vmem:[#allocation3 + $0x90] sm:$0xff] %vm843_vm3, %v784_v1  ;;  %v780_v15 = vpop.permute.xlu1 %779 }
 0x22b   : > { %1055 = vst.msk [vmem:[#allocation3 + $0x90] sm:$0xff] %vm1036_vm4, %v977_v11 }
 0x22c   : > { %860 = vst.msk [vmem:[#allocation3 + $0x80] sm:$0xff] %vm843_vm3, %v780_v15 }
 0x22d   : > { %1053 = vst.msk [vmem:[#allocation3 + $0x80] sm:$0xff] %vm1036_vm4, %v973_v13 }
 0x22f   : > { %2123 = vrot.lane.b32.xlu0 %v3758_v62, %s3107_s20  ;;  %1737 = vrot.lane.b32.xlu2 %v3687_v28, %s3106_s15 }
 0x230   : > { %1545 = vrot.lane.b32.xlu1 %v3743_v57, %s3103_s11 }
 0x231   : > { %v979_v41 = vpop.permute.xlu0 %978  ;;  %v788_v42 = vpop.permute.xlu2 %787 }
 0x232   : > { %864 = vst.msk [vmem:[#allocation3 + $0xa0] sm:$0xff] %vm843_vm3, %v788_v42  ;;  %v975_v18 = vpop.permute.xlu1 %974  ;;  %v2367_v21 = vpop.f32.mrf.mxu1 }
 0x233   : > { %1054 = vst.msk [vmem:[#allocation3 + $0x88] sm:$0xff] %vm1036_vm4, %v975_v18  ;;  %v2368_v28 = vadd.f32 %v3969_v23, %v2367_v21 }
 0x235   : > { %v2444_v40 = vmax.f32 %v2368_v28, 0.0 }
 0x237   : > { %1354 = vrot.lane.b32.xlu0 %v3789_v20, %s3105_s19  ;;  %1932 = vrot.lane.b32.xlu2 %v3781_v19, %s3108_s9 }
 0x238   : > { %1930 = vrot.lane.b32.xlu1 %v3789_v20, %s3108_s9 }
 0x239   : > { %v1730_v57 = vpop.permute.xlu0 %1729  ;;  %v983_v25 = vpop.permute.xlu2 %982 }
 0x23a   : > { %v1536_v29 = vpop.permute.xlu1 %1535  ;;  %v2369_v36 = vpop.f32.mrf.mxu1 }
 0x23b   : > { %1624 = vst.msk [vmem:[#allocation3 + $0x40] sm:$0xff] %vm1615_vm7, %v1536_v29  ;;  %v2370_v17 = vadd.f32 %v3969_v23, %v2369_v36 }
 0x23c   : > { %1818 = vst.msk [vmem:[#allocation3 + $0x40] sm:$0xff] %vm1809_vm8, %v1730_v57 }
 0x23d   : > { %2011 = vst.msk [vmem:[#allocation3 + $0x40] sm:$0xff] %vm2002_vm9, %v1923_v22  ;;  %v2445_v46 = vmax.f32 %v2370_v17, 0.0 }
 0x23f   : > { %v2475_v48 = vpack.c.bf16 %v2445_v46, %v2444_v40  ;;  %1549 = vrot.lane.b32.xlu0 %v3806_v31, %s3103_s11  ;;  %1163 = vrot.lane.b32.xlu2 %v3700_v34, %s3104_s18 }
 0x240   : > { %2125 = vrot.lane.b32.xlu1 %v3806_v31, %s3107_s20 }
 0x241   : > { %2874 = vmatmul.msk.bf16.gmra.mxu2 %vm530_vm1, %v2475_v48  ;;  %v790_v20 = vpop.permute.xlu0 %789  ;;  %v794_v53 = vpop.permute.xlu2 %793 }
 0x242   : > { %865 = vst.msk [vmem:[#allocation3 + $0xa8] sm:$0xff] %vm843_vm3, %v790_v20  ;;  %v786_v52 = vpop.permute.xlu1 %785 }
 0x243   : > { %1058 = vst.msk [vmem:[#allocation3 + $0xa8] sm:$0xff] %vm1036_vm4, %v983_v25 }
 0x244   : > { %867 = vst.msk [vmem:[#allocation3 + $0xb8] sm:$0xff] %vm843_vm3, %v794_v53  ;;  %v4125_v53 = vld [vmem:[#allocation2 + $0x151] sm:$0xff] }
 0x245   : > { %863 = vst.msk [vmem:[#allocation3 + $0x98] sm:$0xff] %vm843_vm3, %v786_v52 }
 0x246   : > { %1056 = vst.msk [vmem:[#allocation3 + $0x98] sm:$0xff] %vm1036_vm4, %v979_v41 }
 0x247   : > { %1934 = vrot.lane.b32.xlu0 %v3774_v12, %s3108_s9  ;;  %1547 = vrot.lane.b32.xlu2 %v3758_v62, %s3103_s11 }
 0x248   : > { %1356 = vrot.lane.b32.xlu1 %v3781_v19, %s3105_s19 }
 0x249   : > { %v1925_v34 = vpop.permute.xlu0 %1924  ;;  %v2118_v31 = vpop.permute.xlu2 %2117 }
 0x24a   : > { %v1732_v56 = vpop.permute.xlu1 %1731 }
 0x24b   : > { %1819 = vst.msk [vmem:[#allocation3 + $0x48] sm:$0xff] %vm1809_vm8, %v1732_v56  ;;  %v4138_v56 = vld [vmem:[#allocation2 + $0x158] sm:$0xff] }
 0x24c   : > { %2012 = vst.msk [vmem:[#allocation3 + $0x48] sm:$0xff] %vm2002_vm9, %v1925_v34 }
 0x24d   : > { %2205 = vst.msk [vmem:[#allocation3 + $0x48] sm:$0xff] %vm2195_vm11, %v2118_v31  ;;  %v4136_v31 = vld [vmem:[#allocation2 + $0x15a] sm:$0xff] }
 0x24f   : > { %2129 = vrot.lane.b32.xlu0 %v3799_v27, %s3107_s20  ;;  %1743 = vrot.lane.b32.xlu2 %v3739_v55, %s3106_s15 }
 0x250   : > { %1741 = vrot.lane.b32.xlu1 %v3736_v51, %s3106_s15 }
 0x251   : > { %v985_v62 = vpop.permute.xlu0 %984  ;;  %v989_v19 = vpop.permute.xlu2 %988 }
 0x252   : > { %v981_v59 = vpop.permute.xlu1 %980 }
 0x253   : > { %1057 = vst.msk [vmem:[#allocation3 + $0xa0] sm:$0xff] %vm1036_vm4, %v981_v59 }
 0x254   : > { %v2237_v29 = vld [vmem:[#allocation3 + $0x48] sm:$0xff] }
 0x257   : > { %1358 = vrot.lane.b32.xlu0 %v3774_v12, %s3105_s19  ;;  %2127 = vrot.lane.b32.xlu2 %v3818_v39, %s3107_s20 }
 0x258   : > { %1936 = vrot.lane.b32.xlu1 %v3848_v50, %s3108_s9 }
 0x259   : > { %v796_v6 = vpop.permute.xlu0 %795  ;;  %v1540_v13 = vpop.permute.xlu2 %1539 }
 0x25a   : > { %868 = vst.msk [vmem:[#allocation3 + $0xc0] sm:$0xff] %vm843_vm3, %v796_v6  ;;  %v792_v11 = vpop.permute.xlu1 %791 }
 0x25b   : > { %1061 = vst.msk [vmem:[#allocation3 + $0xc0] sm:$0xff] %vm1036_vm4, %v989_v19 }
 0x25c   : > { %866 = vst.msk [vmem:[#allocation3 + $0xb0] sm:$0xff] %vm843_vm3, %v792_v11  ;;  %v4164_v11 = vld [vmem:[%s4672_s6] ss:$0 sm:$0xff] }
 0x25d   : > { %1059 = vst.msk [vmem:[#allocation3 + $0xb0] sm:$0xff] %vm1036_vm4, %v985_v62 }
 0x25f   : > { %1553 = vrot.lane.b32.xlu0 %v3799_v27, %s3103_s11  ;;  %1167 = vrot.lane.b32.xlu2 %v3739_v55, %s3104_s18 }
 0x260   : > { %1165 = vrot.lane.b32.xlu1 %v3736_v51, %s3104_s18 }
 0x261   : > { %v991_v12 = vpop.permute.xlu0 %990  ;;  %v800_v58 = vpop.permute.xlu2 %799 }
 0x262   : > { %870 = vst.msk [vmem:[#allocation3 + $0xd0] sm:$0xff] %vm843_vm3, %v800_v58  ;;  %v987_v1 = vpop.permute.xlu1 %986 }
 0x263   : > { %1060 = vst.msk [vmem:[#allocation3 + $0xb8] sm:$0xff] %vm1036_vm4, %v987_v1  ;;  %v2372_v22 = vpop.f32.mrf.mxu1 }
 0x264   : > { %v2373_v51 = vadd.f32 %v3969_v23, %v2372_v22 }
 0x266   : > { %v2446_v18 = vmax.f32 %v2373_v51, 0.0 }
 0x267   : > { %1938 = vrot.lane.b32.xlu0 %v3860_v0, %s3108_s9  ;;  %1551 = vrot.lane.b32.xlu2 %v3818_v39, %s3103_s11 }
 0x268   : > { %1360 = vrot.lane.b32.xlu1 %v3848_v50, %s3105_s19 }
 0x269   : > { %v1347_v55 = vpop.permute.xlu0 %1346  ;;  %v995_v27 = vpop.permute.xlu2 %994 }
 0x26a   : > { %1433 = vst.msk [vmem:[#allocation3 + $0x50] sm:$0xff] %vm1422_vm6, %v1347_v55  ;;  %v2116_v15 = vpop.permute.xlu1 %2115 }
 0x26b   : > { %1626 = vst.msk [vmem:[#allocation3 + $0x50] sm:$0xff] %vm1615_vm7, %v1540_v13  ;;  %v2374_v41 = vpop.f32.mrf.mxu1 }
 0x26c   : > { %2204 = vst.msk [vmem:[#allocation3 + $0x40] sm:$0xff] %vm2195_vm11, %v2116_v15  ;;  %v2375_v42 = vadd.f32 %v3969_v23, %v2374_v41 }
 0x26e   : > { %v2447_v21 = vmax.f32 %v2375_v42, 0.0 }
 0x26f   : > { %2133 = vrot.lane.b32.xlu0 %v3878_v9, %s3107_s20  ;;  %1747 = vrot.lane.b32.xlu2 %v3776_v16, %s3106_s15 }
 0x270   : > { %v2476_v39 = vpack.c.bf16 %v2447_v21, %v2446_v18  ;;  %1745 = vrot.lane.b32.xlu1 %v3771_v10, %s3106_s15  ;;  %v2966_v18 = vld [vmem:[%s3242_s16] sm:$0xff] }
 0x271   : > { %v802_v50 = vpop.permute.xlu0 %801  ;;  %v1736_v28 = vpop.permute.xlu2 %1735 }
 0x272   : > { %871 = vst.msk [vmem:[#allocation3 + $0xd8] sm:$0xff] %vm843_vm3, %v802_v50  ;;  %v798_v57 = vpop.permute.xlu1 %797  ;;  %2875 = vmatmul.msk.bf16.gmra.mxu2 %vm530_vm1, %v2476_v39 }
 0x273   : > { %1064 = vst.msk [vmem:[#allocation3 + $0xd8] sm:$0xff] %vm1036_vm4, %v995_v27  ;;  %v2236_v25 = vld [vmem:[#allocation3 + $0x40] sm:$0xff] }
 0x274   : > { %869 = vst.msk [vmem:[#allocation3 + $0xc8] sm:$0xff] %vm843_vm3, %v798_v57  ;;  %v2264_v36 = vpack.c.bf16 %v2237_v29, %v2236_v25 }
 0x275   : > { %1062 = vst.msk [vmem:[#allocation3 + $0xc8] sm:$0xff] %vm1036_vm4, %v991_v12 }
 0x276   : > { %2861 = vmatmul.msk.bf16.gmra.mxu1 %vm2300_vm12, %v2264_v36 }
 0x277   : > { %1374 = vrot.lane.b32.xlu0 %v3956_v7, %s3105_s19  ;;  %2131 = vrot.lane.b32.xlu2 %v3884_v54, %s3107_s20 }
 0x278   : > { %1940 = vrot.lane.b32.xlu1 %v3835_v24, %s3108_s9 }
 0x279   : > { %v1542_v17 = vpop.permute.xlu0 %1541  ;;  %v2120_v40 = vpop.permute.xlu2 %2119 }
 0x27a   : > { %v1349_v46 = vpop.permute.xlu1 %1348 }
 0x27b   : > { %1434 = vst.msk [vmem:[#allocation3 + $0x58] sm:$0xff] %vm1422_vm6, %v1349_v46 }
 0x27c   : > { %1627 = vst.msk [vmem:[#allocation3 + $0x58] sm:$0xff] %vm1615_vm7, %v1542_v17 }
 0x27d   : > { %1821 = vst.msk [vmem:[#allocation3 + $0x58] sm:$0xff] %vm1809_vm8, %v1736_v28 }
 0x27f   : > { %1569 = vrot.lane.b32.xlu0 %v3971_v14, %s3103_s11  ;;  %1183 = vrot.lane.b32.xlu2 %v3895_v32, %s3104_s18 }
 0x280   : > { %1181 = vrot.lane.b32.xlu1 %v3890_v26, %s3104_s18 }
 0x281   : > { %v1927_v7 = vpop.permute.xlu0 %1926  ;;  %v1353_v48 = vpop.permute.xlu2 %1352 }
 0x282   : > { %1436 = vst.msk [vmem:[#allocation3 + $0x68] sm:$0xff] %vm1422_vm6, %v1353_v48  ;;  %v993_v20 = vpop.permute.xlu1 %992 }
 0x283   : > { %1063 = vst.msk [vmem:[#allocation3 + $0xd0] sm:$0xff] %vm1036_vm4, %v993_v20 }
 0x287   : > { %1954 = vrot.lane.b32.xlu0 %v4125_v53, %s3108_s9  ;;  %1567 = vrot.lane.b32.xlu2 %v3977_v45, %s3103_s11 }
 0x288   : > { %1376 = vrot.lane.b32.xlu1 %v3944_v2, %s3105_s19  ;;  %v4144_v2 = vld [vmem:[#allocation2 + $0x150] sm:$0xff] }
 0x289   : > { %v2122_v14 = vpop.permute.xlu0 %2121  ;;  %v1738_v52 = vpop.permute.xlu2 %1737 }
 0x28a   : > { %v1734_v34 = vpop.permute.xlu1 %1733 }
 0x28b   : > { %1820 = vst.msk [vmem:[#allocation3 + $0x50] sm:$0xff] %vm1809_vm8, %v1734_v34 }
 0x28c   : > { %2013 = vst.msk [vmem:[#allocation3 + $0x50] sm:$0xff] %vm2002_vm9, %v1927_v7 }
 0x28d   : > { %2206 = vst.msk [vmem:[#allocation3 + $0x50] sm:$0xff] %vm2195_vm11, %v2120_v40 }
 0x28f   : > { %2149 = vrot.lane.b32.xlu0 %v4136_v31, %s3107_s20  ;;  %1763 = vrot.lane.b32.xlu2 %v4138_v56, %s3106_s15 }
 0x290   : > { %1761 = vrot.lane.b32.xlu1 %v4144_v2, %s3106_s15 }
 0x291   : > { %v1544_v45 = vpop.permute.xlu0 %1543  ;;  %v1933_v62 = vpop.permute.xlu2 %1932 }
 0x292   : > { %v1929_v19 = vpop.permute.xlu1 %1928  ;;  %v2377_v59 = vpop.f32.mrf.mxu1 }
 0x293   : > { %2014 = vst.msk [vmem:[#allocation3 + $0x58] sm:$0xff] %vm2002_vm9, %v1929_v19  ;;  %v2378_v4 = vadd.f32 %v3969_v23, %v2377_v59  ;;  %v2968_v59 = vld [vmem:[%s3242_s16 + $0x10] sm:$0xff] }
 0x294   : > { %2207 = vst.msk [vmem:[#allocation3 + $0x58] sm:$0xff] %vm2195_vm11, %v2122_v14  ;;  %v2238_v1 = vld [vmem:[#allocation3 + $0x50] sm:$0xff] }
 0x295   : > { %v2448_v51 = vmax.f32 %v2378_v4, 0.0 }
 0x297   : > { %1362 = vrot.lane.b32.xlu0 %v3860_v0, %s3105_s19  ;;  %2147 = vrot.lane.b32.xlu2 %v4150_v63, %s3107_s20 }
 0x298   : > { %1956 = vrot.lane.b32.xlu1 %v4156_v3, %s3108_s9 }
 0x299   : > { %v1740_v6 = vpop.permute.xlu0 %1739  ;;  %v1164_v13 = vpop.permute.xlu2 %1163 }
 0x29a   : > { %1245 = vst.msk [vmem:[#allocation3 + $0x78] sm:$0xff] %vm1229_vm5, %v1164_v13  ;;  %v1351_v0 = vpop.permute.xlu1 %1350  ;;  %v2379_v12 = vpop.f32.mrf.mxu1 }
 0x29b   : > { %1435 = vst.msk [vmem:[#allocation3 + $0x60] sm:$0xff] %vm1422_vm6, %v1351_v0  ;;  %v2380_v58 = vadd.f32 %v3969_v23, %v2379_v12  ;;  %v2239_v22 = vld [vmem:[#allocation3 + $0x58] sm:$0xff] }
 0x29c   : > { %1628 = vst.msk [vmem:[#allocation3 + $0x60] sm:$0xff] %vm1615_vm7, %v1544_v45  ;;  %v2555_v55 = vpop.f32.mrf.mxu2  ;;  %v2265_v27 = vpack.c.bf16 %v2239_v22, %v2238_v1  ;;  %v2969_v1 = vld [vmem:[%s3242_s16 + $0x18] sm:$0xff] }
 0x29d   : > { %1822 = vst.msk [vmem:[#allocation3 + $0x60] sm:$0xff] %vm1809_vm8, %v1738_v52  ;;  %v2449_v15 = vmax.f32 %v2380_v58, 0.0  ;;  %v2556_v41 = vadd.f32 %v4164_v11, %v2555_v55  ;;  %v4246_v58 = vld [vmem:[#allocation2 + $0x172] sm:$0xff]  ;;  %v4255_v22 = vld [vmem:[#allocation2 + $0x168] sm:$0xff] }
 0x29e   : > { %2862 = vmatmul.msk.bf16.gmra.mxu1 %vm2300_vm12, %v2265_v27 }
 0x29f   : > { %v2477_v42 = vpack.c.bf16 %v2449_v15, %v2448_v51  ;;  %v2635_v21 = vadd.f32 %v2966_v18, %v2556_v41  ;;  %1557 = vrot.lane.b32.xlu0 %v3878_v9, %s3103_s11  ;;  %1171 = vrot.lane.b32.xlu2 %v3776_v16, %s3104_s18  ;;  %v2967_v16 = vld [vmem:[%s3242_s16 + $0x8] sm:$0xff] }
 0x2a0   : > { %1169 = vrot.lane.b32.xlu1 %v3771_v10, %s3104_s18 }
 0x2a1   : > { %v2667_v39 = vmax.f32 %v2635_v21, 0.0  ;;  %2876 = vmatmul.msk.bf16.gmra.mxu2 %vm530_vm1, %v2477_v42  ;;  %v2124_v50 = vpop.permute.xlu0 %2123  ;;  %v1548_v28 = vpop.permute.xlu2 %1547  ;;  %v4267_v21 = vld [vmem:[#allocation2 + $0x16a] sm:$0xff] }
 0x2a2   : > { %v1546_v57 = vpop.permute.xlu1 %1545 }
 0x2a3   : > { %2699 = vst.msk [vmem:[%s4183_s23] sm:$0xff] %vm360_vm0, %v2667_v39  ;;  %v4269_v39 = vld [vmem:[#allocation2 + $0x171] sm:$0xff] }
 0x2a4   : > { %1629 = vst.msk [vmem:[#allocation3 + $0x68] sm:$0xff] %vm1615_vm7, %v1546_v57  ;;  %v2557_v9 = vpop.f32.mrf.mxu2 }
 0x2a5   : > { %1823 = vst.msk [vmem:[#allocation3 + $0x68] sm:$0xff] %vm1809_vm8, %v1740_v6  ;;  %v2558_v10 = vadd.f32 %v4164_v11, %v2557_v9 }
 0x2a6   : > { %2016 = vst.msk [vmem:[#allocation3 + $0x68] sm:$0xff] %vm2002_vm9, %v1933_v62 }
 0x2a7   : > { %v2636_v25 = vadd.f32 %v2967_v16, %v2558_v10  ;;  %1942 = vrot.lane.b32.xlu0 %v3907_v35, %s3108_s9  ;;  %1555 = vrot.lane.b32.xlu2 %v3884_v54, %s3103_s11 }
 0x2a8   : > { %1364 = vrot.lane.b32.xlu1 %v3835_v24, %s3105_s19 }
 0x2a9   : > { %v2668_v29 = vmax.f32 %v2636_v25, 0.0  ;;  %v1355_v36 = vpop.permute.xlu0 %1354  ;;  %v1744_v17 = vpop.permute.xlu2 %1743 }
 0x2aa   : > { %1437 = vst.msk [vmem:[#allocation3 + $0x70] sm:$0xff] %vm1422_vm6, %v1355_v36  ;;  %v1931_v40 = vpop.permute.xlu1 %1930 }
 0x2ab   : > { %2700 = vst.msk [vmem:[%s4183_s23 + $0x8] sm:$0xff] %vm360_vm0, %v2668_v29 }
 0x2ac   : > { %1630 = vst.msk [vmem:[#allocation3 + $0x70] sm:$0xff] %vm1615_vm7, %v1548_v28 }
 0x2ad   : > { %2015 = vst.msk [vmem:[#allocation3 + $0x60] sm:$0xff] %vm2002_vm9, %v1931_v40 }
 0x2ae   : > { %2208 = vst.msk [vmem:[#allocation3 + $0x60] sm:$0xff] %vm2195_vm11, %v2124_v50 }
 0x2af   : > { %2137 = vrot.lane.b32.xlu0 %v3922_v44, %s3107_s20  ;;  %1751 = vrot.lane.b32.xlu2 %v3813_v37, %s3106_s15 }
 0x2b0   : > { %1749 = vrot.lane.b32.xlu1 %v3816_v38, %s3106_s15 }
 0x2b1   : > { %v1550_v24 = vpop.permute.xlu0 %1549  ;;  %v2128_v54 = vpop.permute.xlu2 %2127 }
 0x2b2   : > { %v2126_v46 = vpop.permute.xlu1 %2125 }
 0x2b3   : > { %2209 = vst.msk [vmem:[#allocation3 + $0x68] sm:$0xff] %vm2195_vm11, %v2126_v46 }
 0x2b5   : > { %v2240_v14 = vld [vmem:[#allocation3 + $0x60] sm:$0xff] }
 0x2b7   : > { %1378 = vrot.lane.b32.xlu0 %v4125_v53, %s3105_s19  ;;  %2135 = vrot.lane.b32.xlu2 %v3876_v8, %s3107_s20 }
 0x2b8   : > { %1944 = vrot.lane.b32.xlu1 %v3899_v33, %s3108_s9 }
 0x2b9   : > { %v1935_v7 = vpop.permute.xlu0 %1934  ;;  %v1168_v48 = vpop.permute.xlu2 %1167 }
 0x2ba   : > { %1247 = vst.msk [vmem:[#allocation3 + $0x88] sm:$0xff] %vm1229_vm5, %v1168_v48  ;;  %v1357_v20 = vpop.permute.xlu1 %1356  ;;  %v2241_v52 = vld [vmem:[#allocation3 + $0x68] sm:$0xff] }
 0x2bb   : > { %1438 = vst.msk [vmem:[#allocation3 + $0x78] sm:$0xff] %vm1422_vm6, %v1357_v20  ;;  %v2266_v34 = vpack.c.bf16 %v2241_v52, %v2240_v14  ;;  %v2970_v14 = vld [vmem:[%s3242_s16 + $0x20] sm:$0xff] }
 0x2bc   : > { %1631 = vst.msk [vmem:[#allocation3 + $0x78] sm:$0xff] %vm1615_vm7, %v1550_v24 }
 0x2bd   : > { %1825 = vst.msk [vmem:[#allocation3 + $0x78] sm:$0xff] %vm1809_vm8, %v1744_v17  ;;  %2863 = vmatmul.msk.bf16.gmra.mxu1 %vm2300_vm12, %v2266_v34 }
 0x2bf   : > { %1573 = vrot.lane.b32.xlu0 %v4136_v31, %s3103_s11  ;;  %1187 = vrot.lane.b32.xlu2 %v4138_v56, %s3104_s18  ;;  %v4232_v31 = vld [vmem:[#allocation2 + $0x169] sm:$0xff] }
 0x2c0   : > { %1185 = vrot.lane.b32.xlu1 %v4144_v2, %s3104_s18 }
 0x2c1   : > { %v2130_v8 = vpop.permute.xlu0 %2129  ;;  %v1552_v53 = vpop.permute.xlu2 %1551 }
 0x2c2   : > { %v1742_v45 = vpop.permute.xlu1 %1741 }
 0x2c3   : > { %1824 = vst.msk [vmem:[#allocation3 + $0x70] sm:$0xff] %vm1809_vm8, %v1742_v45 }
 0x2c4   : > { %2017 = vst.msk [vmem:[#allocation3 + $0x70] sm:$0xff] %vm2002_vm9, %v1935_v7  ;;  %v2560_v62 = vpop.f32.mrf.mxu2 }
 0x2c5   : > { %2210 = vst.msk [vmem:[#allocation3 + $0x70] sm:$0xff] %vm2195_vm11, %v2128_v54  ;;  %v2561_v19 = vadd.f32 %v4164_v11, %v2560_v62 }
 0x2c7   : > { %v2637_v56 = vadd.f32 %v2968_v59, %v2561_v19  ;;  %1958 = vrot.lane.b32.xlu0 %v4232_v31, %s3108_s9  ;;  %1571 = vrot.lane.b32.xlu2 %v4150_v63, %s3103_s11  ;;  %v4248_v63 = vld [vmem:[#allocation2 + $0x170] sm:$0xff] }
 0x2c8   : > { %1380 = vrot.lane.b32.xlu1 %v4156_v3, %s3105_s19 }
 0x2c9   : > { %v2669_v2 = vmax.f32 %v2637_v56, 0.0  ;;  %v1359_v4 = vpop.permute.xlu0 %1358  ;;  %v1748_v6 = vpop.permute.xlu2 %1747 }
 0x2ca   : > { %v1937_v13 = vpop.permute.xlu1 %1936 }
 0x2cb   : > { %2701 = vst.msk [vmem:[%s4183_s23 + $0x10] sm:$0xff] %vm360_vm0, %v2669_v2 }
 0x2cc   : > { %2018 = vst.msk [vmem:[#allocation3 + $0x78] sm:$0xff] %vm2002_vm9, %v1937_v13  ;;  %v2562_v0 = vpop.f32.mrf.mxu2  ;;  %v2242_v41 = vld [vmem:[#allocation3 + $0x70] sm:$0xff] }
 0x2cd   : > { %2211 = vst.msk [vmem:[#allocation3 + $0x78] sm:$0xff] %vm2195_vm11, %v2130_v8  ;;  %v2563_v12 = vadd.f32 %v4164_v11, %v2562_v0 }
 0x2cf   : > { %v2638_v3 = vadd.f32 %v2969_v1, %v2563_v12  ;;  %2153 = vrot.lane.b32.xlu0 %v4246_v58, %s3107_s20  ;;  %1767 = vrot.lane.b32.xlu2 %v4248_v63, %s3106_s15 }
 0x2d0   : > { %1765 = vrot.lane.b32.xlu1 %v4255_v22, %s3106_s15 }
 0x2d1   : > { %v2670_v55 = vmax.f32 %v2638_v3, 0.0  ;;  %v1554_v27 = vpop.permute.xlu0 %1553  ;;  %v2132_v51 = vpop.permute.xlu2 %2131 }
 0x2d2   : > { %v1166_v15 = vpop.permute.xlu1 %1165 }
 0x2d3   : > { %2702 = vst.msk [vmem:[%s4183_s23 + $0x18] sm:$0xff] %vm360_vm0, %v2670_v55 }
 0x2d4   : > { %1246 = vst.msk [vmem:[#allocation3 + $0x80] sm:$0xff] %vm1229_vm5, %v1166_v15  ;;  %v2243_v42 = vld [vmem:[#allocation3 + $0x78] sm:$0xff] }
 0x2d5   : > { %1439 = vst.msk [vmem:[#allocation3 + $0x80] sm:$0xff] %vm1422_vm6, %v1359_v4  ;;  %v2267_v18 = vpack.c.bf16 %v2243_v42, %v2242_v41  ;;  %v2971_v4 = vld [vmem:[%s3242_s16 + $0x28] sm:$0xff] }
 0x2d6   : > { %1632 = vst.msk [vmem:[#allocation3 + $0x80] sm:$0xff] %vm1615_vm7, %v1552_v53 }
 0x2d7   : > { %2864 = vmatmul.msk.bf16.gmra.mxu1 %vm2300_vm12, %v2267_v18  ;;  %1366 = vrot.lane.b32.xlu0 %v3907_v35, %s3105_s19  ;;  %v493_v35 = vpop.f32.mrf.mxu3 }
 0x2d8   : > { %2151 = vrot.lane.b32.xlu2 %v4267_v21, %s3107_s20  ;;  %1960 = vrot.lane.b32.xlu1 %v4269_v39, %s3108_s9  ;;  %v494_v9 = vadd.f32 %v3841_v47, %v493_v35 }
 0x2d9   : > { %v1939_v50 = vpop.permute.xlu0 %1938  ;;  %v1184_v28 = vpop.permute.xlu2 %1183 }
 0x2da   : > { %1255 = vst.msk [vmem:[#allocation3 + $0xc8] sm:$0xff] %vm1229_vm5, %v1184_v28  ;;  %v1361_v57 = vpop.permute.xlu1 %1360  ;;  %v528_v10 = vmax.f32 %v494_v9, 0.0 }
 0x2db   : > { %1440 = vst.msk [vmem:[#allocation3 + $0x88] sm:$0xff] %vm1422_vm6, %v1361_v57 }
 0x2dc   : > { %1633 = vst.msk [vmem:[#allocation3 + $0x88] sm:$0xff] %vm1615_vm7, %v1554_v27 }
 0x2dd   : > { %1827 = vst.msk [vmem:[#allocation3 + $0x88] sm:$0xff] %vm1809_vm8, %v1748_v6 }
 0x2de   : > { %617 = vst.msk [vmem:[#allocation2 + $0x181] sm:$0xff] %vm530_vm1, %v528_v10 }
 0x2df   : > { %1561 = vrot.lane.b32.xlu0 %v3922_v44, %s3103_s11  ;;  %v495_v36 = vpop.f32.mrf.mxu3 }
 0x2e0   : > { %1175 = vrot.lane.b32.xlu2 %v3813_v37, %s3104_s18  ;;  %1173 = vrot.lane.b32.xlu1 %v3816_v38, %s3104_s18  ;;  %v496_v44 = vadd.f32 %v3841_v47, %v495_v36  ;;  %v1475_v37 = vld [vmem:[#allocation2 + $0x10a] sm:$0xff] }
 0x2e1   : > { %v2134_v16 = vpop.permute.xlu0 %2133  ;;  %v1568_v25 = vpop.permute.xlu2 %1567 }
 0x2e2   : > { %v1746_v29 = vpop.permute.xlu1 %1745  ;;  %v529_v38 = vmax.f32 %v496_v44, 0.0 }
 0x2e3   : > { %1826 = vst.msk [vmem:[#allocation3 + $0x80] sm:$0xff] %vm1809_vm8, %v1746_v29 }
 0x2e4   : > { %2019 = vst.msk [vmem:[#allocation3 + $0x80] sm:$0xff] %vm2002_vm9, %v1939_v50  ;;  %v1284_v50 = vld [vmem:[#allocation2 + $0x121] sm:$0xff] }
 0x2e5   : > { %2212 = vst.msk [vmem:[#allocation3 + $0x80] sm:$0xff] %vm2195_vm11, %v2132_v51  ;;  %v4353_v51 = vld [vmem:[#allocation2 + $0x180] sm:$0xff] }
 0x2e6   : > { %618 = vst.msk [vmem:[#allocation2 + $0x189] sm:$0xff] %vm530_vm1, %v529_v38 }
 0x2e7   : > { %1946 = vrot.lane.b32.xlu0 %v3893_v30, %s3108_s9 }
 0x2e8   : > { %1559 = vrot.lane.b32.xlu2 %v1475_v37, %s3103_s11  ;;  %1368 = vrot.lane.b32.xlu1 %v3899_v33, %s3105_s19 }
 0x2e9   : > { %v1375_v17 = vpop.permute.xlu0 %1374  ;;  %v1764_v40 = vpop.permute.xlu2 %1763 }
 0x2ea   : > { %v1941_v24 = vpop.permute.xlu1 %1940 }
 0x2eb   : > { %2020 = vst.msk [vmem:[#allocation3 + $0x88] sm:$0xff] %vm2002_vm9, %v1941_v24 }
 0x2ec   : > { %2213 = vst.msk [vmem:[#allocation3 + $0x88] sm:$0xff] %vm2195_vm11, %v2134_v16  ;;  %v2244_v46 = vld [vmem:[#allocation3 + $0x80] sm:$0xff] }
 0x2ed   : > { %v4349_v55 = vld [vmem:[#allocation2 + $0x18a] sm:$0xff]  ;;  %v4366_v28 = vld [vmem:[#allocation2 + $0x182] sm:$0xff] }
 0x2ee   : > { %v4351_v27 = vld [vmem:[#allocation2 + $0x188] sm:$0xff] }
 0x2ef   : > { %2141 = vrot.lane.b32.xlu0 %v3915_v43, %s3107_s20  ;;  %v4368_v57 = vld [vmem:[#allocation2 + $0x189] sm:$0xff] }
 0x2f0   : > { %1755 = vrot.lane.b32.xlu2 %v3857_v61, %s3106_s15  ;;  %1753 = vrot.lane.b32.xlu1 %v3854_v60, %s3106_s15 }
 0x2f1   : > { %v1570_v47 = vpop.permute.xlu0 %1569  ;;  %v2148_v30 = vpop.permute.xlu2 %2147 }
 0x2f2   : > { %v1182_v33 = vpop.permute.xlu1 %1181 }
 0x2f3   : > { %1254 = vst.msk [vmem:[#allocation3 + $0xc0] sm:$0xff] %vm1229_vm5, %v1182_v33  ;;  %v2382_v54 = vpop.f32.mrf.mxu1  ;;  %v2245_v7 = vld [vmem:[#allocation3 + $0x88] sm:$0xff] }
 0x2f4   : > { %1447 = vst.msk [vmem:[#allocation3 + $0xc0] sm:$0xff] %vm1422_vm6, %v1375_v17  ;;  %v2268_v48 = vpack.c.bf16 %v2245_v7, %v2244_v46  ;;  %v2383_v53 = vadd.f32 %v3969_v23, %v2382_v54  ;;  %v1477_v54 = vld [vmem:[#allocation2 + $0x122] sm:$0xff] }
 0x2f5   : > { %1640 = vst.msk [vmem:[#allocation3 + $0xc0] sm:$0xff] %vm1615_vm7, %v1568_v25  ;;  %v2565_v43 = vpop.f32.mrf.mxu2  ;;  %v1478_v25 = vld [vmem:[#allocation2 + $0x12a] sm:$0xff] }
 0x2f6   : > { %v2566_v20 = vadd.f32 %v4164_v11, %v2565_v43  ;;  %2865 = vmatmul.msk.bf16.gmra.mxu1 %vm2300_vm12, %v2268_v48  ;;  %v1285_v46 = vld [vmem:[#allocation2 + $0x129] sm:$0xff] }
 0x2f7   : > { %1382 = vrot.lane.b32.xlu0 %v4232_v31, %s3105_s19 }
 0x2f8   : > { %v2639_v52 = vadd.f32 %v2970_v14, %v2566_v20  ;;  %2139 = vrot.lane.b32.xlu2 %v3930_v49, %s3107_s20  ;;  %1948 = vrot.lane.b32.xlu1 %v3950_v5, %s3108_s9  ;;  %v2450_v5 = vmax.f32 %v2383_v53, 0.0  ;;  %v2973_v53 = vld [vmem:[%s3242_s16 + $0x38] sm:$0xff] }
 0x2f9   : > { %v1955_v34 = vpop.permute.xlu0 %1954  ;;  %v1172_v8 = vpop.permute.xlu2 %1171 }
 0x2fa   : > { %v2671_v45 = vmax.f32 %v2639_v52, 0.0  ;;  %1249 = vst.msk [vmem:[#allocation3 + $0x98] sm:$0xff] %vm1229_vm5, %v1172_v8  ;;  %v1377_v62 = vpop.permute.xlu1 %1376  ;;  %v2058_v8 = vld [vmem:[#allocation2 + $0x142] sm:$0xff] }
 0x2fb   : > { %1448 = vst.msk [vmem:[#allocation3 + $0xc8] sm:$0xff] %vm1422_vm6, %v1377_v62  ;;  %v2384_v19 = vpop.f32.mrf.mxu1 }
 0x2fc   : > { %2703 = vst.msk [vmem:[%s4183_s23 + $0x20] sm:$0xff] %vm360_vm0, %v2671_v45  ;;  %v2385_v31 = vadd.f32 %v3969_v23, %v2384_v19 }
 0x2fd   : > { %1641 = vst.msk [vmem:[#allocation3 + $0xc8] sm:$0xff] %vm1615_vm7, %v1570_v47  ;;  %v2567_v49 = vpop.f32.mrf.mxu2  ;;  %v1864_v47 = vld [vmem:[#allocation2 + $0x139] sm:$0xff] }
 0x2fe   : > { %1835 = vst.msk [vmem:[#allocation3 + $0xc8] sm:$0xff] %vm1809_vm8, %v1764_v40  ;;  %v2451_v59 = vmax.f32 %v2385_v31, 0.0  ;;  %v2568_v56 = vadd.f32 %v4164_v11, %v2567_v49 }
 0x2ff   : > { %1577 = vrot.lane.b32.xlu0 %v4246_v58, %s3103_s11  ;;  %v4337_v58 = vld [vmem:[#allocation2 + $0x181] sm:$0xff] }
 0x300   : > { %v2478_v2 = vpack.c.bf16 %v2451_v59, %v2450_v5  ;;  %v2640_v6 = vadd.f32 %v2971_v4, %v2568_v56  ;;  %1191 = vrot.lane.b32.xlu2 %v4248_v63, %s3104_s18  ;;  %1189 = vrot.lane.b32.xlu1 %v4255_v22, %s3104_s18 }
 0x301   : > { %v2150_v13 = vpop.permute.xlu0 %2149  ;;  %v1556_v0 = vpop.permute.xlu2 %1555 }
 0x302   : > { %v2672_v12 = vmax.f32 %v2640_v6, 0.0  ;;  %2877 = vmatmul.msk.bf16.gmra.mxu2 %vm530_vm1, %v2478_v2  ;;  %v1762_v1 = vpop.permute.xlu1 %1761 }
 0x303   : > { %1834 = vst.msk [vmem:[#allocation3 + $0xc0] sm:$0xff] %vm1809_vm8, %v1762_v1 }
 0x304   : > { %2704 = vst.msk [vmem:[%s4183_s23 + $0x28] sm:$0xff] %vm360_vm0, %v2672_v12 }
 0x305   : > { %2027 = vst.msk [vmem:[#allocation3 + $0xc0] sm:$0xff] %vm2002_vm9, %v1955_v34 }
 0x306   : > { %2220 = vst.msk [vmem:[#allocation3 + $0xc0] sm:$0xff] %vm2195_vm11, %v2148_v30  ;;  %v2972_v30 = vld [vmem:[%s3242_s16 + $0x30] sm:$0xff] }
 0x307   : > { %1962 = vrot.lane.b32.xlu0 %v4337_v58, %s3108_s9 }
 0x308   : > { %1575 = vrot.lane.b32.xlu2 %v4267_v21, %s3103_s11  ;;  %1384 = vrot.lane.b32.xlu1 %v4269_v39, %s3105_s19 }
 0x309   : > { %v1363_v63 = vpop.permute.xlu0 %1362  ;;  %v1752_v3 = vpop.permute.xlu2 %1751 }
 0x30a   : > { %v1957_v22 = vpop.permute.xlu1 %1956 }
 0x30b   : > { %2028 = vst.msk [vmem:[#allocation3 + $0xc8] sm:$0xff] %vm2002_vm9, %v1957_v22 }
 0x30c   : > { %2221 = vst.msk [vmem:[#allocation3 + $0xc8] sm:$0xff] %vm2195_vm11, %v2150_v13 }
 0x30d   : > { %v2252_v18 = vld [vmem:[#allocation3 + $0xc0] sm:$0xff] }
 0x30f   : > { %2157 = vrot.lane.b32.xlu0 %v4349_v55, %s3107_s20 }
 0x310   : > { %1771 = vrot.lane.b32.xlu2 %v4351_v27, %s3106_s15  ;;  %1769 = vrot.lane.b32.xlu1 %v4353_v51, %s3106_s15 }
 0x311   : > { %v1558_v15 = vpop.permute.xlu0 %1557  ;;  %v2136_v41 = vpop.permute.xlu2 %2135 }
 0x312   : > { %v1170_v42 = vpop.permute.xlu1 %1169 }
 0x313   : > { %1248 = vst.msk [vmem:[#allocation3 + $0x90] sm:$0xff] %vm1229_vm5, %v1170_v42  ;;  %v2253_v21 = vld [vmem:[#allocation3 + $0xc8] sm:$0xff] }
 0x314   : > { %1441 = vst.msk [vmem:[#allocation3 + $0x90] sm:$0xff] %vm1422_vm6, %v1363_v63  ;;  %v2272_v39 = vpack.c.bf16 %v2253_v21, %v2252_v18  ;;  %v2066_v18 = vld [vmem:[#allocation2 + $0x1a2] sm:$0xff]  ;;  %v1679_v21 = vld [vmem:[#allocation2 + $0x198] sm:$0xff] }
 0x315   : > { %1634 = vst.msk [vmem:[#allocation3 + $0x90] sm:$0xff] %vm1615_vm7, %v1556_v0 }
 0x316   : > { %2869 = vmatmul.msk.bf16.vlgmr.msrb.gmra.mxu3 %vm2300_vm12, %v2272_v39  ;;  %v1680_v39 = vld [vmem:[#allocation2 + $0x1a0] sm:$0xff] }
 0x317   : > { %1370 = vrot.lane.b32.xlu0 %v1284_v50, %s3105_s19 }
 0x318   : > { %2155 = vrot.lane.b32.xlu2 %v4366_v28, %s3107_s20  ;;  %1964 = vrot.lane.b32.xlu1 %v4368_v57, %s3108_s9 }
 0x319   : > { %v1943_v35 = vpop.permute.xlu0 %1942  ;;  %v1188_v9 = vpop.permute.xlu2 %1187 }
 0x31a   : > { %1257 = vst.msk [vmem:[#allocation3 + $0xd8] sm:$0xff] %vm1229_vm5, %v1188_v9  ;;  %v1365_v10 = vpop.permute.xlu1 %1364 }
 0x31b   : > { %1442 = vst.msk [vmem:[#allocation3 + $0x98] sm:$0xff] %vm1422_vm6, %v1365_v10  ;;  %v2387_v16 = vpop.f32.mrf.mxu1 }
 0x31c   : > { %1635 = vst.msk [vmem:[#allocation3 + $0x98] sm:$0xff] %vm1615_vm7, %v1558_v15  ;;  %v2388_v44 = vadd.f32 %v3969_v23, %v2387_v16 }
 0x31d   : > { %1829 = vst.msk [vmem:[#allocation3 + $0x98] sm:$0xff] %vm1809_vm8, %v1752_v3  ;;  %v4431_v3 = vld [vmem:[%s4671_s5] ss:$0 sm:$0xff] }
 0x31e   : > { %v2452_v24 = vmax.f32 %v2388_v44, 0.0 }
 0x31f   : > { %1565 = vrot.lane.b32.xlu0 %v1478_v25, %s3103_s11  ;;  %v1873_v25 = vld [vmem:[#allocation2 + $0x1a1] sm:$0xff] }
 0x320   : > { %1179 = vrot.lane.b32.xlu2 %v3857_v61, %s3104_s18  ;;  %1177 = vrot.lane.b32.xlu1 %v3854_v60, %s3104_s18 }
 0x321   : > { %v2138_v29 = vpop.permute.xlu0 %2137  ;;  %v1572_v36 = vpop.permute.xlu2 %1571 }
 0x322   : > { %v1750_v37 = vpop.permute.xlu1 %1749 }
 0x323   : > { %1828 = vst.msk [vmem:[#allocation3 + $0x90] sm:$0xff] %vm1809_vm8, %v1750_v37  ;;  %v2389_v38 = vpop.f32.mrf.mxu1 }
 0x324   : > { %2021 = vst.msk [vmem:[#allocation3 + $0x90] sm:$0xff] %vm2002_vm9, %v1943_v35  ;;  %v2390_v17 = vadd.f32 %v3969_v23, %v2389_v38  ;;  %v2570_v40 = vpop.f32.mrf.mxu2 }
 0x325   : > { %2214 = vst.msk [vmem:[#allocation3 + $0x90] sm:$0xff] %vm2195_vm11, %v2136_v41  ;;  %v2571_v61 = vadd.f32 %v4164_v11, %v2570_v40 }
 0x326   : > { %v2453_v60 = vmax.f32 %v2390_v17, 0.0 }
 0x327   : > { %v2641_v33 = vadd.f32 %v2972_v30, %v2571_v61  ;;  %1950 = vrot.lane.b32.xlu0 %v1864_v47, %s3108_s9 }
 0x328   : > { %v2479_v7 = vpack.c.bf16 %v2453_v60, %v2452_v24  ;;  %1563 = vrot.lane.b32.xlu2 %v1477_v54, %s3103_s11  ;;  %1372 = vrot.lane.b32.xlu1 %v1285_v46, %s3105_s19 }
 0x329   : > { %v2673_v48 = vmax.f32 %v2641_v33, 0.0  ;;  %v1379_v43 = vpop.permute.xlu0 %1378  ;;  %v1768_v20 = vpop.permute.xlu2 %1767 }
 0x32a   : > { %v1945_v14 = vpop.permute.xlu1 %1944  ;;  %2878 = vmatmul.msk.bf16.gmra.mxu2 %vm530_vm1, %v2479_v7 }
 0x32b   : > { %2705 = vst.msk [vmem:[%s4183_s23 + $0x30] sm:$0xff] %vm360_vm0, %v2673_v48 }
 0x32c   : > { %2022 = vst.msk [vmem:[#allocation3 + $0x98] sm:$0xff] %vm2002_vm9, %v1945_v14  ;;  %v2572_v52 = vpop.f32.mrf.mxu2  ;;  %v2246_v5 = vld [vmem:[#allocation3 + $0x90] sm:$0xff] }
 0x32d   : > { %2215 = vst.msk [vmem:[#allocation3 + $0x98] sm:$0xff] %vm2195_vm11, %v2138_v29  ;;  %v2573_v34 = vadd.f32 %v4164_v11, %v2572_v52  ;;  %v2065_v29 = vld [vmem:[#allocation2 + $0x19a] sm:$0xff] }
 0x32f   : > { %v2642_v45 = vadd.f32 %v2973_v53, %v2573_v34  ;;  %2145 = vrot.lane.b32.xlu0 %v2058_v8, %s3107_s20 }
 0x330   : > { %1759 = vrot.lane.b32.xlu2 %v3895_v32, %s3106_s15  ;;  %1757 = vrot.lane.b32.xlu1 %v3890_v26, %s3106_s15  ;;  %v2057_v26 = vld [vmem:[#allocation2 + $0x13a] sm:$0xff] }
 0x331   : > { %v2674_v62 = vmax.f32 %v2642_v45, 0.0  ;;  %v1574_v19 = vpop.permute.xlu0 %1573  ;;  %v1865_v32 = vld [vmem:[#allocation2 + $0x141] sm:$0xff] }
 0x332   : > { %v2152_v31 = vpop.permute.xlu2 %2151  ;;  %v1186_v49 = vpop.permute.xlu1 %1185 }
 0x333   : > { %2706 = vst.msk [vmem:[%s4183_s23 + $0x38] sm:$0xff] %vm360_vm0, %v2674_v62 }
 0x334   : > { %1256 = vst.msk [vmem:[#allocation3 + $0xd0] sm:$0xff] %vm1229_vm5, %v1186_v49  ;;  %v2247_v59 = vld [vmem:[#allocation3 + $0x98] sm:$0xff] }
 0x335   : > { %1449 = vst.msk [vmem:[#allocation3 + $0xd0] sm:$0xff] %vm1422_vm6, %v1379_v43  ;;  %v2269_v56 = vpack.c.bf16 %v2247_v59, %v2246_v5 }
 0x336   : > { %1642 = vst.msk [vmem:[#allocation3 + $0xd0] sm:$0xff] %vm1615_vm7, %v1572_v36 }
 0x337   : > { %2866 = vmatmul.msk.bf16.gmra.mxu1 %vm2300_vm12, %v2269_v56  ;;  %1386 = vrot.lane.b32.xlu0 %v4337_v58, %s3105_s19 }
 0x338   : > { %2143 = vrot.lane.b32.xlu2 %v2057_v26, %s3107_s20  ;;  %1952 = vrot.lane.b32.xlu1 %v1865_v32, %s3108_s9 }
 0x339   : > { %v1959_v2 = vpop.permute.xlu0 %1958 }
 0x33a   : > { %v1176_v4 = vpop.permute.xlu2 %1175  ;;  %v1381_v6 = vpop.permute.xlu1 %1380 }
 0x33b   : > { %1251 = vst.msk [vmem:[#allocation3 + $0xa8] sm:$0xff] %vm1229_vm5, %v1176_v4  ;;  %v2392_v13 = vpop.f32.mrf.mxu1 }
 0x33c   : > { %1450 = vst.msk [vmem:[#allocation3 + $0xd8] sm:$0xff] %vm1422_vm6, %v1381_v6  ;;  %v2393_v12 = vadd.f32 %v3969_v23, %v2392_v13  ;;  %v2975_v13 = vld [vmem:[%s3242_s16 + $0x40] sm:$0xff] }
 0x33d   : > { %1643 = vst.msk [vmem:[#allocation3 + $0xd8] sm:$0xff] %vm1615_vm7, %v1574_v19 }
 0x33e   : > { %1837 = vst.msk [vmem:[#allocation3 + $0xd8] sm:$0xff] %vm1809_vm8, %v1768_v20 }
 0x33f   : > { %1581 = vrot.lane.b32.xlu0 %v4349_v55, %s3103_s11  ;;  %v1872_v55 = vld [vmem:[#allocation2 + $0x199] sm:$0xff] }
 0x340   : > { %1195 = vrot.lane.b32.xlu2 %v4351_v27, %s3104_s18  ;;  %1193 = vrot.lane.b32.xlu1 %v4353_v51, %s3104_s18  ;;  %v2454_v27 = vmax.f32 %v2393_v12, 0.0  ;;  %s3050_s18 = scalar_lea.hbm %s4673_s7, 512 }
 0x341   : > { %v2154_v0 = vpop.permute.xlu0 %2153 }
 0x342   : > { %v1560_v1 = vpop.permute.xlu2 %1559  ;;  %v1766_v58 = vpop.permute.xlu1 %1765 }
 0x343   : > { %1836 = vst.msk [vmem:[#allocation3 + $0xd0] sm:$0xff] %vm1809_vm8, %v1766_v58  ;;  %v2394_v63 = vpop.f32.mrf.mxu1 }
 0x344   : > { %2029 = vst.msk [vmem:[#allocation3 + $0xd0] sm:$0xff] %vm2002_vm9, %v1959_v2  ;;  %v2395_v22 = vadd.f32 %v4431_v3, %v2394_v63 }
 0x345   : > { %2222 = vst.msk [vmem:[#allocation3 + $0xd0] sm:$0xff] %vm2195_vm11, %v2152_v31 }
 0x346   : > { %v2455_v51 = vmax.f32 %v2395_v22, 0.0 }
 0x347   : > { %1966 = vrot.lane.b32.xlu0 %v1872_v55, %s3108_s9 }
 0x348   : > { %v2480_v23 = vpack.c.bf16 %v2455_v51, %v2454_v27  ;;  %1579 = vrot.lane.b32.xlu2 %v4366_v28, %s3103_s11  ;;  %1388 = vrot.lane.b32.xlu1 %v4368_v57, %s3105_s19  ;;  %v2976_v27 = vld [vmem:[%s3242_s16 + $0x48] sm:$0xff]  ;;  %s2898_s19 = sshll.u32 %s3171_s28, 8  ;;  %s2732_s28 = scalar_lea.sflag [#allocation6], %s3236_s22 }
 0x349   : > { %v1367_v15 = vpop.permute.xlu0 %1366 }
 0x34a   : > { %2879 = vmatmul.msk.bf16.gmra.mxu2 %vm530_vm1, %v2480_v23  ;;  %v1756_v41 = vpop.permute.xlu2 %1755  ;;  %v1961_v42 = vpop.permute.xlu1 %1960 }
 0x34b   : > { %2030 = vst.msk [vmem:[#allocation3 + $0xd8] sm:$0xff] %vm2002_vm9, %v1961_v42 }
 0x34c   : > { %2223 = vst.msk [vmem:[#allocation3 + $0xd8] sm:$0xff] %vm2195_vm11, %v2154_v0  ;;  %v2254_v35 = vld [vmem:[#allocation3 + $0xd0] sm:$0xff] }
 0x34f   : > { %2161 = vrot.lane.b32.xlu0 %v2066_v18, %s3107_s20 }
 0x350   : > { %1773 = vrot.lane.b32.xlu1 %v1679_v21, %s3106_s15  ;;  %1775 = vrot.lane.b32.xlu2 %v1680_v39, %s3106_s15 }
 0x351   : > { %v1562_v50 = vpop.permute.xlu0 %1561 }
 0x352   : > { %v2140_v28 = vpop.permute.xlu2 %2139  ;;  %v1174_v57 = vpop.permute.xlu1 %1173 }
 0x353   : > { %1250 = vst.msk [vmem:[#allocation3 + $0xa0] sm:$0xff] %vm1229_vm5, %v1174_v57  ;;  %v2255_v9 = vld [vmem:[#allocation3 + $0xd8] sm:$0xff] }
 0x354   : > { %1443 = vst.msk [vmem:[#allocation3 + $0xa0] sm:$0xff] %vm1422_vm6, %v1367_v15  ;;  %v2397_v10 = vpop.f32.mrf.mxu1  ;;  %v2273_v16 = vpack.c.bf16 %v2255_v9, %v2254_v35 }
 0x355   : > { %1636 = vst.msk [vmem:[#allocation3 + $0xa0] sm:$0xff] %vm1615_vm7, %v1560_v1  ;;  %v2398_v38 = vadd.f32 %v4431_v3, %v2397_v10 }
 0x356   : > { %2870 = vmatmul.msk.bf16.gmra.mxu3 %vm2300_vm12, %v2273_v16 }
 0x357   : > { %v2456_v61 = vmax.f32 %v2398_v38, 0.0 }
 0x358   : > { %1968 = vrot.lane.b32.xlu1 %v1873_v25, %s3108_s9  ;;  %2159 = vrot.lane.b32.xlu2 %v2065_v29, %s3107_s20  ;;  %s2743_s9 = scalar_lea.hbm %s4673_s7, %s2898_s19 }
 0x359   : > { %v1947_v36 = vpop.permute.xlu0 %1946  ;;  %s2746_s12 = sshll.u32 %s2743_s9, 4  ;;  %s2747_s12 = int_to_ptr.hbm [resolvable:$true] %s2746_s12 }
 0x35a   : > { %v1192_v44 = vpop.permute.xlu2 %1191  ;;  %v1369_v37 = vpop.permute.xlu1 %1368  ;;  %s3044_s21 = sshra.s32 %s2747_s12, 4  ;;  %s3045_s21 = int_to_ptr.hbm [resolvable:$true] %s3044_s21 }
 0x35b   : > { %1259 = vst.msk [vmem:[#allocation3 + $0xe8] sm:$0xff] %vm1229_vm5, %v1192_v44  ;;  %s3046_s10 = scalar_lea.hbm %s3045_s21, 256  ;;  %p3051_p0 = scmp.lt.s32.totalorder %s3045_s21, %s4673_s7 }
 0x35c   : > { %1444 = vst.msk [vmem:[#allocation3 + $0xa8] sm:$0xff] %vm1422_vm6, %v1369_v37  ;;  %v2399_v17 = vpop.f32.mrf.mxu1  ;;  %p3047_p6 = scmp.ne.s32.totalorder %s3045_s21, %s3046_s10  ;;  %p3052_p1 = scmp.lt.s32.totalorder %s3050_s18, %s3046_s10 }
 0x35d   : > { %1637 = vst.msk [vmem:[#allocation3 + $0xa8] sm:$0xff] %vm1615_vm7, %v1562_v50  ;;  %v2400_v40 = vadd.f32 %v4431_v3, %v2399_v17 }
 0x35e   : > { %1831 = vst.msk [vmem:[#allocation3 + $0xa8] sm:$0xff] %vm1809_vm8, %v1756_v41  ;;  %p3048_p9 = pnand %p3047_p6, %p3200_p11  ;;  %p3053_p3 = por %p3052_p1, %p3051_p0 }
 0x35f   : > { %v2457_v24 = vmax.f32 %v2400_v40, 0.0 }
 0x360   : > { %p3049_p13 = pneg %p3048_p9 }
 0x361   : > { %v2481_v60 = vpack.c.bf16 %v2457_v24, %v2456_v61  ;;  %v2142_v47 = vpop.permute.xlu0 %2141 }
 0x362   : > { %v1576_v30 = vpop.permute.xlu2 %1575  ;;  %v1754_v33 = vpop.permute.xlu1 %1753  ;;  %p3054_p4 = pnand %p3053_p3, %p3049_p13 }
 0x363   : > { %1830 = vst.msk [vmem:[#allocation3 + $0xa0] sm:$0xff] %vm1809_vm8, %v1754_v33  ;;  %2880 = vmatmul.msk.bf16.gmra.mxu2 %vm530_vm1, %v2481_v60  ;;  %v2977_v60 = vld [vmem:[%s3242_s16 + $0x50] sm:$0xff] }
 0x364   : > { %2023 = vst.msk [vmem:[#allocation3 + $0xa0] sm:$0xff] %vm2002_vm9, %v1947_v36 }
 0x365   : > { %2216 = vst.msk [vmem:[#allocation3 + $0xa0] sm:$0xff] %vm2195_vm11, %v2140_v28 }
 0x369   : > { %v1383_v54 = vpop.permute.xlu0 %1382 }
 0x36a   : > { %v1772_v46 = vpop.permute.xlu2 %1771  ;;  %v1949_v7 = vpop.permute.xlu1 %1948 }
 0x36b   : > { %2024 = vst.msk [vmem:[#allocation3 + $0xa8] sm:$0xff] %vm2002_vm9, %v1949_v7 }
 0x36c   : > { %2217 = vst.msk [vmem:[#allocation3 + $0xa8] sm:$0xff] %vm2195_vm11, %v2142_v47  ;;  %v2248_v52 = vld [vmem:[#allocation3 + $0xa0] sm:$0xff] }
 0x371   : > { %v1578_v48 = vpop.permute.xlu0 %1577 }
 0x372   : > { %v2156_v43 = vpop.permute.xlu2 %2155  ;;  %v1190_v20 = vpop.permute.xlu1 %1189 }
 0x373   : > { %1258 = vst.msk [vmem:[#allocation3 + $0xe0] sm:$0xff] %vm1229_vm5, %v1190_v20  ;;  %v2402_v14 = vpop.f32.mrf.mxu1  ;;  %v2249_v34 = vld [vmem:[#allocation3 + $0xa8] sm:$0xff] }
 0x374   : > { %1451 = vst.msk [vmem:[#allocation3 + $0xe0] sm:$0xff] %vm1422_vm6, %v1383_v54  ;;  %v2270_v8 = vpack.c.bf16 %v2249_v34, %v2248_v52  ;;  %v2403_v45 = vadd.f32 %v4431_v3, %v2402_v14  ;;  %v2978_v52 = vld [vmem:[%s3242_s16 + $0x58] sm:$0xff] }
 0x375   : > { %1644 = vst.msk [vmem:[#allocation3 + $0xe0] sm:$0xff] %vm1615_vm7, %v1576_v30 }
 0x376   : > { %2867 = vmatmul.msk.bf16.gmra.mxu1 %vm2300_vm12, %v2270_v8  ;;  %v2458_v5 = vmax.f32 %v2403_v45, 0.0 }
 0x379   : > { %v1963_v53 = vpop.permute.xlu0 %1962 }
 0x37a   : > { %v1180_v62 = vpop.permute.xlu2 %1179  ;;  %v1385_v19 = vpop.permute.xlu1 %1384 }
 0x37b   : > { %1253 = vst.msk [vmem:[#allocation3 + $0xb8] sm:$0xff] %vm1229_vm5, %v1180_v62  ;;  %v2404_v31 = vpop.f32.mrf.mxu1 }
 0x37c   : > { %1452 = vst.msk [vmem:[#allocation3 + $0xe8] sm:$0xff] %vm1422_vm6, %v1385_v19  ;;  %v2405_v49 = vadd.f32 %v4431_v3, %v2404_v31 }
 0x37d   : > { %1645 = vst.msk [vmem:[#allocation3 + $0xe8] sm:$0xff] %vm1615_vm7, %v1578_v48 }
 0x37e   : > { %1839 = vst.msk [vmem:[#allocation3 + $0xe8] sm:$0xff] %vm1809_vm8, %v1772_v46  ;;  %v2459_v59 = vmax.f32 %v2405_v49, 0.0 }
 0x380   : > { %v2482_v56 = vpack.c.bf16 %v2459_v59, %v2458_v5 }
 0x381   : > { %v2158_v26 = vpop.permute.xlu0 %2157 }
 0x382   : > { %v1564_v32 = vpop.permute.xlu2 %1563  ;;  %v1770_v2 = vpop.permute.xlu1 %1769  ;;  %2881 = vmatmul.msk.bf16.gmra.mxu2 %vm530_vm1, %v2482_v56 }
 0x383   : > { %1838 = vst.msk [vmem:[#allocation3 + $0xe0] sm:$0xff] %vm1809_vm8, %v1770_v2 }
 0x384   : > { %2031 = vst.msk [vmem:[#allocation3 + $0xe0] sm:$0xff] %vm2002_vm9, %v1963_v53 }
 0x385   : > { %2224 = vst.msk [vmem:[#allocation3 + $0xe0] sm:$0xff] %vm2195_vm11, %v2156_v43  ;;  %v2575_v4 = vpop.f32.mrf.mxu2 }
 0x386   : > { %v2576_v6 = vadd.f32 %v4164_v11, %v2575_v4 }
 0x388   : > { %v2643_v0 = vadd.f32 %v2975_v13, %v2576_v6 }
 0x389   : > { %v1371_v12 = vpop.permute.xlu0 %1370 }
 0x38a   : > { %v2675_v1 = vmax.f32 %v2643_v0, 0.0  ;;  %v1760_v58 = vpop.permute.xlu2 %1759  ;;  %v1965_v63 = vpop.permute.xlu1 %1964  ;;  %v2979_v0 = vld [vmem:[%s3242_s16 + $0x60] sm:$0xff] }
 0x38b   : > { %2032 = vst.msk [vmem:[#allocation3 + $0xe8] sm:$0xff] %vm2002_vm9, %v1965_v63 }
 0x38c   : > { %2707 = vst.msk [vmem:[%s4183_s23 + $0x40] sm:$0xff] %vm360_vm0, %v2675_v1  ;;  %v2256_v18 = vld [vmem:[#allocation3 + $0xe0] sm:$0xff] }
 0x38d   : > { %2225 = vst.msk [vmem:[#allocation3 + $0xe8] sm:$0xff] %vm2195_vm11, %v2158_v26  ;;  %v2577_v22 = vpop.f32.mrf.mxu2 }
 0x38e   : > { %v2578_v55 = vadd.f32 %v4164_v11, %v2577_v22 }
 0x390   : > { %v2644_v51 = vadd.f32 %v2976_v27, %v2578_v55 }
 0x391   : > { %v1566_v23 = vpop.permute.xlu0 %1565 }
 0x392   : > { %v2676_v15 = vmax.f32 %v2644_v51, 0.0  ;;  %v2144_v41 = vpop.permute.xlu2 %2143  ;;  %v1178_v42 = vpop.permute.xlu1 %1177  ;;  %v2980_v51 = vld [vmem:[%s3242_s16 + $0x68] sm:$0xff] }
 0x393   : > { %1252 = vst.msk [vmem:[#allocation3 + $0xb0] sm:$0xff] %vm1229_vm5, %v1178_v42 }
 0x394   : > { %2708 = vst.msk [vmem:[%s4183_s23 + $0x48] sm:$0xff] %vm360_vm0, %v2676_v15  ;;  %v2257_v21 = vld [vmem:[#allocation3 + $0xe8] sm:$0xff] }
 0x395   : > { %1445 = vst.msk [vmem:[#allocation3 + $0xb0] sm:$0xff] %vm1422_vm6, %v1371_v12  ;;  %v2274_v39 = vpack.c.bf16 %v2257_v21, %v2256_v18 }
 0x396   : > { %1638 = vst.msk [vmem:[#allocation3 + $0xb0] sm:$0xff] %vm1615_vm7, %v1564_v32 }
 0x397   : > { %2871 = vmatmul.msk.bf16.gmra.mxu3 %vm2300_vm12, %v2274_v39 }
 0x399   : > { %v2422_v50 = vpop.f32.mrf.mxu3  ;;  %v1951_v28 = vpop.permute.xlu0 %1950 }
 0x39a   : > { %v1196_v57 = vpop.permute.xlu2 %1195  ;;  %v1373_v35 = vpop.permute.xlu1 %1372  ;;  %v2423_v9 = vadd.f32 %v4431_v3, %v2422_v50 }
 0x39b   : > { %1261 = vst.msk [vmem:[#allocation3 + $0xf8] sm:$0xff] %vm1229_vm5, %v1196_v57  ;;  %v4542_v57 = vld [vmem:[%s4672_s6] ss:$0 sm:$0xff] }
 0x39c   : > { %1446 = vst.msk [vmem:[#allocation3 + $0xb8] sm:$0xff] %vm1422_vm6, %v1373_v35  ;;  %v2466_v36 = vmax.f32 %v2423_v9, 0.0  ;;  %v2982_v9 = vld [vmem:[%s3242_s16 + $0x70] sm:$0xff] }
 0x39d   : > { %1639 = vst.msk [vmem:[#allocation3 + $0xb8] sm:$0xff] %vm1615_vm7, %v1566_v23 }
 0x39e   : > { %1833 = vst.msk [vmem:[#allocation3 + $0xb8] sm:$0xff] %vm1809_vm8, %v1760_v58 }
 0x3a1   : > { %v2424_v10 = vpop.f32.mrf.mxu3  ;;  %v2146_v29 = vpop.permute.xlu0 %2145 }
 0x3a2   : > { %v2425_v16 = vadd.f32 %v4431_v3, %v2424_v10  ;;  %v1758_v25 = vpop.permute.xlu1 %1757  ;;  %v1580_v24 = vpop.permute.xlu2 %1579 }
 0x3a3   : > { %1832 = vst.msk [vmem:[#allocation3 + $0xb0] sm:$0xff] %vm1809_vm8, %v1758_v25 }
 0x3a4   : > { %v2467_v44 = vmax.f32 %v2425_v16, 0.0  ;;  %2025 = vst.msk [vmem:[#allocation3 + $0xb0] sm:$0xff] %vm2002_vm9, %v1951_v28 }
 0x3a5   : > { %2218 = vst.msk [vmem:[#allocation3 + $0xb0] sm:$0xff] %vm2195_vm11, %v2144_v41 }
 0x3a6   : > { %v4501_v37 = vpack.c.bf16 %v2467_v44, %v2466_v36  ;;  %v2983_v36 = vld [vmem:[%s3242_s16 + $0x78] sm:$0xff] }
 0x3a9   : > { %v1387_v17 = vpop.permute.xlu0 %1386 }
 0x3aa   : > { %v1953_v38 = vpop.permute.xlu1 %1952  ;;  %v1776_v8 = vpop.permute.xlu2 %1775 }
 0x3ab   : > { %2026 = vst.msk [vmem:[#allocation3 + $0xb8] sm:$0xff] %vm2002_vm9, %v1953_v38 }
 0x3ac   : > { %2219 = vst.msk [vmem:[#allocation3 + $0xb8] sm:$0xff] %vm2195_vm11, %v2146_v29  ;;  %v2250_v54 = vld [vmem:[#allocation3 + $0xb0] sm:$0xff] }
 0x3ad   : > { %v2580_v40 = vpop.f32.mrf.mxu2 }
 0x3ae   : > { %v2581_v61 = vadd.f32 %v4164_v11, %v2580_v40 }
 0x3b0   : > { %v2645_v47 = vadd.f32 %v2977_v60, %v2581_v61 }
 0x3b1   : > { %v1582_v14 = vpop.permute.xlu0 %1581 }
 0x3b2   : > { %v2677_v30 = vmax.f32 %v2645_v47, 0.0  ;;  %v1194_v33 = vpop.permute.xlu1 %1193  ;;  %v2160_v32 = vpop.permute.xlu2 %2159 }
 0x3b3   : > { %1260 = vst.msk [vmem:[#allocation3 + $0xf0] sm:$0xff] %vm1229_vm5, %v1194_v33  ;;  %v2251_v46 = vld [vmem:[#allocation3 + $0xb8] sm:$0xff] }
 0x3b4   : > { %2709 = vst.msk [vmem:[%s4183_s23 + $0x50] sm:$0xff] %vm360_vm0, %v2677_v30  ;;  %v2407_v7 = vpop.f32.mrf.mxu1  ;;  %v2271_v48 = vpack.c.bf16 %v2251_v46, %v2250_v54  ;;  %v2984_v46 = vld [vmem:[%s3242_s16 + $0x80] sm:$0xff] }
 0x3b5   : > { %1453 = vst.msk [vmem:[#allocation3 + $0xf0] sm:$0xff] %vm1422_vm6, %v1387_v17  ;;  %v2582_v43 = vpop.f32.mrf.mxu2  ;;  %v2408_v62 = vadd.f32 %v4431_v3, %v2407_v7 }
 0x3b6   : > { %1646 = vst.msk [vmem:[#allocation3 + $0xf0] sm:$0xff] %vm1615_vm7, %v1580_v24  ;;  %v2583_v20 = vadd.f32 %v4164_v11, %v2582_v43  ;;  %2868 = vmatmul.msk.bf16.gmra.mxu1 %vm2300_vm12, %v2271_v48 }
 0x3b7   : > { %v2460_v49 = vmax.f32 %v2408_v62, 0.0 }
 0x3b8   : > { %v2646_v34 = vadd.f32 %v2978_v52, %v2583_v20 }
 0x3b9   : > { %v1967_v59 = vpop.permute.xlu0 %1966 }
 0x3ba   : > { %v2678_v53 = vmax.f32 %v2646_v34, 0.0  ;;  %v1389_v45 = vpop.permute.xlu1 %1388 }
 0x3bb   : > { %1454 = vst.msk [vmem:[#allocation3 + $0xf8] sm:$0xff] %vm1422_vm6, %v1389_v45 }
 0x3bc   : > { %2710 = vst.msk [vmem:[%s4183_s23 + $0x58] sm:$0xff] %vm360_vm0, %v2678_v53  ;;  %v2409_v19 = vpop.f32.mrf.mxu1 }
 0x3bd   : > { %1647 = vst.msk [vmem:[#allocation3 + $0xf8] sm:$0xff] %vm1615_vm7, %v1582_v14  ;;  %v2410_v31 = vadd.f32 %v4431_v3, %v2409_v19  ;;  %v2985_v14 = vld [vmem:[%s3242_s16 + $0x88] sm:$0xff] }
 0x3be   : > { %1841 = vst.msk [vmem:[#allocation3 + $0xf8] sm:$0xff] %vm1809_vm8, %v1776_v8 }
 0x3bf   : > { %v2461_v5 = vmax.f32 %v2410_v31, 0.0 }
 0x3c1   : > { %v2483_v56 = vpack.c.bf16 %v2461_v5, %v2460_v49  ;;  %v2162_v2 = vpop.permute.xlu0 %2161 }
 0x3c2   : > { %v1774_v26 = vpop.permute.xlu1 %1773 }
 0x3c3   : > { %1840 = vst.msk [vmem:[#allocation3 + $0xf0] sm:$0xff] %vm1809_vm8, %v1774_v26  ;;  %2882 = vmatmul.msk.bf16.gmra.mxu2 %vm530_vm1, %v2483_v56 }
 0x3c4   : > { %2033 = vst.msk [vmem:[#allocation3 + $0xf0] sm:$0xff] %vm2002_vm9, %v1967_v59 }
 0x3c5   : > { %2226 = vst.msk [vmem:[#allocation3 + $0xf0] sm:$0xff] %vm2195_vm11, %v2160_v32 }
 0x3ca   : > { %v1969_v4 = vpop.permute.xlu1 %1968 }
 0x3cb   : > { %2034 = vst.msk [vmem:[#allocation3 + $0xf8] sm:$0xff] %vm2002_vm9, %v1969_v4 }
 0x3cc   : > { %2227 = vst.msk [vmem:[#allocation3 + $0xf8] sm:$0xff] %vm2195_vm11, %v2162_v2  ;;  %v2258_v1 = vld [vmem:[#allocation3 + $0xf0] sm:$0xff] }
 0x3cd   : > { %v2585_v6 = vpop.f32.mrf.mxu2 }
 0x3ce   : > { %v2586_v13 = vadd.f32 %v4164_v11, %v2585_v6 }
 0x3d0   : > { %v2647_v12 = vadd.f32 %v2979_v0, %v2586_v13  ;;  %v2986_v0 = vld [vmem:[%s3242_s16 + $0x90] sm:$0xff] }
 0x3d2   : > { %v2679_v58 = vmax.f32 %v2647_v12, 0.0 }
 0x3d3   : > { %v2259_v63 = vld [vmem:[#allocation3 + $0xf8] sm:$0xff] }
 0x3d4   : > { %2711 = vst.msk [vmem:[%s4183_s23 + $0x60] sm:$0xff] %vm360_vm0, %v2679_v58  ;;  %v2275_v22 = vpack.c.bf16 %v2259_v63, %v2258_v1 }
 0x3d5   : > { %v2587_v55 = vpop.f32.mrf.mxu2 }
 0x3d6   : > { %v2588_v27 = vadd.f32 %v4164_v11, %v2587_v55  ;;  %2872 = vmatmul.msk.bf16.gmra.mxu3 %vm2300_vm12, %v2275_v22  ;;  %v2987_v22 = vld [vmem:[%s3242_s16 + $0x98] sm:$0xff] }
 0x3d8   : > { %v2648_v23 = vadd.f32 %v2980_v51, %v2588_v27 }
 0x3d9   : > { %v2427_v15 = vpop.f32.mrf.mxu3 }
 0x3da   : > { %v2680_v41 = vmax.f32 %v2648_v23, 0.0  ;;  %v2428_v42 = vadd.f32 %v4431_v3, %v2427_v15 }
 0x3dc   : > { %2712 = vst.msk [vmem:[%s4183_s23 + $0x68] sm:$0xff] %vm360_vm0, %v2680_v41  ;;  %v2468_v39 = vmax.f32 %v2428_v42, 0.0 }
 0x3e1   : > { %v2429_v18 = vpop.f32.mrf.mxu3 }
 0x3e2   : > { %v2430_v21 = vadd.f32 %v4431_v3, %v2429_v18 }
 0x3e4   : > { %v2469_v50 = vmax.f32 %v2430_v21, 0.0 }
 0x3e6   : > { %v2487_v11 = vpack.c.bf16 %v2469_v50, %v2468_v39  ;;  %v2590_v28 = vpop.f32.mrf.mxu2  ;;  %v2988_v50 = vld [vmem:[%s3242_s16 + $0xd0] sm:$0xff] }
 0x3e7   : > { %v2591_v35 = vadd.f32 %v4542_v57, %v2590_v28 }
 0x3e8   : > { %2886 = vmatmul.msk.bf16.vlgmr.msra.gmra.mxu3 %vm530_vm1, %v2487_v11 }
 0x3e9   : > { %v2649_v10 = vadd.f32 %v2982_v9, %v2591_v35  ;;  %v2989_v9 = vld [vmem:[%s3242_s16 + $0xd8] sm:$0xff] }
 0x3eb   : > { %v2681_v16 = vmax.f32 %v2649_v10, 0.0 }
 0x3ed   : > { %2713 = vst.msk [vmem:[%s4183_s23 + $0x70] sm:$0xff] %vm360_vm0, %v2681_v16 }
 0x3ee   : > { %v2592_v25 = vpop.f32.mrf.mxu2 }
 0x3ef   : > { %v2593_v29 = vadd.f32 %v4542_v57, %v2592_v25 }
 0x3f1   : > { %v2650_v44 = vadd.f32 %v2983_v36, %v2593_v29  ;;  %v2990_v36 = vld [vmem:[%s3242_s16 + $0xa0] sm:$0xff] }
 0x3f3   : > { %v2682_v38 = vmax.f32 %v2650_v44, 0.0  ;;  %v2412_v17 = vpop.f32.mrf.mxu1 }
 0x3f4   : > { %v2413_v40 = vadd.f32 %v4431_v3, %v2412_v17 }
 0x3f5   : > { %2714 = vst.msk [vmem:[%s4183_s23 + $0x78] sm:$0xff] %vm360_vm0, %v2682_v38 }
 0x3f6   : > { %v2462_v60 = vmax.f32 %v2413_v40, 0.0 }
 0x3fb   : > { %v2414_v61 = vpop.f32.mrf.mxu1 }
 0x3fc   : > { %v2415_v24 = vadd.f32 %v4431_v3, %v2414_v61  ;;  %v2991_v61 = vld [vmem:[%s3242_s16 + $0xa8] sm:$0xff] }
 0x3fe   : > { %v2463_v47 = vmax.f32 %v2415_v24, 0.0 }
 0x400   : > { %v2484_v30 = vpack.c.bf16 %v2463_v47, %v2462_v60 }
 0x402   : > { %2883 = vmatmul.msk.bf16.gmra.mxu2 %vm530_vm1, %v2484_v30 }
 0x405   : > { %v2595_v33 = vpop.f32.mrf.mxu2 }
 0x406   : > { %v2596_v54 = vadd.f32 %v4542_v57, %v2595_v33  ;;  %v2992_v33 = vld [vmem:[%s3242_s16 + $0xe0] sm:$0xff] }
 0x408   : > { %v2651_v7 = vadd.f32 %v2984_v46, %v2596_v54 }
 0x40a   : > { %v2683_v48 = vmax.f32 %v2651_v7, 0.0 }
 0x40c   : > { %2715 = vst.msk [vmem:[%s4183_s23 + $0x80] sm:$0xff] %vm360_vm0, %v2683_v48 }
 0x40d   : > { %v2597_v43 = vpop.f32.mrf.mxu2 }
 0x40e   : > { %v2598_v20 = vadd.f32 %v4542_v57, %v2597_v43  ;;  %v2993_v43 = vld [vmem:[%s3242_s16 + $0xe8] sm:$0xff] }
 0x410   : > { %v2652_v52 = vadd.f32 %v2985_v14, %v2598_v20 }
 0x412   : > { %v2684_v34 = vmax.f32 %v2652_v52, 0.0 }
 0x414   : > { %2716 = vst.msk [vmem:[%s4183_s23 + $0x88] sm:$0xff] %vm360_vm0, %v2684_v34 }
 0x41a   : > { %v2432_v8 = vpop.f32.mrf.mxu3 }
 0x41b   : > { %v2433_v53 = vadd.f32 %v4431_v3, %v2432_v8  ;;  %v2994_v8 = vld [vmem:[%s3242_s16 + $0xb0] sm:$0xff] }
 0x41d   : > { %v2470_v19 = vmax.f32 %v2433_v53, 0.0 }
 0x422   : > { %v2434_v45 = vpop.f32.mrf.mxu3 }
 0x423   : > { %v2435_v62 = vadd.f32 %v4431_v3, %v2434_v45 }
 0x425   : > { %v2471_v31 = vmax.f32 %v2435_v62, 0.0 }
 0x427   : > { %v2488_v49 = vpack.c.bf16 %v2471_v31, %v2470_v19  ;;  %v2995_v31 = vld [vmem:[%s3242_s16 + $0xb8] sm:$0xff] }
 0x429   : > { %2887 = vmatmul.msk.bf16.gmra.mxu3 %vm530_vm1, %v2488_v49 }
 0x433   : > { %v2417_v5 = vpop.f32.mrf.mxu1 }
 0x434   : > { %v2418_v59 = vadd.f32 %v4431_v3, %v2417_v5 }
 0x436   : > { %v2464_v32 = vmax.f32 %v2418_v59, 0.0 }
 0x43b   : > { %v2419_v56 = vpop.f32.mrf.mxu1 }
 0x43c   : > { %v2420_v26 = vadd.f32 %v4431_v3, %v2419_v56 }
 0x43e   : > { %v2465_v2 = vmax.f32 %v2420_v26, 0.0  ;;  %v2996_v26 = vld [vmem:[%s3242_s16 + $0xc0] sm:$0xff] }
 0x440   : > { %v2485_v4 = vpack.c.bf16 %v2465_v2, %v2464_v32 }
 0x442   : > { %2884 = vmatmul.msk.bf16.gmra.mxu2 %vm530_vm1, %v2485_v4 }
 0x446   : > { %v2600_v6 = vpop.f32.mrf.mxu2 }
 0x447   : > { %v2601_v13 = vadd.f32 %v4542_v57, %v2600_v6 }
 0x449   : > { %v2653_v12 = vadd.f32 %v2986_v0, %v2601_v13  ;;  %v2997_v13 = vld [vmem:[%s3242_s16 + $0xc8] sm:$0xff] }
 0x44b   : > { %v2685_v1 = vmax.f32 %v2653_v12, 0.0 }
 0x44d   : > { %2717 = vst.msk [vmem:[%s4183_s23 + $0x90] sm:$0xff] %vm360_vm0, %v2685_v1 }
 0x44e   : > { %v2602_v58 = vpop.f32.mrf.mxu2 }
 0x44f   : > { %v2603_v63 = vadd.f32 %v4542_v57, %v2602_v58 }
 0x451   : > { %v2654_v55 = vadd.f32 %v2987_v22, %v2603_v63  ;;  %v2998_v63 = vld [vmem:[%s3242_s16 + $0xf0] sm:$0xff] }
 0x452   : > { %2885 = vmatmul.msk.bf16.gmra.mxu2 %vm530_vm1, %v4501_v37 }
 0x453   : > { %v2686_v27 = vmax.f32 %v2654_v55, 0.0 }
 0x455   : > { %2718 = vst.msk [vmem:[%s4183_s23 + $0x98] sm:$0xff] %vm360_vm0, %v2686_v27 }
 0x459   : > { %v2437_v51 = vpop.f32.mrf.mxu3 }
 0x45a   : > { %v2438_v23 = vadd.f32 %v4431_v3, %v2437_v51 }
 0x45c   : > { %v2472_v42 = vmax.f32 %v2438_v23, 0.0  ;;  %v2999_v23 = vld [vmem:[%s3242_s16 + $0xf8] sm:$0xff] }
 0x461   : > { %v2439_v15 = vpop.f32.mrf.mxu3 }
 0x462   : > { %v2440_v41 = vadd.f32 %v4431_v3, %v2439_v15 }
 0x464   : > { %v2473_v18 = vmax.f32 %v2440_v41, 0.0 }
 0x466   : > { %v2489_v21 = vpack.c.bf16 %v2473_v18, %v2472_v42 }
 0x468   : > { %2888 = vmatmul.msk.bf16.gmra.mxu3 %vm530_vm1, %v2489_v21 }
 0x46b   : > { %v2620_v39 = vpop.f32.mrf.mxu3 }
 0x46c   : > { %v2621_v37 = vadd.f32 %v4542_v57, %v2620_v39 }
 0x46e   : > { %v2661_v11 = vadd.f32 %v2988_v50, %v2621_v37 }
 0x470   : > { %v2693_v28 = vmax.f32 %v2661_v11, 0.0 }
 0x472   : > { %2725 = vst.msk [vmem:[%s4183_s23 + $0xd0] sm:$0xff] %vm360_vm0, %v2693_v28 }
 0x473   : > { %v2622_v35 = vpop.f32.mrf.mxu3 }
 0x474   : > { %v2623_v3 = vadd.f32 %v4542_v57, %v2622_v35 }
 0x476   : > { %v2662_v10 = vadd.f32 %v2989_v9, %v2623_v3 }
 0x478   : > { %v2694_v16 = vmax.f32 %v2662_v10, 0.0 }
 0x47a   : > { %2726 = vst.msk [vmem:[%s4183_s23 + $0xd8] sm:$0xff] %vm360_vm0, %v2694_v16 }
 0x485   : > { %v2605_v25 = vpop.f32.mrf.mxu2 }
 0x486   : > { %v2606_v29 = vadd.f32 %v4542_v57, %v2605_v25 }
 0x488   : > { %v2655_v44 = vadd.f32 %v2990_v36, %v2606_v29 }
 0x48a   : > { %v2687_v38 = vmax.f32 %v2655_v44, 0.0 }
 0x48c   : > { %2719 = vst.msk [vmem:[%s4183_s23 + $0xa0] sm:$0xff] %vm360_vm0, %v2687_v38 }
 0x48d   : > { %v2607_v17 = vpop.f32.mrf.mxu2 }
 0x48e   : > { %v2608_v40 = vadd.f32 %v4542_v57, %v2607_v17 }
 0x490   : > { %v2656_v24 = vadd.f32 %v2991_v61, %v2608_v40 }
 0x492   : > { %v2688_v60 = vmax.f32 %v2656_v24, 0.0 }
 0x494   : > { %2720 = vst.msk [vmem:[%s4183_s23 + $0xa8] sm:$0xff] %vm360_vm0, %v2688_v60 }
 0x4ac   : > { %v2625_v47 = vpop.f32.mrf.mxu3 }
 0x4ad   : > { %v2626_v30 = vadd.f32 %v4542_v57, %v2625_v47 }
 0x4af   : > { %v2663_v54 = vadd.f32 %v2992_v33, %v2626_v30 }
 0x4b1   : > { %v2695_v46 = vmax.f32 %v2663_v54, 0.0 }
 0x4b3   : > { %2727 = vst.msk [vmem:[%s4183_s23 + $0xe0] sm:$0xff] %vm360_vm0, %v2695_v46 }
 0x4b4   : > { %v2627_v7 = vpop.f32.mrf.mxu3 }
 0x4b5   : > { %v2628_v48 = vadd.f32 %v4542_v57, %v2627_v7 }
 0x4b7   : > { %v2664_v20 = vadd.f32 %v2993_v43, %v2628_v48 }
 0x4b9   : > { %v2696_v14 = vmax.f32 %v2664_v20, 0.0 }
 0x4bb   : > { %2728 = vst.msk [vmem:[%s4183_s23 + $0xe8] sm:$0xff] %vm360_vm0, %v2696_v14 }
 0x4c5   : > { %v2610_v52 = vpop.f32.mrf.mxu2 }
 0x4c6   : > { %v2611_v34 = vadd.f32 %v4542_v57, %v2610_v52 }
 0x4c8   : > { %v2657_v53 = vadd.f32 %v2994_v8, %v2611_v34 }
 0x4ca   : > { %v2689_v45 = vmax.f32 %v2657_v53, 0.0 }
 0x4cc   : > { %2721 = vst.msk [vmem:[%s4183_s23 + $0xb0] sm:$0xff] %vm360_vm0, %v2689_v45 }
 0x4cd   : > { %v2612_v62 = vpop.f32.mrf.mxu2 }
 0x4ce   : > { %v2613_v19 = vadd.f32 %v4542_v57, %v2612_v62 }
 0x4d0   : > { %v2658_v49 = vadd.f32 %v2995_v31, %v2613_v19 }
 0x4d2   : > { %v2690_v5 = vmax.f32 %v2658_v49, 0.0 }
 0x4d4   : > { %2722 = vst.msk [vmem:[%s4183_s23 + $0xb8] sm:$0xff] %vm360_vm0, %v2690_v5 }
 0x4d5   : > { %v2615_v59 = vpop.f32.mrf.mxu2 }
 0x4d6   : > { %v2616_v56 = vadd.f32 %v4542_v57, %v2615_v59 }
 0x4d8   : > { %v2659_v32 = vadd.f32 %v2996_v26, %v2616_v56 }
 0x4da   : > { %v2691_v2 = vmax.f32 %v2659_v32, 0.0 }
 0x4dc   : > { %2723 = vst.msk [vmem:[%s4183_s23 + $0xc0] sm:$0xff] %vm360_vm0, %v2691_v2 }
 0x4dd   : > { %v2617_v4 = vpop.f32.mrf.mxu2 }
 0x4de   : > { %v2618_v6 = vadd.f32 %v4542_v57, %v2617_v4 }
 0x4e0   : > { %v2660_v0 = vadd.f32 %v2997_v13, %v2618_v6 }
 0x4e2   : > { %v2692_v12 = vmax.f32 %v2660_v0, 0.0 }
 0x4e4   : > { %2724 = vst.msk [vmem:[%s4183_s23 + $0xc8] sm:$0xff] %vm360_vm0, %v2692_v12 }
 0x4eb   : > { %v2630_v1 = vpop.f32.mrf.mxu3 }
 0x4ec   : > { %v2631_v58 = vadd.f32 %v4542_v57, %v2630_v1 }
 0x4ee   : > { %v2665_v22 = vadd.f32 %v2998_v63, %v2631_v58 }
 0x4f0   : > { %v2697_v55 = vmax.f32 %v2665_v22, 0.0 }
 0x4f2   : > { %2729 = vst.msk [vmem:[%s4183_s23 + $0xf0] sm:$0xff] %vm360_vm0, %v2697_v55 }
 0x4f3   : > { %v2632_v27 = vpop.f32.mrf.mxu3 }
 0x4f4   : > { %v2633_v51 = vadd.f32 %v4542_v57, %v2632_v27 }
 0x4f6   : > { %v2666_v15 = vadd.f32 %v2999_v23, %v2633_v51 }
 0x4f8   : > { %v2698_v41 = vmax.f32 %v2666_v15, 0.0 }
 0x4fa   : > { %2730 = vst.msk [vmem:[%s4183_s23 + $0xf8] sm:$0xff] %vm360_vm0, %v2698_v41 }
 0x4fb   : > { %3057 = shalt.err (!%p3054_p4)
}
 0x4fc   : > { %s3109_s22 = smov 128  }
 0x4fd   : > { %2906 = dma.vmem_to_hbm [thread:$0]  (%p3200_p11), %s2745_s17, 4096, %s2747_s12, %s2732_s28, %s3109_s22, %s3109_s22, %s3102_s29  }
 0x4fe PF: > { %s2761_s23 = sand.u32 1, %s3084_s24   ;;  %p4680_p7 = scmp.ge.s32.totalorder %s3096_s27, 2 }
 0x4ff   : > { %s2762_s15 = scalar_lea.sflag [#allocation6], %s2761_s23 }
 0x500   : > { %p2913_p5 = pnand %p4680_p7, %p3204_p12 }
 0x502   : > { %p2914_p8 = pneg %p2913_p5 }
 0x504   : > { %3079 = dma.done.wait (%p2914_p8), %s2762_s15, 4096  }
 0x505   : > { %3081 = vsyncadd (%p2914_p8), %s2762_s15, 4294963200  ;;  %s4681_s20 = sld [smem:[#allocation10_spill]]  ;;  %p20_p10 = scmp.ge.s32.totalorder %s3175_s30, 4  }
 0x506   : > { %s4682_s24 = smov %s3088_s25  ;;  %s4683_s25 = smov %s3092_s26 }
 0x507   : > { %s4685_s27 = smov %s3175_s30  ;;  %22 = sbr.rel (!%p20_p10) target bundleno = 5 (0x5), region = 95 }
 0x50b   : > { %s4684_s26 = smov %s4681_s20 }
 0x50c   :  { %2768 = vsyncpa [#allocation5], 1 }
 0x50d   :  { %2770 = vsyncpa [#allocation5 + $0x1], 1 }
 0x50e   :  { %2771 = vsyncpa [#allocation6], 1 }
 0x50f   :  { %2773 = vsyncpa [#allocation6 + $0x1], 1 }

</bundles_post_ra>
